<compile_context>
chip_gen: v7x
topology: tpu7x:2x2x1
jax: 0.10.0
libtpu: 0.0.40
codegen_flags: <defaults>
</compile_context>

<pallas_src>
import jax
import jax.numpy as jnp
import numpy as np
from jax.experimental import pallas as pl
from jax.experimental.pallas import tpu as pltpu


def _round_up(a, b):
    return ((a + b - 1) // b) * b


# ----------------------------------------------------------------------------
# Pallas kernel: fused projection + (folded) embedding + MLP + output head
# ----------------------------------------------------------------------------
def _mine_kernel(
    x_ref, y_ref,
    wp_ref, cp_ref,            # x projection: BN-scale-folded weight, folded shift
    w1h_ref, e1_ref, c1_ref,   # layer 1: x-part weight, emb-folded weight, shift
    w2_ref, c2_ref,            # layer 2
    w3_ref, c3_ref,            # layer 3
    wo_ref, bo_ref,            # output head: (1, d3) row weight, (1, 1) bias
    out_ref,
):
    x = x_ref[...]                                      # (tn, x_dim)
    tn = x.shape[0]

    # --- x projection: Linear(+BN scale folded) -> shift -> ReLU (Dropout = id) ---
    h = jnp.dot(x, wp_ref[...], preferred_element_type=jnp.float32)
    h = jnp.maximum(h + cp_ref[...], 0.0)               # (tn, proj_dim)

    # --- embedding folded through layer 1 -----------------------------------
    # Original: f1_pre = concat([h, emb[y0], emb[y1], ...]) @ W1
    # Folded  : f1_pre = h @ W1'[:P]  +  onehot_all @ concat_f(emb @ W1'[P+f*E:P+(f+1)*E])
    # where onehot_all is ONE combined (tn, cf*vocab) one-hot: no lane concats,
    # no per-frame micro-matmuls, no gathers.
    y = y_ref[...]                                      # (tn, cf) int32
    cf = y.shape[1]
    cfv = e1_ref.shape[0]                               # cf * vocab
    vocab = cfv // cf
    lane = jax.lax.broadcasted_iota(jnp.int32, (tn, cfv), 1)
    hit = lane == y[:, 0:1]                             # frame 0 lives in lanes [0, vocab)
    for f in range(1, cf):                              # static, tiny loop (cf is small)
        hit = jnp.logical_or(hit, lane == (y[:, f:f + 1] + f * vocab))
    onehot = hit.astype(jnp.float32)                    # (tn, cf*vocab)

    f1 = jnp.dot(h, w1h_ref[...], preferred_element_type=jnp.float32)
    f1 = f1 + jnp.dot(onehot, e1_ref[...], preferred_element_type=jnp.float32)
    f1 = jnp.maximum(f1 + c1_ref[...], 0.0)

    f2 = jnp.maximum(
        jnp.dot(f1, w2_ref[...], preferred_element_type=jnp.float32) + c2_ref[...], 0.0)
    f3 = jnp.maximum(
        jnp.dot(f2, w3_ref[...], preferred_element_type=jnp.float32) + c3_ref[...], 0.0)

    # --- output head: width-1 matmul replaced by VPU multiply + lane reduce ---
    # (Output writeback is tiny (tn x 1 f32); not worth a transpose to lane-dense.)
    out_ref[...] = jnp.sum(f3 * wo_ref[...], axis=-1, keepdims=True) + bo_ref[...]


def _fold_bn(bias, gamma, beta, running_mean, running_var, eps=1e-5):
    """Fold Linear bias + eval-mode BatchNorm into (scale, shift): out = z*scale + shift."""
    scale = gamma / jnp.sqrt(running_var + eps)
    shift = beta + (bias - running_mean) * scale
    return scale.reshape(1, -1), shift.reshape(1, -1)


def fold_params(p, cf):
    """One-time constant folds:
       * BN scale folded into each weight matrix (W' = W * scale, col-wise),
       * embedding folded through the (BN-scaled) layer-1 weight,
       * output weight reshaped into a (1, d3) row for the VPU-reduce head."""
    proj_dim = p["wp"].shape[1]
    vocab, embed_dim = p["emb"].shape
    fp = {}
    fp["wp"] = p["wp"] * p["ap"]                       # (x_dim, P) * (1, P)
    fp["cp"] = p["cp"]
    w1 = p["w1"] * p["a1"]                             # (P + cf*E, d1) * (1, d1)
    fp["w1h"] = w1[:proj_dim]
    fp["e1"] = jnp.concatenate(
        [p["emb"] @ w1[proj_dim + f * embed_dim: proj_dim + (f + 1) * embed_dim]
         for f in range(cf)], axis=0)                  # (cf*vocab, d1)
    fp["c1"] = p["c1"]
    fp["w2"] = p["w2"] * p["a2"]
    fp["c2"] = p["c2"]
    fp["w3"] = p["w3"] * p["a3"]
    fp["c3"] = p["c3"]
    fp["wo"] = p["wo"].reshape(1, -1)                  # (1, d3)
    fp["bo"] = p["bo"].reshape(1, 1)
    return fp


# ----------------------------------------------------------------------------
# Wrapper
# ----------------------------------------------------------------------------
def mine_forward_pallas(x, y, fp, *, tn=512):
    """x: [N, x_dim] f32, y: [N, context_frames] int32  ->  [N, 1] f32 (eval-mode)."""
    N, x_dim = x.shape
    cf = y.shape[1]

    # Batch tile: large (amortize per-step overhead), multiple of 8, never larger
    # than the padded batch.  Pad so the tail tile is covered (then slice back).
    tn = max(8, min(_round_up(tn, 8), _round_up(N, 8)))
    n_pad = _round_up(N, tn)
    if n_pad != N:
        x = jnp.pad(x, ((0, n_pad - N), (0, 0)))
        y = jnp.pad(y, ((0, n_pad - N), (0, 0)))        # pads with index 0 (valid)
    n_tiles = n_pad // tn

    # Constant index_maps keep weights VMEM-resident across the whole batch grid.
    # (At real model sizes, single-buffer them via pipeline_mode=pl.Buffered(1) to
    #  halve their VMEM footprint; negligible at these sizes.)
    full = lambda a: pl.BlockSpec(a.shape, lambda i: (0,) * a.ndim)

    out = pl.pallas_call(
        _mine_kernel,
        out_shape=jax.ShapeDtypeStruct((n_pad, 1), jnp.float32),
        grid=(n_tiles,),
        in_specs=[
            pl.BlockSpec((tn, x_dim), lambda i: (i, 0)),
            pl.BlockSpec((tn, cf), lambda i: (i, 0)),
            full(fp["wp"]), full(fp["cp"]),
            full(fp["w1h"]), full(fp["e1"]), full(fp["c1"]),
            full(fp["w2"]), full(fp["c2"]),
            full(fp["w3"]), full(fp["c3"]),
            full(fp["wo"]), full(fp["bo"]),
        ],
        out_specs=pl.BlockSpec((tn, 1), lambda i: (i, 0)),
        compiler_params=pltpu.CompilerParams(
            dimension_semantics=("parallel",)),
    )(x, y,
      fp["wp"], fp["cp"],
      fp["w1h"], fp["e1"], fp["c1"],
      fp["w2"], fp["c2"],
      fp["w3"], fp["c3"],
      fp["wo"], fp["bo"])

    return out[:N]


# ----------------------------------------------------------------------------
# Pure-JAX reference (original, un-fused math) for correctness check
# ----------------------------------------------------------------------------
def mine_forward_ref(x, y, params):
    emb = params["emb"]
    h = jnp.maximum(x @ params["wp"] * params["ap"] + params["cp"], 0.0)
    y_emb = jnp.concatenate([emb[y[:, f]] for f in range(y.shape[1])], axis=1)
    feat = jnp.concatenate([h, y_emb], axis=1)
    f1 = jnp.maximum(feat @ params["w1"] * params["a1"] + params["c1"], 0.0)
    f2 = jnp.maximum(f1 @ params["w2"] * params["a2"] + params["c2"], 0.0)
    f3 = jnp.maximum(f2 @ params["w3"] * params["a3"] + params["c3"], 0.0)
    return f3 @ params["wo"] + params["bo"]


# ----------------------------------------------------------------------------
# Deterministic parameter construction (synthetic — no checkpoint loading)
# ----------------------------------------------------------------------------
def make_params(key, x_dim, vocab_size, embedding_dim, hidden_dims, x_proj_dim, cf):
    keys = jax.random.split(key, 16)
    eps = 1e-5

    def linear(k, din, dout, std=None):
        std = std if std is not None else 1.0 / np.sqrt(din)
        w = jax.random.normal(k, (din, dout), jnp.float32) * std
        b = jnp.zeros((dout,), jnp.float32)
        return w, b

    def bn_stats(k, d):
        # Non-trivial running statistics (as after training) so the BN fold is
        # genuinely exercised; eval-mode formula is unchanged.
        k1, k2, k3, k4 = jax.random.split(k, 4)
        gamma = 1.0 + 0.1 * jax.random.normal(k1, (d,), jnp.float32)
        beta = 0.1 * jax.random.normal(k2, (d,), jnp.float32)
        mean = 0.1 * jax.random.normal(k3, (d,), jnp.float32)
        var = 0.5 + jax.random.uniform(k4, (d,), jnp.float32)   # in [0.5, 1.5)
        return gamma, beta, mean, var

    p = {}
    # x projection
    wp, bp = linear(keys[0], x_dim, x_proj_dim)
    p["wp"] = wp
    p["ap"], p["cp"] = _fold_bn(bp, *bn_stats(keys[7], x_proj_dim), eps)
    # y embedding table (torch default: N(0, 1))
    p["emb"] = jax.random.normal(keys[1], (vocab_size, embedding_dim), jnp.float32)
    # MLP
    mlp_in = x_proj_dim + embedding_dim * cf
    dims = [mlp_in] + list(hidden_dims)
    for li in range(3):
        w, b = linear(keys[2 + li], dims[li], dims[li + 1])
        a, c = _fold_bn(b, *bn_stats(keys[8 + li], dims[li + 1]), eps)
        p[f"w{li+1}"], p[f"a{li+1}"], p[f"c{li+1}"] = w, a, c
    # output layer: N(0, 0.01), bias 0
    p["wo"] = jax.random.normal(keys[6], (dims[-1], 1), jnp.float32) * 0.01
    p["bo"] = jnp.zeros((1, 1), jnp.float32)
    return p


if __name__ == "__main__":
    # Small, forward-consistent shapes.  N is deliberately NOT a multiple of the
    # batch tile so the padding path is exercised; tn=512 gives a 2-step grid
    # (megacore-friendly) while amortizing per-step pipeline overhead.
    N = 1000
    x_dim = 8
    x_proj_dim = 16
    vocab_size = 32
    embedding_dim = 8
    context_frames = 2
    hidden_dims = [32, 32, 16]

    key = jax.random.PRNGKey(0)
    kx, ky, kp = jax.random.split(key, 3)
    x = jax.random.normal(kx, (N, x_dim), jnp.float32)
    y = jax.random.randint(ky, (N, context_frames), 0, vocab_size, jnp.int32)

    params = make_params(kp, x_dim, vocab_size, embedding_dim, hidden_dims,
                         x_proj_dim, context_frames)

    # One-time constant folds (outside the per-call path).
    folded = fold_params(params, context_frames)

    # Per-call forward: single jitted XLA program wrapping the Pallas kernel.
    fwd = jax.jit(lambda xb, yb, fpb: mine_forward_pallas(xb, yb, fpb, tn=512))

    out = fwd(x, y, folded)
    out = jax.block_until_ready(out)

    ref = mine_forward_ref(x, y, params)
    np.testing.assert_allclose(np.asarray(out), np.asarray(ref), rtol=1e-4, atol=1e-4)
    assert out.shape == (N, 1)

    # TODO(synk): train-mode BatchNorm (batch statistics) and Dropout masking are not
    # modeled; this kernel implements the deterministic eval-mode forward pass.
    print("KERNEL_OK")
</pallas_src>

<mosaic_0001>
module attributes {stable_mosaic.version = 11 : i64} {
  func.func @_mine_kernel(%arg0: i32, %arg1: memref<512x8xf32, #tpu.memory_space<vmem>>, %arg2: memref<512x2xi32, #tpu.memory_space<vmem>>, %arg3: memref<8x16xf32, #tpu.memory_space<vmem>>, %arg4: memref<1x16xf32, #tpu.memory_space<vmem>>, %arg5: memref<16x32xf32, #tpu.memory_space<vmem>>, %arg6: memref<64x32xf32, #tpu.memory_space<vmem>>, %arg7: memref<1x32xf32, #tpu.memory_space<vmem>>, %arg8: memref<32x32xf32, #tpu.memory_space<vmem>>, %arg9: memref<1x32xf32, #tpu.memory_space<vmem>>, %arg10: memref<32x16xf32, #tpu.memory_space<vmem>>, %arg11: memref<1x16xf32, #tpu.memory_space<vmem>>, %arg12: memref<1x16xf32, #tpu.memory_space<vmem>>, %arg13: memref<1x1xf32, #tpu.memory_space<vmem>>, %arg14: memref<512x1xf32, #tpu.memory_space<vmem>>) attributes {dimension_semantics = [#tpu.dimension_semantics<parallel>], iteration_bounds = array<i64: 2>, scalar_prefetch = 0 : i64, scratch_operands = 0 : i64, tpu.core_type = #tpu.core_type<tc>, window_params = [{transform_indices = @transform_0, window_bounds = array<i64: 512, 8>}, {transform_indices = @transform_1, window_bounds = array<i64: 512, 2>}, {pipeline_mode = #tpu.pipeline_mode<synchronous>, transform_indices = @transform_2, window_bounds = array<i64: 8, 16>}, {pipeline_mode = #tpu.pipeline_mode<synchronous>, transform_indices = @transform_3, window_bounds = array<i64: 1, 16>}, {pipeline_mode = #tpu.pipeline_mode<synchronous>, transform_indices = @transform_4, window_bounds = array<i64: 16, 32>}, {pipeline_mode = #tpu.pipeline_mode<synchronous>, transform_indices = @transform_5, window_bounds = array<i64: 64, 32>}, {pipeline_mode = #tpu.pipeline_mode<synchronous>, transform_indices = @transform_6, window_bounds = array<i64: 1, 32>}, {pipeline_mode = #tpu.pipeline_mode<synchronous>, transform_indices = @transform_7, window_bounds = array<i64: 32, 32>}, {pipeline_mode = #tpu.pipeline_mode<synchronous>, transform_indices = @transform_8, window_bounds = array<i64: 1, 32>}, {pipeline_mode = #tpu.pipeline_mode<synchronous>, transform_indices = @transform_9, window_bounds = array<i64: 32, 16>}, {pipeline_mode = #tpu.pipeline_mode<synchronous>, transform_indices = @transform_10, window_bounds = array<i64: 1, 16>}, {pipeline_mode = #tpu.pipeline_mode<synchronous>, transform_indices = @transform_11, window_bounds = array<i64: 1, 16>}, {pipeline_mode = #tpu.pipeline_mode<synchronous>, transform_indices = @transform_12, window_bounds = array<i64: 1, 1>}, {transform_indices = @transform_13, window_bounds = array<i64: 512, 1>}]} {
    %c0 = arith.constant 0 : index
    %c0_0 = arith.constant 0 : index
    %0 = vector.load %arg1[%c0, %c0_0] : memref<512x8xf32, #tpu.memory_space<vmem>>, vector<512x8xf32>
    %c0_1 = arith.constant 0 : index
    %c0_2 = arith.constant 0 : index
    %1 = vector.load %arg3[%c0_1, %c0_2] : memref<8x16xf32, #tpu.memory_space<vmem>>, vector<8x16xf32>
    %cst = arith.constant dense<0.000000e+00> : vector<512x16xf32>
    %2 = tpu.matmul %0, %1, %cst {dimension_numbers = #tpu.dot_dimension_numbers<[1], [0], [0], [1], [0, 0, 1, 1], [], []>} : vector<512x8xf32>, vector<8x16xf32>, vector<512x16xf32> -> vector<512x16xf32>
    %c0_3 = arith.constant 0 : index
    %c0_4 = arith.constant 0 : index
    %3 = vector.load %arg4[%c0_3, %c0_4] : memref<1x16xf32, #tpu.memory_space<vmem>>, vector<1x16xf32>
    %4 = vector.broadcast %3 : vector<1x16xf32> to vector<512x16xf32>
    %5 = arith.addf %2, %4 : vector<512x16xf32>
    %cst_5 = arith.constant 0.000000e+00 : f32
    %6 = vector.broadcast %cst_5 : f32 to vector<512x16xf32>
    %7 = arith.maximumf %5, %6 : vector<512x16xf32>
    %c0_6 = arith.constant 0 : index
    %c0_7 = arith.constant 0 : index
    %8 = vector.load %arg2[%c0_6, %c0_7] : memref<512x2xi32, #tpu.memory_space<vmem>>, vector<512x2xi32>
    %9 = tpu.iota {dimensions = array<i32: 1>} : vector<512x64xi32>
    %10 = vector.extract_strided_slice %8 {offsets = [0, 0], sizes = [512, 1], strides = [1, 1]} : vector<512x2xi32> to vector<512x1xi32>
    %11 = vector.broadcast %10 : vector<512x1xi32> to vector<512x64xi32>
    %12 = arith.cmpi eq, %9, %11 : vector<512x64xi32>
    %13 = vector.extract_strided_slice %8 {offsets = [0, 1], sizes = [512, 1], strides = [1, 1]} : vector<512x2xi32> to vector<512x1xi32>
    %c32_i32 = arith.constant 32 : i32
    %14 = vector.broadcast %c32_i32 : i32 to vector<512x1xi32>
    %15 = arith.addi %13, %14 : vector<512x1xi32>
    %16 = vector.broadcast %15 : vector<512x1xi32> to vector<512x64xi32>
    %17 = arith.cmpi eq, %9, %16 : vector<512x64xi32>
    %18 = arith.ori %12, %17 : vector<512x64xi1>
    %19 = arith.extui %18 : vector<512x64xi1> to vector<512x64xi32>
    %20 = arith.sitofp %19 : vector<512x64xi32> to vector<512x64xf32>
    %c0_8 = arith.constant 0 : index
    %c0_9 = arith.constant 0 : index
    %21 = vector.load %arg5[%c0_8, %c0_9] : memref<16x32xf32, #tpu.memory_space<vmem>>, vector<16x32xf32>
    %cst_10 = arith.constant dense<0.000000e+00> : vector<512x32xf32>
    %22 = tpu.matmul %7, %21, %cst_10 {dimension_numbers = #tpu.dot_dimension_numbers<[1], [0], [0], [1], [0, 0, 1, 1], [], []>} : vector<512x16xf32>, vector<16x32xf32>, vector<512x32xf32> -> vector<512x32xf32>
    %c0_11 = arith.constant 0 : index
    %c0_12 = arith.constant 0 : index
    %23 = vector.load %arg6[%c0_11, %c0_12] : memref<64x32xf32, #tpu.memory_space<vmem>>, vector<64x32xf32>
    %cst_13 = arith.constant dense<0.000000e+00> : vector<512x32xf32>
    %24 = tpu.matmul %20, %23, %cst_13 {dimension_numbers = #tpu.dot_dimension_numbers<[1], [0], [0], [1], [0, 0, 1, 1], [], []>} : vector<512x64xf32>, vector<64x32xf32>, vector<512x32xf32> -> vector<512x32xf32>
    %25 = arith.addf %22, %24 : vector<512x32xf32>
    %c0_14 = arith.constant 0 : index
    %c0_15 = arith.constant 0 : index
    %26 = vector.load %arg7[%c0_14, %c0_15] : memref<1x32xf32, #tpu.memory_space<vmem>>, vector<1x32xf32>
    %27 = vector.broadcast %26 : vector<1x32xf32> to vector<512x32xf32>
    %28 = arith.addf %25, %27 : vector<512x32xf32>
    %cst_16 = arith.constant 0.000000e+00 : f32
    %29 = vector.broadcast %cst_16 : f32 to vector<512x32xf32>
    %30 = arith.maximumf %28, %29 : vector<512x32xf32>
    %c0_17 = arith.constant 0 : index
    %c0_18 = arith.constant 0 : index
    %31 = vector.load %arg8[%c0_17, %c0_18] : memref<32x32xf32, #tpu.memory_space<vmem>>, vector<32x32xf32>
    %cst_19 = arith.constant dense<0.000000e+00> : vector<512x32xf32>
    %32 = tpu.matmul %30, %31, %cst_19 {dimension_numbers = #tpu.dot_dimension_numbers<[1], [0], [0], [1], [0, 0, 1, 1], [], []>} : vector<512x32xf32>, vector<32x32xf32>, vector<512x32xf32> -> vector<512x32xf32>
    %c0_20 = arith.constant 0 : index
    %c0_21 = arith.constant 0 : index
    %33 = vector.load %arg9[%c0_20, %c0_21] : memref<1x32xf32, #tpu.memory_space<vmem>>, vector<1x32xf32>
    %34 = vector.broadcast %33 : vector<1x32xf32> to vector<512x32xf32>
    %35 = arith.addf %32, %34 : vector<512x32xf32>
    %cst_22 = arith.constant 0.000000e+00 : f32
    %36 = vector.broadcast %cst_22 : f32 to vector<512x32xf32>
    %37 = arith.maximumf %35, %36 : vector<512x32xf32>
    %c0_23 = arith.constant 0 : index
    %c0_24 = arith.constant 0 : index
    %38 = vector.load %arg10[%c0_23, %c0_24] : memref<32x16xf32, #tpu.memory_space<vmem>>, vector<32x16xf32>
    %cst_25 = arith.constant dense<0.000000e+00> : vector<512x16xf32>
    %39 = tpu.matmul %37, %38, %cst_25 {dimension_numbers = #tpu.dot_dimension_numbers<[1], [0], [0], [1], [0, 0, 1, 1], [], []>} : vector<512x32xf32>, vector<32x16xf32>, vector<512x16xf32> -> vector<512x16xf32>
    %c0_26 = arith.constant 0 : index
    %c0_27 = arith.constant 0 : index
    %40 = vector.load %arg11[%c0_26, %c0_27] : memref<1x16xf32, #tpu.memory_space<vmem>>, vector<1x16xf32>
    %41 = vector.broadcast %40 : vector<1x16xf32> to vector<512x16xf32>
    %42 = arith.addf %39, %41 : vector<512x16xf32>
    %cst_28 = arith.constant 0.000000e+00 : f32
    %43 = vector.broadcast %cst_28 : f32 to vector<512x16xf32>
    %44 = arith.maximumf %42, %43 : vector<512x16xf32>
    %c0_29 = arith.constant 0 : index
    %c0_30 = arith.constant 0 : index
    %45 = vector.load %arg12[%c0_29, %c0_30] : memref<1x16xf32, #tpu.memory_space<vmem>>, vector<1x16xf32>
    %46 = vector.broadcast %45 : vector<1x16xf32> to vector<512x16xf32>
    %47 = arith.mulf %44, %46 : vector<512x16xf32>
    %cst_31 = arith.constant dense<0.000000e+00> : vector<512xf32>
    %48 = vector.multi_reduction <add>, %47, %cst_31 [1] : vector<512x16xf32> to vector<512xf32>
    %49 = vector.shape_cast %48 : vector<512xf32> to vector<512x1xf32>
    %c0_32 = arith.constant 0 : index
    %c0_33 = arith.constant 0 : index
    %50 = vector.load %arg13[%c0_32, %c0_33] : memref<1x1xf32, #tpu.memory_space<vmem>>, vector<1x1xf32>
    %51 = vector.broadcast %50 : vector<1x1xf32> to vector<512x1xf32>
    %52 = arith.addf %49, %51 : vector<512x1xf32>
    %c0_34 = arith.constant 0 : index
    %c0_35 = arith.constant 0 : index
    %53 = vector.load %arg14[%c0_34, %c0_35] : memref<512x1xf32, #tpu.memory_space<vmem>>, vector<512x1xf32>
    tpu.vector_store %arg14[%c0_34, %c0_35], %52 {strides = array<i32>} : memref<512x1xf32, #tpu.memory_space<vmem>>, vector<512x1xf32>,
    return
  }
  func.func @transform_0(%arg0: i32) -> (i32, i32) {
    %c0_i32 = arith.constant 0 : i32
    %c0_i32_0 = arith.constant 0 : i32
    return %arg0, %c0_i32 : i32, i32
  }
  func.func @transform_1(%arg0: i32) -> (i32, i32) {
    %c0_i32 = arith.constant 0 : i32
    %c0_i32_0 = arith.constant 0 : i32
    return %arg0, %c0_i32 : i32, i32
  }
  func.func @transform_2(%arg0: i32) -> (i32, i32) {
    %c0_i32 = arith.constant 0 : i32
    %c0_i32_0 = arith.constant 0 : i32
    %c0_i32_1 = arith.constant 0 : i32
    return %c0_i32, %c0_i32_0 : i32, i32
  }
  func.func @transform_3(%arg0: i32) -> (i32, i32) {
    %c0_i32 = arith.constant 0 : i32
    %c0_i32_0 = arith.constant 0 : i32
    %c0_i32_1 = arith.constant 0 : i32
    return %c0_i32, %c0_i32_0 : i32, i32
  }
  func.func @transform_4(%arg0: i32) -> (i32, i32) {
    %c0_i32 = arith.constant 0 : i32
    %c0_i32_0 = arith.constant 0 : i32
    %c0_i32_1 = arith.constant 0 : i32
    return %c0_i32, %c0_i32_0 : i32, i32
  }
  func.func @transform_5(%arg0: i32) -> (i32, i32) {
    %c0_i32 = arith.constant 0 : i32
    %c0_i32_0 = arith.constant 0 : i32
    %c0_i32_1 = arith.constant 0 : i32
    return %c0_i32, %c0_i32_0 : i32, i32
  }
  func.func @transform_6(%arg0: i32) -> (i32, i32) {
    %c0_i32 = arith.constant 0 : i32
    %c0_i32_0 = arith.constant 0 : i32
    %c0_i32_1 = arith.constant 0 : i32
    return %c0_i32, %c0_i32_0 : i32, i32
  }
  func.func @transform_7(%arg0: i32) -> (i32, i32) {
    %c0_i32 = arith.constant 0 : i32
    %c0_i32_0 = arith.constant 0 : i32
    %c0_i32_1 = arith.constant 0 : i32
    return %c0_i32, %c0_i32_0 : i32, i32
  }
  func.func @transform_8(%arg0: i32) -> (i32, i32) {
    %c0_i32 = arith.constant 0 : i32
    %c0_i32_0 = arith.constant 0 : i32
    %c0_i32_1 = arith.constant 0 : i32
    return %c0_i32, %c0_i32_0 : i32, i32
  }
  func.func @transform_9(%arg0: i32) -> (i32, i32) {
    %c0_i32 = arith.constant 0 : i32
    %c0_i32_0 = arith.constant 0 : i32
    %c0_i32_1 = arith.constant 0 : i32
    return %c0_i32, %c0_i32_0 : i32, i32
  }
  func.func @transform_10(%arg0: i32) -> (i32, i32) {
    %c0_i32 = arith.constant 0 : i32
    %c0_i32_0 = arith.constant 0 : i32
    %c0_i32_1 = arith.constant 0 : i32
    return %c0_i32, %c0_i32_0 : i32, i32
  }
  func.func @transform_11(%arg0: i32) -> (i32, i32) {
    %c0_i32 = arith.constant 0 : i32
    %c0_i32_0 = arith.constant 0 : i32
    %c0_i32_1 = arith.constant 0 : i32
    return %c0_i32, %c0_i32_0 : i32, i32
  }
  func.func @transform_12(%arg0: i32) -> (i32, i32) {
    %c0_i32 = arith.constant 0 : i32
    %c0_i32_0 = arith.constant 0 : i32
    %c0_i32_1 = arith.constant 0 : i32
    return %c0_i32, %c0_i32_0 : i32, i32
  }
  func.func @transform_13(%arg0: i32) -> (i32, i32) {
    %c0_i32 = arith.constant 0 : i32
    %c0_i32_0 = arith.constant 0 : i32
    return %arg0, %c0_i32 : i32, i32
  }
}

</mosaic_0001>

<bundles_post_ra>
// kernel: _lambda_.1
= control target key start
LH: loop header
LB: loop body
LE: loop exit
PB: predicated region body
PF: predicated region fallthrough
CT: control target
= control target key end

     0   :  { %s6551_s27 = smov 0   ;;  %s8076_s0 = inlined_call_operand.vmem [shape: f32[1024,8], index: 0, kind: input, shape index: {}]   ;;  %s8077_s1 = inlined_call_operand.vmem [shape: s32[1024,2], index: 1, kind: input, shape index: {}]   ;;  %s8078_s2 = inlined_call_operand.vmem [shape: f32[8,16], index: 2, kind: input, shape index: {}]   ;;  %s8079_s3 = inlined_call_operand.vmem [shape: f32[1,16], index: 3, kind: input, shape index: {}]   ;;  %s8080_s4 = inlined_call_operand.vmem [shape: f32[16,32], index: 4, kind: input, shape index: {}]   ;;  %s8081_s5 = inlined_call_operand.vmem [shape: f32[64,32], index: 5, kind: input, shape index: {}]   ;;  %s8082_s6 = inlined_call_operand.vmem [shape: f32[1,32], index: 6, kind: input, shape index: {}]   ;;  %s8083_s7 = inlined_call_operand.vmem [shape: f32[32,32], index: 7, kind: input, shape index: {}]   ;;  %s8084_s8 = inlined_call_operand.vmem [shape: f32[1,32], index: 8, kind: input, shape index: {}]   ;;  %s8085_s9 = inlined_call_operand.vmem [shape: f32[32,16], index: 9, kind: input, shape index: {}]   ;;  %s8086_s10 = inlined_call_operand.vmem [shape: f32[1,16], index: 10, kind: input, shape index: {}]   ;;  %s8087_s11 = inlined_call_operand.vmem [shape: f32[1,16], index: 11, kind: input, shape index: {}]   ;;  %s8088_s12 = inlined_call_operand.<no memory space> [shape: f32[1,1], index: 12, kind: input, shape index: {}]   ;;  %s8089_s13 = inlined_call_operand.vmem [shape: f32[1024,1], index: 13, kind: output, shape index: {}]  }
   0x1   :  { %v18_v0 = vstv %s8088_s12 }
   0x2   :  { %19 = vst [vmem:[#allocation2] sm:$0x1] %v18_v0 }
   0x3 LB: > { %s5089_s28 = sadd.s32 4294967295, %s6473_s27   ;;  %p5093_p0 = scmp.ge.s32.totalorder %s6473_s27, 1  ;;  %s6473_s27 = sphi %s6551_s27, %s25_s27  }
   0x4   : > { %p401_p1 = scmp.lt.s32.totalorder %s6473_s27, 3 }
   0x6   : > { %p402_p2 = pnand %p5093_p0, %p401_p1 }
   0x8   : > { %405 = sbr.rel (%p402_p2) target bundleno = 1336 (0x538), region = 72 }
   0xf   : > { %s5094_s29 = sshll.u32 %s5089_s28, 6  ;;  %v532_v1 = vld [vmem:[%s8078_s2] sm:$0xff]  ;;  %v6475_v2 = vmov 0   ;;  %v2019_v4 = vld [vmem:[%s8081_s5 + $0x8] sm:$0xff]  ;;  %vm540_vm0 = vcmask 64512   ;;  %v6476_v10 = vmov 1  }
  0x10   : > { %6463 = vset.pattern.permute.xlu1 %v6475_v2  ;;  %6462 = vset.pattern.permute.xlu0 %v6475_v2  ;;  %p451_p3 = scmp.lt.s32.totalorder %s5094_s29, 127  ;;  %v2018_v3 = vld [vmem:[%s8081_s5] sm:$0xff]  ;;  %v2020_v11 = vld [vmem:[%s8081_s5 + $0x10] sm:$0xff]  ;;  %v2021_v12 = vld [vmem:[%s8081_s5 + $0x18] sm:$0xff]  ;;  %vm2026_vm3 = vcmask 523264  }
  0x11   : > { %6385 = vmatprep.subr.mxu1 %v532_v1  ;;  %v6349_v5 = vpack.c.bf16 %v2019_v4, %v2018_v3  ;;  %5831 = vmatprep.subr.mxu0 %v532_v1  ;;  %v6353_v19 = vpack.c.bf16 %v2021_v12, %v2020_v11  ;;  %v2022_v33 = vld [vmem:[%s8081_s5 + $0x20] sm:$0xff]  ;;  %v2023_v34 = vld [vmem:[%s8081_s5 + $0x28] sm:$0xff]  ;;  %v2024_v38 = vld [vmem:[%s8081_s5 + $0x30] sm:$0xff] }
  0x12   : > { %s8113_s29 = smov (!%p451_p3, %s5094_s29), 127  ;;  %6386 = vmatpush3.msra.mxu1 %v532_v1  ;;  %5832 = vmatpush3.msra.mxu0 %v532_v1  ;;  %v6357_v37 = vpack.c.bf16 %v2023_v34, %v2022_v33  ;;  %v2025_v40 = vld [vmem:[%s8081_s5 + $0x38] sm:$0xff] }
  0x13   : > { %6350 = vmatprep.subr.bf16.mxu1 %v6349_v5  ;;  %s6568_s18 = sshll.u32 %s8113_s29, 3  ;;  %v6361_v41 = vpack.c.bf16 %v2025_v40, %v2024_v38 }
  0x14   : > { %s6574_s21 = scalar_lea.vmem %s8077_s1, %s6568_s18  ;;  %s6583_s24 = scalar_lea.vmem %s8076_s0, %s6568_s18 }
  0x15   : > { %v1183_v6 = vld [vmem:[%s6574_s21 + $0x8] sm:$0xff]  ;;  %v1182_v7 = vld [vmem:[%s6574_s21] sm:$0xff]  ;;  %v1184_v9 = vld [vmem:[%s6574_s21 + $0x10] sm:$0xff]  ;;  %s7879_s22 = scalar_lea.vmem %s8089_s13, %s6568_s18 }
  0x16   : > { %1252 = vperm.xlu1 %6463, %v1183_v6   ;;  %1249 = vperm.xlu0 %6462, %v1182_v7   ;;  %v1504_v8 = vadd.s32 32, %v1182_v7  ;;  %v1505_v13 = vadd.s32 32, %v1183_v6  ;;  %v1506_v14 = vadd.s32 32, %v1184_v9  ;;  %v500_v15 = vld [vmem:[%s6583_s24 + $0x100] sm:$0xff]  ;;  %v501_v16 = vld [vmem:[%s6583_s24 + $0x108] sm:$0xff]  ;;  %v1185_v17 = vld [vmem:[%s6574_s21 + $0x18] sm:$0xff] }
  0x17   : > { %5881 = vmatprep.mubr.msk.f32.mxu1 %vm540_vm0, %v500_v15  ;;  %v502_v18 = vld [vmem:[%s6583_s24 + $0x110] sm:$0xff]  ;;  %v503_v20 = vld [vmem:[%s6583_s24 + $0x118] sm:$0xff]  ;;  %v1507_v21 = vadd.s32 32, %v1185_v17  ;;  %v504_v22 = vld [vmem:[%s6583_s24 + $0x120] sm:$0xff] }
  0x18   : > { %5882 = vmatmul.mubr.msk.f32.vlgmr.msra.gmra.mrb[0].mxu1 %vm540_vm0, %v501_v16  ;;  %v1186_v23 = vld [vmem:[%s6574_s21 + $0x20] sm:$0xff]  ;;  %v505_v24 = vld [vmem:[%s6583_s24 + $0x128] sm:$0xff]  ;;  %v506_v26 = vld [vmem:[%s6583_s24 + $0x130] sm:$0xff] }
  0x19   : > { %5884 = vmatprep.mubr.msk.f32.mxu1 %vm540_vm0, %v502_v18  ;;  %6352 = vmatpush3.bf16.msra.mxu1 %v6349_v5  ;;  %v1508_v25 = vadd.s32 32, %v1186_v23  ;;  %v1187_v27 = vld [vmem:[%s6574_s21 + $0x28] sm:$0xff]  ;;  %v507_v28 = vld [vmem:[%s6583_s24 + $0x138] sm:$0xff]  ;;  %v508_v30 = vld [vmem:[%s6583_s24 + $0x140] sm:$0xff] }
  0x1a   : > { %1255 = vperm.xlu1 %6463, %v1184_v9   ;;  %6464 = vset.pattern.permute.xlu0 %v6476_v10  ;;  %v1509_v29 = vadd.s32 32, %v1187_v27  ;;  %v1188_v31 = vld [vmem:[%s6574_s21 + $0x30] sm:$0xff]  ;;  %v509_v32 = vld [vmem:[%s6583_s24 + $0x148] sm:$0xff]  ;;  %v1189_v39 = vld [vmem:[%s6574_s21 + $0x38] sm:$0xff] }
  0x1b   : > { %1569 = vperm.xlu0 %6464, %v1504_v8   ;;  %6354 = vmatprep.subr.bf16.mxu1 %v6353_v19  ;;  %v1510_v35 = vadd.s32 32, %v1188_v31  ;;  %v510_v36 = vld [vmem:[%s6583_s24 + $0x150] sm:$0xff]  ;;  %v511_v42 = vld [vmem:[%s6583_s24 + $0x158] sm:$0xff]  ;;  %v1511_v43 = vadd.s32 32, %v1189_v39  ;;  %v512_v44 = vld [vmem:[%s6583_s24 + $0x160] sm:$0xff] }
  0x1c   : > { %5885 = vmatmul.mubr.msk.f32.gmra.mrb[2].mxu1 %vm540_vm0, %v503_v20  ;;  %v1190_v45 = vld [vmem:[%s6574_s21 + $0x40] sm:$0xff]  ;;  %v513_v46 = vld [vmem:[%s6583_s24 + $0x168] sm:$0xff]  ;;  %v514_v48 = vld [vmem:[%s6583_s24 + $0x170] sm:$0xff] }
  0x1d   : > { %5887 = vmatprep.mubr.msk.f32.mxu1 %vm540_vm0, %v504_v22  ;;  %6356 = vmatpush3.bf16.msra.mxu1 %v6353_v19  ;;  %v1512_v47 = vadd.s32 32, %v1190_v45  ;;  %v1191_v49 = vld [vmem:[%s6574_s21 + $0x48] sm:$0xff]  ;;  %v515_v50 = vld [vmem:[%s6583_s24 + $0x178] sm:$0xff]  ;;  %v516_v52 = vld [vmem:[%s6583_s24 + $0x180] sm:$0xff] }
  0x1e   : > { %6465 = vset.pattern.permute.xlu1 %v6476_v10  ;;  %6358 = vmatprep.subr.bf16.mxu1 %v6357_v37  ;;  %v1513_v51 = vadd.s32 32, %v1191_v49  ;;  %v1192_v53 = vld [vmem:[%s6574_s21 + $0x50] sm:$0xff]  ;;  %v517_v54 = vld [vmem:[%s6583_s24 + $0x188] sm:$0xff]  ;;  %v1193_v57 = vld [vmem:[%s6574_s21 + $0x58] sm:$0xff] }
  0x1f   : > { %1572 = vperm.xlu1 %6465, %v1505_v13   ;;  %1575 = vperm.xlu0 %6464, %v1506_v14   ;;  %v1514_v55 = vadd.s32 32, %v1192_v53  ;;  %v518_v56 = vld [vmem:[%s6583_s24 + $0x190] sm:$0xff]  ;;  %v519_v58 = vld [vmem:[%s6583_s24 + $0x198] sm:$0xff]  ;;  %v1515_v59 = vadd.s32 32, %v1193_v57  ;;  %v520_v60 = vld [vmem:[%s6583_s24 + $0x1a0] sm:$0xff] }
  0x20   : > { %5888 = vmatmul.mubr.msk.f32.gmra.mrb[4].mxu1 %vm540_vm0, %v505_v24  ;;  %v468_v61 = vld [vmem:[%s6583_s24] sm:$0xff]  ;;  %v469_v63 = vld [vmem:[%s6583_s24 + $0x8] sm:$0xff]  ;;  %v470_v3 = vld [vmem:[%s6583_s24 + $0x10] sm:$0xff] }
  0x21   : > { %5890 = vmatprep.mubr.msk.f32.mxu1 %vm540_vm0, %v506_v26  ;;  %6360 = vmatpush3.bf16.msra.mxu1 %v6357_v37  ;;  %v1194_v62 = vld [vmem:[%s6574_s21 + $0x60] sm:$0xff]  ;;  %v521_v0 = vld [vmem:[%s6583_s24 + $0x1a8] sm:$0xff]  ;;  %v471_v5 = vld [vmem:[%s6583_s24 + $0x18] sm:$0xff] }
  0x22   : > { %6362 = vmatprep.subr.bf16.mxu1 %v6361_v41  ;;  %5833 = vmatprep.mubr.msk.f32.mxu0 %vm540_vm0, %v468_v61  ;;  %v1516_v1 = vadd.s32 32, %v1194_v62  ;;  %v1195_v4 = vld [vmem:[%s6574_s21 + $0x68] sm:$0xff]  ;;  %v523_v6 = vld [vmem:[%s6583_s24 + $0x1b8] sm:$0xff]  ;;  %v524_v8 = vld [vmem:[%s6583_s24 + $0x1c0] sm:$0xff] }
  0x23   : > { %6466 = vset.pattern.permute.xlu1 %v6475_v2  ;;  %1578 = vperm.xlu0 %6464, %v1507_v21   ;;  %v522_v2 = vld [vmem:[%s6583_s24 + $0x1b0] sm:$0xff]  ;;  %v1517_v7 = vadd.s32 32, %v1195_v4  ;;  %v472_v9 = vld [vmem:[%s6583_s24 + $0x20] sm:$0xff]  ;;  %v473_v11 = vld [vmem:[%s6583_s24 + $0x28] sm:$0xff] }
  0x24   : > { %1258 = vperm.xlu1 %6466, %v1185_v17   ;;  %5891 = vmatmul.mubr.msk.f32.gmra.mrb[6].mxu1 %vm540_vm0, %v507_v28  ;;  %v1196_v10 = vld [vmem:[%s6574_s21 + $0x70] sm:$0xff]  ;;  %v525_v12 = vld [vmem:[%s6583_s24 + $0x1c8] sm:$0xff]  ;;  %v1197_v16 = vld [vmem:[%s6574_s21 + $0x78] sm:$0xff] }
  0x25   : > { %5893 = vmatprep.mubr.msk.f32.mxu1 %vm540_vm0, %v508_v30  ;;  %6364 = vmatpush3.bf16.msra.mxu1 %v6361_v41  ;;  %v1518_v13 = vadd.s32 32, %v1196_v10  ;;  %v526_v14 = vld [vmem:[%s6583_s24 + $0x1d0] sm:$0xff]  ;;  %v475_v17 = vld [vmem:[%s6583_s24 + $0x38] sm:$0xff]  ;;  %v1519_v19 = vadd.s32 32, %v1197_v16  ;;  %v528_v20 = vld [vmem:[%s6583_s24 + $0x1e0] sm:$0xff] }
  0x26   : > { %5834 = vmatmul.mubr.msk.f32.vlgmr.msra.gmra.mrb[0].mxu0 %vm540_vm0, %v469_v63  ;;  %v474_v15 = vld [vmem:[%s6583_s24 + $0x30] sm:$0xff]  ;;  %v527_v18 = vld [vmem:[%s6583_s24 + $0x1d8] sm:$0xff]  ;;  %v476_v21 = vld [vmem:[%s6583_s24 + $0x40] sm:$0xff] }
  0x27   : > { %1581 = vperm.xlu0 %6464, %v1508_v25   ;;  %5836 = vmatprep.mubr.msk.f32.mxu0 %vm540_vm0, %v470_v3  ;;  %v1198_v22 = vld [vmem:[%s6574_s21 + $0x80] sm:$0xff]  ;;  %v529_v24 = vld [vmem:[%s6583_s24 + $0x1e8] sm:$0xff]  ;;  %v530_v26 = vld [vmem:[%s6583_s24 + $0x1f0] sm:$0xff] }
  0x28   : > { %1261 = vperm.xlu1 %6466, %v1186_v23   ;;  %5894 = vmatmul.mubr.msk.f32.gmra.mrb[8].mxu1 %vm540_vm0, %v509_v32  ;;  %v477_v23 = vld [vmem:[%s6583_s24 + $0x48] sm:$0xff]  ;;  %v1520_v25 = vadd.s32 32, %v1198_v22  ;;  %v531_v30 = vld [vmem:[%s6583_s24 + $0x1f8] sm:$0xff]  ;;  %v480_v32 = vld [vmem:[%s6583_s24 + $0x60] sm:$0xff] }
  0x29   : > { %5896 = vmatprep.mubr.msk.f32.mxu1 %vm540_vm0, %v510_v36  ;;  %v1199_v28 = vld [vmem:[%s6574_s21 + $0x88] sm:$0xff]  ;;  %v1200_v33 = vld [vmem:[%s6574_s21 + $0x90] sm:$0xff]  ;;  %v1201_v37 = vld [vmem:[%s6574_s21 + $0x98] sm:$0xff] }
  0x2a   : > { %5837 = vmatmul.mubr.msk.f32.gmra.mrb[2].mxu0 %vm540_vm0, %v471_v5  ;;  %v481_v34 = vld [vmem:[%s6583_s24 + $0x68] sm:$0xff]  ;;  %v482_v36 = vld [vmem:[%s6583_s24 + $0x70] sm:$0xff]  ;;  %v483_v38 = vld [vmem:[%s6583_s24 + $0x78] sm:$0xff] }
  0x2b   : > { %1584 = vperm.xlu0 %6464, %v1509_v29   ;;  %5839 = vmatprep.mubr.msk.f32.mxu0 %vm540_vm0, %v472_v9  ;;  %v479_v29 = vld [vmem:[%s6583_s24 + $0x58] sm:$0xff]  ;;  %v484_v40 = vld [vmem:[%s6583_s24 + $0x80] sm:$0xff]  ;;  %v1207_v61 = vld [vmem:[%s6574_s21 + $0xc8] sm:$0xff] }
  0x2c   : > { %1264 = vperm.xlu1 %6466, %v1187_v27   ;;  %5897 = vmatmul.mubr.msk.f32.gmra.mrb[10].mxu1 %vm540_vm0, %v511_v42  ;;  %v478_v27 = vld [vmem:[%s6583_s24 + $0x50] sm:$0xff]  ;;  %v1202_v41 = vld [vmem:[%s6574_s21 + $0xa0] sm:$0xff]  ;;  %v485_v42 = vld [vmem:[%s6583_s24 + $0x88] sm:$0xff]  ;;  %v1529_v63 = vadd.s32 32, %v1207_v61 }
  0x2d   : > { %5899 = vmatprep.mubr.msk.f32.mxu1 %vm540_vm0, %v512_v44  ;;  %v486_v44 = vld [vmem:[%s6583_s24 + $0x90] sm:$0xff]  ;;  %v1209_v5 = vld [vmem:[%s6574_s21 + $0xd8] sm:$0xff] }
  0x2e   : > { %5840 = vmatmul.mubr.msk.f32.gmra.mrb[4].mxu0 %vm540_vm0, %v473_v11 }
  0x2f   : > { %1587 = vperm.xlu0 %6464, %v1510_v35   ;;  %5842 = vmatprep.mubr.msk.f32.mxu0 %vm540_vm0, %v474_v15  ;;  %v1522_v35 = vadd.s32 32, %v1200_v33 }
  0x30   : > { %1267 = vperm.xlu1 %6466, %v1188_v31   ;;  %5900 = vmatmul.mubr.msk.f32.gmra.mrb[12].mxu1 %vm540_vm0, %v513_v46  ;;  %v1521_v31 = vadd.s32 32, %v1199_v28  ;;  %v487_v46 = vld [vmem:[%s6583_s24 + $0x98] sm:$0xff] }
  0x31   : > { %5902 = vmatprep.mubr.msk.f32.mxu1 %vm540_vm0, %v514_v48  ;;  %v488_v48 = vld [vmem:[%s6583_s24 + $0xa0] sm:$0xff] }
  0x32   : > { %5843 = vmatmul.mubr.msk.f32.gmra.mrb[6].mxu0 %vm540_vm0, %v475_v17  ;;  %v1246_v17 = vlaneseq }
  0x33   : > { %1590 = vperm.xlu0 %6464, %v1511_v43   ;;  %5845 = vmatprep.mubr.msk.f32.mxu0 %vm540_vm0, %v476_v21  ;;  %v1524_v43 = vadd.s32 32, %v1202_v41 }
  0x34   : > { %1270 = vperm.xlu1 %6466, %v1189_v39   ;;  %5903 = vmatmul.mubr.msk.f32.gmra.mrb[14].mxu1 %vm540_vm0, %v515_v50  ;;  %v1523_v39 = vadd.s32 32, %v1201_v37  ;;  %v489_v50 = vld [vmem:[%s6583_s24 + $0xa8] sm:$0xff] }
  0x35   : > { %5905 = vmatprep.mubr.msk.f32.mxu1 %vm540_vm0, %v516_v52  ;;  %v490_v52 = vld [vmem:[%s6583_s24 + $0xb0] sm:$0xff] }
  0x36   : > { %5846 = vmatmul.mubr.msk.f32.gmra.mrb[8].mxu0 %vm540_vm0, %v477_v23 }
  0x37   : > { %1593 = vperm.xlu0 %6464, %v1512_v47   ;;  %5848 = vmatprep.mubr.msk.f32.mxu0 %vm540_vm0, %v478_v27 }
  0x38   : > { %1273 = vperm.xlu1 %6466, %v1190_v45   ;;  %5906 = vmatmul.mubr.msk.f32.gmra.mrb[16].mxu1 %vm540_vm0, %v517_v54  ;;  %v1203_v45 = vld [vmem:[%s6574_s21 + $0xa8] sm:$0xff]  ;;  %v491_v54 = vld [vmem:[%s6583_s24 + $0xb8] sm:$0xff] }
  0x39   : > { %5908 = vmatprep.mubr.msk.f32.mxu1 %vm540_vm0, %v518_v56  ;;  %v1525_v47 = vadd.s32 32, %v1203_v45  ;;  %v492_v56 = vld [vmem:[%s6583_s24 + $0xc0] sm:$0xff] }
  0x3a   : > { %5849 = vmatmul.mubr.msk.f32.gmra.mrb[10].mxu0 %vm540_vm0, %v479_v29  ;;  %v2017_v29 = vld [vmem:[%s8080_s4 + $0x8] sm:$0xff] }
  0x3b   : > { %1596 = vperm.xlu0 %6464, %v1513_v51   ;;  %5851 = vmatprep.mubr.msk.f32.mxu0 %vm540_vm0, %v480_v32  ;;  %v6477_v32 = vmov 0.0  }
  0x3c   : > { %1276 = vperm.xlu1 %6466, %v1191_v49   ;;  %5909 = vmatmul.mubr.msk.f32.gmra.mrb[18].mxu1 %vm540_vm0, %v519_v58  ;;  %v1204_v49 = vld [vmem:[%s6574_s21 + $0xb0] sm:$0xff]  ;;  %v493_v58 = vld [vmem:[%s6583_s24 + $0xc8] sm:$0xff] }
  0x3d   : > { %5911 = vmatprep.mubr.msk.f32.mxu1 %vm540_vm0, %v520_v60  ;;  %v1526_v51 = vadd.s32 32, %v1204_v49  ;;  %v494_v60 = vld [vmem:[%s6583_s24 + $0xd0] sm:$0xff] }
  0x3e   : > { %5852 = vmatmul.mubr.msk.f32.gmra.mrb[12].mxu0 %vm540_vm0, %v481_v34 }
  0x3f   : > { %1599 = vperm.xlu0 %6464, %v1514_v55   ;;  %5854 = vmatprep.mubr.msk.f32.mxu0 %vm540_vm0, %v482_v36 }
  0x40   : > { %1279 = vperm.xlu1 %6466, %v1192_v53   ;;  %5912 = vmatmul.mubr.msk.f32.gmra.mrb[20].mxu1 %vm540_vm0, %v521_v0  ;;  %v1205_v53 = vld [vmem:[%s6574_s21 + $0xb8] sm:$0xff]  ;;  %v496_v0 = vld [vmem:[%s6583_s24 + $0xe0] sm:$0xff] }
  0x41   : > { %5914 = vmatprep.mubr.msk.f32.mxu1 %vm540_vm0, %v522_v2  ;;  %v1527_v55 = vadd.s32 32, %v1205_v53  ;;  %v497_v2 = vld [vmem:[%s6583_s24 + $0xe8] sm:$0xff] }
  0x42   : > { %5855 = vmatmul.mubr.msk.f32.gmra.mrb[14].mxu0 %vm540_vm0, %v483_v38 }
  0x43   : > { %1602 = vperm.xlu0 %6464, %v1515_v59   ;;  %5857 = vmatprep.mubr.msk.f32.mxu0 %vm540_vm0, %v484_v40 }
  0x44   : > { %1282 = vperm.xlu1 %6466, %v1193_v57   ;;  %5915 = vmatmul.mubr.msk.f32.gmra.mrb[22].mxu1 %vm540_vm0, %v523_v6  ;;  %v1206_v57 = vld [vmem:[%s6574_s21 + $0xc0] sm:$0xff]  ;;  %v499_v6 = vld [vmem:[%s6583_s24 + $0xf8] sm:$0xff] }
  0x45   : > { %5917 = vmatprep.mubr.msk.f32.mxu1 %vm540_vm0, %v524_v8  ;;  %v1528_v59 = vadd.s32 32, %v1206_v57  ;;  %v1210_v8 = vld [vmem:[%s6574_s21 + $0xe0] sm:$0xff] }
  0x46   : > { %5858 = vmatmul.mubr.msk.f32.gmra.mrb[16].mxu0 %vm540_vm0, %v485_v42  ;;  %v1532_v9 = vadd.s32 32, %v1210_v8 }
  0x47   : > { %1605 = vperm.xlu0 %6464, %v1516_v1   ;;  %5860 = vmatprep.mubr.msk.f32.mxu0 %vm540_vm0, %v486_v44  ;;  %v1208_v1 = vld [vmem:[%s6574_s21 + $0xd0] sm:$0xff] }
  0x48   : > { %1285 = vperm.xlu1 %6466, %v1194_v62   ;;  %5918 = vmatmul.mubr.msk.f32.gmra.mrb[24].mxu1 %vm540_vm0, %v525_v12  ;;  %v495_v62 = vld [vmem:[%s6583_s24 + $0xd8] sm:$0xff]  ;;  %v1530_v3 = vadd.s32 32, %v1208_v1  ;;  %v1212_v12 = vld [vmem:[%s6574_s21 + $0xf0] sm:$0xff] }
  0x49   : > { %5920 = vmatprep.mubr.msk.f32.mxu1 %vm540_vm0, %v526_v14  ;;  %v1213_v14 = vld [vmem:[%s6574_s21 + $0xf8] sm:$0xff] }
  0x4a   : > { %5861 = vmatmul.mubr.msk.f32.gmra.mrb[18].mxu0 %vm540_vm0, %v487_v46  ;;  %v1535_v15 = vadd.s32 32, %v1213_v14 }
  0x4b   : > { %1608 = vperm.xlu0 %6464, %v1517_v7   ;;  %5863 = vmatprep.mubr.msk.f32.mxu0 %vm540_vm0, %v488_v48  ;;  %v1531_v7 = vadd.s32 32, %v1209_v5  ;;  %v1220_v48 = vld [vmem:[%s6574_s21 + $0x130] sm:$0xff] }
  0x4c   : > { %1288 = vperm.xlu1 %6466, %v1195_v4   ;;  %5921 = vmatmul.mubr.msk.f32.gmra.mrb[26].mxu1 %vm540_vm0, %v527_v18  ;;  %v498_v4 = vld [vmem:[%s6583_s24 + $0xf0] sm:$0xff] }
  0x4d   : > { %5923 = vmatprep.mubr.msk.f32.mxu1 %vm540_vm0, %v528_v20 }
  0x4e   : > { %5864 = vmatmul.mubr.msk.f32.gmra.mrb[20].mxu0 %vm540_vm0, %v489_v50 }
  0x4f   : > { %1611 = vperm.xlu0 %6464, %v1518_v13   ;;  %5866 = vmatprep.mubr.msk.f32.mxu0 %vm540_vm0, %v490_v52  ;;  %v1534_v13 = vadd.s32 32, %v1212_v12  ;;  %v1542_v52 = vadd.s32 32, %v1220_v48 }
  0x50   : > { %1291 = vperm.xlu1 %6466, %v1196_v10   ;;  %5924 = vmatmul.mubr.msk.f32.gmra.mrb[28].mxu1 %vm540_vm0, %v529_v24  ;;  %v1211_v10 = vld [vmem:[%s6574_s21 + $0xe8] sm:$0xff]  ;;  %v1216_v24 = vld [vmem:[%s6574_s21 + $0x110] sm:$0xff] }
  0x51   : > { %5926 = vmatprep.mubr.msk.f32.mxu1 %vm540_vm0, %v530_v26  ;;  %v1533_v11 = vadd.s32 32, %v1211_v10  ;;  %v1538_v27 = vadd.s32 32, %v1216_v24 }
  0x52   : > { %5867 = vmatmul.mubr.msk.f32.gmra.mrb[22].mxu0 %vm540_vm0, %v491_v54 }
  0x53   : > { %1614 = vperm.xlu0 %6464, %v1519_v19   ;;  %5869 = vmatprep.mubr.msk.f32.mxu0 %vm540_vm0, %v492_v56  ;;  %v1215_v19 = vld [vmem:[%s6574_s21 + $0x108] sm:$0xff] }
  0x54   : > { %1294 = vperm.xlu1 %6466, %v1197_v16   ;;  %5927 = vmatmul.mubr.msk.f32.gmra.mrb[30].mxu1 %vm540_vm0, %v531_v30  ;;  %v1214_v16 = vld [vmem:[%s6574_s21 + $0x100] sm:$0xff]  ;;  %v1537_v23 = vadd.s32 32, %v1215_v19  ;;  %v1217_v30 = vld [vmem:[%s6574_s21 + $0x118] sm:$0xff] }
  0x55   : > { %v1536_v18 = vadd.s32 32, %v1214_v16  ;;  %v1539_v36 = vadd.s32 32, %v1217_v30 }
  0x56   : > { %5870 = vmatmul.mubr.msk.f32.gmra.mrb[24].mxu0 %vm540_vm0, %v493_v58  ;;  %v1222_v58 = vld [vmem:[%s6574_s21 + $0x140] sm:$0xff] }
  0x57   : > { %1617 = vperm.xlu0 %6464, %v1520_v25   ;;  %5872 = vmatprep.mubr.msk.f32.mxu0 %vm540_vm0, %v494_v60 }
  0x58   : > { %1297 = vperm.xlu1 %6466, %v1198_v22   ;;  %v6762_v22 = vand.u32 127, %v1246_v17 }
  0x5a   : > { %5873 = vmatmul.mubr.msk.f32.gmra.mrb[26].mxu0 %vm540_vm0, %v495_v62  ;;  %v1544_v62 = vadd.s32 32, %v1222_v58 }
  0x5b   : > { %1620 = vperm.xlu0 %6464, %v1521_v31   ;;  %5875 = vmatprep.mubr.msk.f32.mxu0 %vm540_vm0, %v496_v0 }
  0x5c   : > { %1300 = vperm.xlu1 %6466, %v1199_v28   ;;  %v2016_v28 = vld [vmem:[%s8080_s4] sm:$0xff] }
  0x5d   : > { %v6365_v31 = vpack.c.bf16 %v2017_v29, %v2016_v28 }
  0x5e   : > { %5876 = vmatmul.mubr.msk.f32.gmra.mrb[28].mxu0 %vm540_vm0, %v497_v2 }
  0x5f   : > { %1623 = vperm.xlu0 %6464, %v1522_v35   ;;  %5878 = vmatprep.mubr.msk.f32.mxu0 %vm540_vm0, %v498_v4  ;;  %v1224_v4 = vld [vmem:[%s6574_s21 + $0x150] sm:$0xff] }
  0x60   : > { %1303 = vperm.xlu1 %6466, %v1200_v33   ;;  %6366 = vmatprep.subr.bf16.mxu1 %v6365_v31 }
  0x62   : > { %5879 = vmatmul.mubr.msk.f32.gmra.mrb[30].mxu0 %vm540_vm0, %v499_v6 }
  0x63   : > { %1626 = vperm.xlu0 %6464, %v1523_v39  }
  0x64   : > { %1306 = vperm.xlu1 %6466, %v1201_v37   ;;  %v1218_v37 = vld [vmem:[%s6574_s21 + $0x120] sm:$0xff] }
  0x65   : > { %v1540_v42 = vadd.s32 32, %v1218_v37 }
  0x67   : > { %1629 = vperm.xlu0 %6464, %v1524_v43   ;;  %v1219_v43 = vld [vmem:[%s6574_s21 + $0x128] sm:$0xff] }
  0x68   : > { %1309 = vperm.xlu1 %6466, %v1202_v41  }
  0x6b   : > { %1632 = vperm.xlu0 %6464, %v1525_v47   ;;  %v1541_v47 = vadd.s32 32, %v1219_v43 }
  0x6c   : > { %1312 = vperm.xlu1 %6466, %v1203_v45  }
  0x6f   : > { %1635 = vperm.xlu0 %6464, %v1526_v51  }
  0x70   : > { %1315 = vperm.xlu1 %6466, %v1204_v49  }
  0x73   : > { %1638 = vperm.xlu0 %6464, %v1527_v55  }
  0x74   : > { %1318 = vperm.xlu1 %6466, %v1205_v53   ;;  %v1221_v53 = vld [vmem:[%s6574_s21 + $0x138] sm:$0xff] }
  0x77   : > { %1641 = vperm.xlu0 %6464, %v1528_v59  }
  0x78   : > { %1321 = vperm.xlu1 %6466, %v1206_v57   ;;  %v1543_v57 = vadd.s32 32, %v1221_v53 }
  0x7b   : > { %1644 = vperm.xlu0 %6464, %v1529_v63   ;;  %v1223_v63 = vld [vmem:[%s6574_s21 + $0x148] sm:$0xff] }
  0x7c   : > { %1324 = vperm.xlu1 %6466, %v1207_v61  }
  0x7f   : > { %1647 = vperm.xlu0 %6464, %v1530_v3   ;;  %v1545_v3 = vadd.s32 32, %v1223_v63 }
  0x80   : > { %1327 = vperm.xlu1 %6466, %v1208_v1  }
  0x83   : > { %1650 = vperm.xlu0 %6464, %v1531_v7  }
  0x84   : > { %1330 = vperm.xlu1 %6466, %v1209_v5  }
  0x87   : > { %1653 = vperm.xlu0 %6464, %v1532_v9   ;;  %v1225_v9 = vld [vmem:[%s6574_s21 + $0x158] sm:$0xff] }
  0x88   : > { %1333 = vperm.xlu1 %6466, %v1210_v8   ;;  %v1546_v8 = vadd.s32 32, %v1224_v4 }
  0x8b   : > { %1656 = vperm.xlu0 %6464, %v1533_v11  }
  0x8c   : > { %1336 = vperm.xlu1 %6466, %v1211_v10  }
  0x8f   : > { %1659 = vperm.xlu0 %6464, %v1534_v13   ;;  %v1547_v13 = vadd.s32 32, %v1225_v9 }
  0x90   : > { %1339 = vperm.xlu1 %6466, %v1212_v12  }
  0x93   : > { %1662 = vperm.xlu0 %6464, %v1535_v15  }
  0x94   : > { %1342 = vperm.xlu1 %6466, %v1213_v14   ;;  %v1226_v14 = vld [vmem:[%s6574_s21 + $0x160] sm:$0xff] }
  0x95   : > { %v1253_v20 = vpop.permute.xlu1 %1252  ;;  %v1250_v21 = vpop.permute.xlu0 %1249 }
  0x96   : > { %vm1440_vm1 = vcmp.eq.s32.totalorder %v6762_v22, %v1250_v21  ;;  %vm1441_vm5 = vcmp.eq.s32.totalorder %v6762_v22, %v1253_v20 }
  0x97   : > { %1665 = vperm.xlu0 %6464, %v1536_v18   ;;  %v1548_v18 = vadd.s32 32, %v1226_v14 }
  0x98   : > { %1345 = vperm.xlu1 %6466, %v1214_v16  }
  0x99   : > { %v1256_v25 = vpop.permute.xlu1 %1255 }
  0x9a   : > { %v1570_v26 = vpop.permute.xlu0 %1569  ;;  %vm1442_vm8 = vcmp.eq.s32.totalorder %v6762_v22, %v1256_v25  ;;  %v1228_v25 = vld [vmem:[%s6574_s21 + $0x170] sm:$0xff] }
  0x9b   : > { %vm1760_vm2 = vcmp.eq.s32.totalorder %v6762_v22, %v1570_v26  ;;  %1668 = vperm.xlu0 %6464, %v1537_v23   ;;  %v1550_v29 = vadd.s32 32, %v1228_v25 }
  0x9c   : > { %vm1824_vm4 = vmor %vm1440_vm1, %vm1760_vm2  ;;  %1348 = vperm.xlu1 %6466, %v1215_v19   ;;  %v1227_v19 = vld [vmem:[%s6574_s21 + $0x168] sm:$0xff] }
  0x9d   : > { %v5165_v33 = vsel %vm1824_vm4, 1.0, %v6477_v32 }
  0x9e   : > { %v1573_v34 = vpop.permute.xlu1 %1572  ;;  %v1576_v35 = vpop.permute.xlu0 %1575  ;;  %5945 = vmatprep.mubr.msk.f32.mxu1 %vm2026_vm3, %v5165_v33 }
  0x9f   : > { %vm1761_vm6 = vcmp.eq.s32.totalorder %v6762_v22, %v1573_v34  ;;  %vm1762_vm7 = vcmp.eq.s32.totalorder %v6762_v22, %v1576_v35  ;;  %1671 = vperm.xlu0 %6464, %v1538_v27  }
  0xa0   : > { %vm1825_vm9 = vmor %vm1441_vm5, %vm1761_vm6  ;;  %1351 = vperm.xlu1 %6466, %v1216_v24   ;;  %v1549_v24 = vadd.s32 32, %v1227_v19 }
  0xa1   : > { %v5166_v38 = vsel %vm1825_vm9, 1.0, %v6477_v32  ;;  %vm1826_vm10 = vmor %vm1442_vm8, %vm1762_vm7 }
  0xa2   : > { %v1579_v39 = vpop.permute.xlu0 %1578  ;;  %5946 = vmatmul.mubr.msk.f32.vlgmr.msra.gmra.mrb[32].mxu1 %vm2026_vm3, %v5166_v38  ;;  %v5167_v40 = vsel %vm1826_vm10, 1.0, %v6477_v32 }
  0xa3   : > { %vm1763_vm11 = vcmp.eq.s32.totalorder %v6762_v22, %v1579_v39  ;;  %v1259_v41 = vpop.permute.xlu1 %1258  ;;  %1674 = vperm.xlu0 %6464, %v1539_v36   ;;  %5948 = vmatprep.mubr.msk.f32.mxu1 %vm2026_vm3, %v5167_v40  ;;  %v1230_v36 = vld [vmem:[%s6574_s21 + $0x180] sm:$0xff] }
  0xa4   : > { %vm1443_vm12 = vcmp.eq.s32.totalorder %v6762_v22, %v1259_v41  ;;  %1354 = vperm.xlu1 %6466, %v1217_v30   ;;  %6368 = vmatpush3.bf16.msra.mxu1 %v6365_v31  ;;  %v1229_v30 = vld [vmem:[%s6574_s21 + $0x178] sm:$0xff]  ;;  %v1552_v40 = vadd.s32 32, %v1230_v36  ;;  %v1231_v41 = vld [vmem:[%s6574_s21 + $0x188] sm:$0xff] }
  0xa5   : > { %vm1827_vm13 = vmor %vm1443_vm12, %vm1763_vm11  ;;  %v1551_v35 = vadd.s32 32, %v1229_v30 }
  0xa6   : > { %v1582_v44 = vpop.permute.xlu0 %1581  ;;  %v5168_v45 = vsel %vm1827_vm13, 1.0, %v6477_v32 }
  0xa7   : > { %vm1764_vm14 = vcmp.eq.s32.totalorder %v6762_v22, %v1582_v44  ;;  %v1262_v46 = vpop.permute.xlu1 %1261  ;;  %1677 = vperm.xlu0 %6464, %v1540_v42   ;;  %5949 = vmatmul.mubr.msk.f32.gmra.mrb[34].mxu1 %vm2026_vm3, %v5168_v45  ;;  %v1553_v45 = vadd.s32 32, %v1231_v41 }
  0xa8   : > { %vm1444_vm15 = vcmp.eq.s32.totalorder %v6762_v22, %v1262_v46  ;;  %1357 = vperm.xlu1 %6466, %v1218_v37   ;;  %v1232_v46 = vld [vmem:[%s6574_s21 + $0x190] sm:$0xff] }
  0xa9   : > { %vm1828_vm0 = vmor %vm1444_vm15, %vm1764_vm14 }
  0xaa   : > { %v1585_v49 = vpop.permute.xlu0 %1584  ;;  %v5169_v50 = vsel %vm1828_vm0, 1.0, %v6477_v32 }
  0xab   : > { %vm1765_vm1 = vcmp.eq.s32.totalorder %v6762_v22, %v1585_v49  ;;  %v1265_v51 = vpop.permute.xlu1 %1264  ;;  %1680 = vperm.xlu0 %6464, %v1541_v47   ;;  %5951 = vmatprep.mubr.msk.f32.mxu1 %vm2026_vm3, %v5169_v50  ;;  %v1554_v50 = vadd.s32 32, %v1232_v46 }
  0xac   : > { %vm1445_vm2 = vcmp.eq.s32.totalorder %v6762_v22, %v1265_v51  ;;  %1360 = vperm.xlu1 %6466, %v1219_v43   ;;  %v1233_v51 = vld [vmem:[%s6574_s21 + $0x198] sm:$0xff] }
  0xad   : > { %vm1829_vm4 = vmor %vm1445_vm2, %vm1765_vm1 }
  0xae   : > { %v1588_v54 = vpop.permute.xlu0 %1587  ;;  %v5170_v55 = vsel %vm1829_vm4, 1.0, %v6477_v32 }
  0xaf   : > { %vm1766_vm5 = vcmp.eq.s32.totalorder %v6762_v22, %v1588_v54  ;;  %v1268_v56 = vpop.permute.xlu1 %1267  ;;  %1683 = vperm.xlu0 %6464, %v1542_v52   ;;  %5952 = vmatmul.mubr.msk.f32.gmra.mrb[36].mxu1 %vm2026_vm3, %v5170_v55  ;;  %v1555_v55 = vadd.s32 32, %v1233_v51 }
  0xb0   : > { %vm1446_vm6 = vcmp.eq.s32.totalorder %v6762_v22, %v1268_v56  ;;  %1363 = vperm.xlu1 %6466, %v1220_v48   ;;  %v1234_v56 = vld [vmem:[%s6574_s21 + $0x1a0] sm:$0xff] }
  0xb1   : > { %vm1830_vm7 = vmor %vm1446_vm6, %vm1766_vm5 }
  0xb2   : > { %v1591_v59 = vpop.permute.xlu0 %1590  ;;  %v5171_v60 = vsel %vm1830_vm7, 1.0, %v6477_v32 }
  0xb3   : > { %vm1767_vm8 = vcmp.eq.s32.totalorder %v6762_v22, %v1591_v59  ;;  %v1271_v61 = vpop.permute.xlu1 %1270  ;;  %1686 = vperm.xlu0 %6464, %v1543_v57   ;;  %5954 = vmatprep.mubr.msk.f32.mxu1 %vm2026_vm3, %v5171_v60  ;;  %v1556_v60 = vadd.s32 32, %v1234_v56 }
  0xb4   : > { %vm1447_vm9 = vcmp.eq.s32.totalorder %v6762_v22, %v1271_v61  ;;  %1366 = vperm.xlu1 %6466, %v1221_v53   ;;  %v1235_v61 = vld [vmem:[%s6574_s21 + $0x1a8] sm:$0xff] }
  0xb5   : > { %vm1831_vm10 = vmor %vm1447_vm9, %vm1767_vm8 }
  0xb6   : > { %v1594_v0 = vpop.permute.xlu0 %1593  ;;  %v5172_v1 = vsel %vm1831_vm10, 1.0, %v6477_v32 }
  0xb7   : > { %vm1768_vm11 = vcmp.eq.s32.totalorder %v6762_v22, %v1594_v0  ;;  %v1274_v2 = vpop.permute.xlu1 %1273  ;;  %1689 = vperm.xlu0 %6464, %v1544_v62   ;;  %5955 = vmatmul.mubr.msk.f32.gmra.mrb[38].mxu1 %vm2026_vm3, %v5172_v1  ;;  %v1557_v1 = vadd.s32 32, %v1235_v61 }
  0xb8   : > { %vm1448_vm12 = vcmp.eq.s32.totalorder %v6762_v22, %v1274_v2  ;;  %1369 = vperm.xlu1 %6466, %v1222_v58   ;;  %v1236_v2 = vld [vmem:[%s6574_s21 + $0x1b0] sm:$0xff] }
  0xb9   : > { %vm1832_vm13 = vmor %vm1448_vm12, %vm1768_vm11 }
  0xba   : > { %v1597_v5 = vpop.permute.xlu0 %1596  ;;  %v5173_v6 = vsel %vm1832_vm13, 1.0, %v6477_v32 }
  0xbb   : > { %vm1769_vm14 = vcmp.eq.s32.totalorder %v6762_v22, %v1597_v5  ;;  %v1277_v7 = vpop.permute.xlu1 %1276  ;;  %1692 = vperm.xlu0 %6464, %v1545_v3   ;;  %5957 = vmatprep.mubr.msk.f32.mxu1 %vm2026_vm3, %v5173_v6  ;;  %v1558_v6 = vadd.s32 32, %v1236_v2 }
  0xbc   : > { %vm1449_vm15 = vcmp.eq.s32.totalorder %v6762_v22, %v1277_v7  ;;  %1372 = vperm.xlu1 %6466, %v1223_v63   ;;  %v1237_v7 = vld [vmem:[%s6574_s21 + $0x1b8] sm:$0xff] }
  0xbd   : > { %vm1833_vm0 = vmor %vm1449_vm15, %vm1769_vm14 }
  0xbe   : > { %v1600_v10 = vpop.permute.xlu0 %1599  ;;  %v5174_v11 = vsel %vm1833_vm0, 1.0, %v6477_v32 }
  0xbf   : > { %vm1770_vm1 = vcmp.eq.s32.totalorder %v6762_v22, %v1600_v10  ;;  %v1280_v12 = vpop.permute.xlu1 %1279  ;;  %1695 = vperm.xlu0 %6464, %v1546_v8   ;;  %5958 = vmatmul.mubr.msk.f32.gmra.mrb[40].mxu1 %vm2026_vm3, %v5174_v11  ;;  %v1559_v11 = vadd.s32 32, %v1237_v7 }
  0xc0   : > { %vm1450_vm2 = vcmp.eq.s32.totalorder %v6762_v22, %v1280_v12  ;;  %1375 = vperm.xlu1 %6466, %v1224_v4   ;;  %v1238_v12 = vld [vmem:[%s6574_s21 + $0x1c0] sm:$0xff] }
  0xc1   : > { %vm1834_vm4 = vmor %vm1450_vm2, %vm1770_vm1 }
  0xc2   : > { %v1603_v15 = vpop.permute.xlu0 %1602  ;;  %v5175_v16 = vsel %vm1834_vm4, 1.0, %v6477_v32 }
  0xc3   : > { %vm1771_vm5 = vcmp.eq.s32.totalorder %v6762_v22, %v1603_v15  ;;  %v1283_v17 = vpop.permute.xlu1 %1282  ;;  %1698 = vperm.xlu0 %6464, %v1547_v13   ;;  %5960 = vmatprep.mubr.msk.f32.mxu1 %vm2026_vm3, %v5175_v16  ;;  %v1560_v16 = vadd.s32 32, %v1238_v12 }
  0xc4   : > { %vm1451_vm6 = vcmp.eq.s32.totalorder %v6762_v22, %v1283_v17  ;;  %1378 = vperm.xlu1 %6466, %v1225_v9   ;;  %v1239_v17 = vld [vmem:[%s6574_s21 + $0x1c8] sm:$0xff] }
  0xc5   : > { %vm1835_vm7 = vmor %vm1451_vm6, %vm1771_vm5 }
  0xc6   : > { %v1606_v20 = vpop.permute.xlu0 %1605  ;;  %v5176_v21 = vsel %vm1835_vm7, 1.0, %v6477_v32 }
  0xc7   : > { %vm1772_vm8 = vcmp.eq.s32.totalorder %v6762_v22, %v1606_v20  ;;  %v1286_v23 = vpop.permute.xlu1 %1285  ;;  %1701 = vperm.xlu0 %6464, %v1548_v18   ;;  %5961 = vmatmul.mubr.msk.f32.gmra.mrb[42].mxu1 %vm2026_vm3, %v5176_v21  ;;  %v1561_v21 = vadd.s32 32, %v1239_v17 }
  0xc8   : > { %vm1452_vm9 = vcmp.eq.s32.totalorder %v6762_v22, %v1286_v23  ;;  %1381 = vperm.xlu1 %6466, %v1226_v14   ;;  %v1240_v23 = vld [vmem:[%s6574_s21 + $0x1d0] sm:$0xff] }
  0xc9   : > { %vm1836_vm10 = vmor %vm1452_vm9, %vm1772_vm8 }
  0xca   : > { %v1609_v26 = vpop.permute.xlu0 %1608  ;;  %v5177_v27 = vsel %vm1836_vm10, 1.0, %v6477_v32 }
  0xcb   : > { %vm1773_vm11 = vcmp.eq.s32.totalorder %v6762_v22, %v1609_v26  ;;  %v1289_v28 = vpop.permute.xlu1 %1288  ;;  %1704 = vperm.xlu0 %6464, %v1549_v24   ;;  %5963 = vmatprep.mubr.msk.f32.mxu1 %vm2026_vm3, %v5177_v27  ;;  %v1562_v27 = vadd.s32 32, %v1240_v23 }
  0xcc   : > { %vm1453_vm12 = vcmp.eq.s32.totalorder %v6762_v22, %v1289_v28  ;;  %1384 = vperm.xlu1 %6466, %v1227_v19   ;;  %v1241_v28 = vld [vmem:[%s6574_s21 + $0x1d8] sm:$0xff] }
  0xcd   : > { %vm1837_vm13 = vmor %vm1453_vm12, %vm1773_vm11 }
  0xce   : > { %v1612_v31 = vpop.permute.xlu0 %1611  ;;  %v5178_v33 = vsel %vm1837_vm13, 1.0, %v6477_v32 }
  0xcf   : > { %vm1774_vm14 = vcmp.eq.s32.totalorder %v6762_v22, %v1612_v31  ;;  %v1292_v34 = vpop.permute.xlu1 %1291  ;;  %1707 = vperm.xlu0 %6464, %v1550_v29   ;;  %5964 = vmatmul.mubr.msk.f32.gmra.mrb[44].mxu1 %vm2026_vm3, %v5178_v33  ;;  %v1563_v33 = vadd.s32 32, %v1241_v28 }
  0xd0   : > { %vm1454_vm15 = vcmp.eq.s32.totalorder %v6762_v22, %v1292_v34  ;;  %1387 = vperm.xlu1 %6466, %v1228_v25   ;;  %v1242_v34 = vld [vmem:[%s6574_s21 + $0x1e0] sm:$0xff] }
  0xd1   : > { %vm1838_vm0 = vmor %vm1454_vm15, %vm1774_vm14 }
  0xd2   : > { %v1615_v37 = vpop.permute.xlu0 %1614  ;;  %v5179_v38 = vsel %vm1838_vm0, 1.0, %v6477_v32 }
  0xd3   : > { %vm1775_vm1 = vcmp.eq.s32.totalorder %v6762_v22, %v1615_v37  ;;  %v1295_v39 = vpop.permute.xlu1 %1294  ;;  %1710 = vperm.xlu0 %6464, %v1551_v35   ;;  %5966 = vmatprep.mubr.msk.f32.mxu1 %vm2026_vm3, %v5179_v38  ;;  %v1564_v38 = vadd.s32 32, %v1242_v34 }
  0xd4   : > { %vm1455_vm2 = vcmp.eq.s32.totalorder %v6762_v22, %v1295_v39  ;;  %1390 = vperm.xlu1 %6466, %v1229_v30   ;;  %v1243_v39 = vld [vmem:[%s6574_s21 + $0x1e8] sm:$0xff] }
  0xd5   : > { %vm1839_vm4 = vmor %vm1455_vm2, %vm1775_vm1 }
  0xd6   : > { %v1618_v42 = vpop.permute.xlu0 %1617  ;;  %v5180_v43 = vsel %vm1839_vm4, 1.0, %v6477_v32 }
  0xd7   : > { %vm1776_vm5 = vcmp.eq.s32.totalorder %v6762_v22, %v1618_v42  ;;  %v1298_v44 = vpop.permute.xlu1 %1297  ;;  %1713 = vperm.xlu0 %6464, %v1552_v40   ;;  %5967 = vmatmul.mubr.msk.f32.gmra.mrb[46].mxu1 %vm2026_vm3, %v5180_v43  ;;  %v1565_v43 = vadd.s32 32, %v1243_v39 }
  0xd8   : > { %vm1456_vm6 = vcmp.eq.s32.totalorder %v6762_v22, %v1298_v44  ;;  %1393 = vperm.xlu1 %6466, %v1230_v36   ;;  %v1244_v44 = vld [vmem:[%s6574_s21 + $0x1f0] sm:$0xff] }
  0xd9   : > { %vm1840_vm7 = vmor %vm1456_vm6, %vm1776_vm5 }
  0xda   : > { %v1621_v47 = vpop.permute.xlu0 %1620  ;;  %v5181_v48 = vsel %vm1840_vm7, 1.0, %v6477_v32 }
  0xdb   : > { %vm1777_vm8 = vcmp.eq.s32.totalorder %v6762_v22, %v1621_v47  ;;  %v1301_v49 = vpop.permute.xlu1 %1300  ;;  %1716 = vperm.xlu0 %6464, %v1553_v45   ;;  %5969 = vmatprep.mubr.msk.f32.mxu1 %vm2026_vm3, %v5181_v48  ;;  %v1566_v48 = vadd.s32 32, %v1244_v44 }
  0xdc   : > { %vm1457_vm9 = vcmp.eq.s32.totalorder %v6762_v22, %v1301_v49  ;;  %1396 = vperm.xlu1 %6466, %v1231_v41   ;;  %v1245_v49 = vld [vmem:[%s6574_s21 + $0x1f8] sm:$0xff] }
  0xdd   : > { %vm1841_vm10 = vmor %vm1457_vm9, %vm1777_vm8 }
  0xde   : > { %v1624_v52 = vpop.permute.xlu0 %1623  ;;  %v5182_v53 = vsel %vm1841_vm10, 1.0, %v6477_v32 }
  0xdf   : > { %vm1778_vm11 = vcmp.eq.s32.totalorder %v6762_v22, %v1624_v52  ;;  %v1304_v54 = vpop.permute.xlu1 %1303  ;;  %1719 = vperm.xlu0 %6464, %v1554_v50   ;;  %5970 = vmatmul.mubr.msk.f32.gmra.mrb[48].mxu1 %vm2026_vm3, %v5182_v53  ;;  %v1567_v53 = vadd.s32 32, %v1245_v49 }
  0xe0   : > { %vm1458_vm12 = vcmp.eq.s32.totalorder %v6762_v22, %v1304_v54  ;;  %1399 = vperm.xlu1 %6466, %v1232_v46  }
  0xe1   : > { %vm1842_vm13 = vmor %vm1458_vm12, %vm1778_vm11 }
  0xe2   : > { %v1627_v57 = vpop.permute.xlu0 %1626  ;;  %v5183_v58 = vsel %vm1842_vm13, 1.0, %v6477_v32 }
  0xe3   : > { %vm1779_vm14 = vcmp.eq.s32.totalorder %v6762_v22, %v1627_v57  ;;  %v1307_v59 = vpop.permute.xlu1 %1306  ;;  %1722 = vperm.xlu0 %6464, %v1555_v55   ;;  %5972 = vmatprep.mubr.msk.f32.mxu1 %vm2026_vm3, %v5183_v58 }
  0xe4   : > { %vm1459_vm15 = vcmp.eq.s32.totalorder %v6762_v22, %v1307_v59  ;;  %1402 = vperm.xlu1 %6466, %v1233_v51  }
  0xe5   : > { %vm1843_vm0 = vmor %vm1459_vm15, %vm1779_vm14 }
  0xe6   : > { %v1630_v62 = vpop.permute.xlu0 %1629  ;;  %v5184_v63 = vsel %vm1843_vm0, 1.0, %v6477_v32 }
  0xe7   : > { %vm1780_vm1 = vcmp.eq.s32.totalorder %v6762_v22, %v1630_v62  ;;  %v1310_v0 = vpop.permute.xlu1 %1309  ;;  %1725 = vperm.xlu0 %6464, %v1556_v60   ;;  %5973 = vmatmul.mubr.msk.f32.gmra.mrb[50].mxu1 %vm2026_vm3, %v5184_v63 }
  0xe8   : > { %vm1460_vm2 = vcmp.eq.s32.totalorder %v6762_v22, %v1310_v0  ;;  %1405 = vperm.xlu1 %6466, %v1234_v56  }
  0xe9   : > { %vm1844_vm4 = vmor %vm1460_vm2, %vm1780_vm1 }
  0xea   : > { %v1633_v3 = vpop.permute.xlu0 %1632  ;;  %v5185_v4 = vsel %vm1844_vm4, 1.0, %v6477_v32 }
  0xeb   : > { %vm1781_vm5 = vcmp.eq.s32.totalorder %v6762_v22, %v1633_v3  ;;  %v1313_v5 = vpop.permute.xlu1 %1312  ;;  %1728 = vperm.xlu0 %6464, %v1557_v1   ;;  %5975 = vmatprep.mubr.msk.f32.mxu1 %vm2026_vm3, %v5185_v4 }
  0xec   : > { %vm1461_vm6 = vcmp.eq.s32.totalorder %v6762_v22, %v1313_v5  ;;  %1408 = vperm.xlu1 %6466, %v1235_v61  }
  0xed   : > { %vm1845_vm7 = vmor %vm1461_vm6, %vm1781_vm5 }
  0xee   : > { %v1636_v8 = vpop.permute.xlu0 %1635  ;;  %v5186_v9 = vsel %vm1845_vm7, 1.0, %v6477_v32 }
  0xef   : > { %vm1782_vm8 = vcmp.eq.s32.totalorder %v6762_v22, %v1636_v8  ;;  %v1316_v10 = vpop.permute.xlu1 %1315  ;;  %1731 = vperm.xlu0 %6464, %v1558_v6   ;;  %5976 = vmatmul.mubr.msk.f32.gmra.mrb[52].mxu1 %vm2026_vm3, %v5186_v9 }
  0xf0   : > { %vm1462_vm9 = vcmp.eq.s32.totalorder %v6762_v22, %v1316_v10  ;;  %1411 = vperm.xlu1 %6466, %v1236_v2  }
  0xf1   : > { %vm1846_vm10 = vmor %vm1462_vm9, %vm1782_vm8 }
  0xf2   : > { %v1639_v13 = vpop.permute.xlu0 %1638  ;;  %v5187_v14 = vsel %vm1846_vm10, 1.0, %v6477_v32 }
  0xf3   : > { %vm1783_vm11 = vcmp.eq.s32.totalorder %v6762_v22, %v1639_v13  ;;  %v1319_v15 = vpop.permute.xlu1 %1318  ;;  %1734 = vperm.xlu0 %6464, %v1559_v11   ;;  %5978 = vmatprep.mubr.msk.f32.mxu1 %vm2026_vm3, %v5187_v14 }
  0xf4   : > { %vm1463_vm12 = vcmp.eq.s32.totalorder %v6762_v22, %v1319_v15  ;;  %1414 = vperm.xlu1 %6466, %v1237_v7  }
  0xf5   : > { %vm1847_vm13 = vmor %vm1463_vm12, %vm1783_vm11 }
  0xf6   : > { %v1642_v18 = vpop.permute.xlu0 %1641  ;;  %v5188_v19 = vsel %vm1847_vm13, 1.0, %v6477_v32 }
  0xf7   : > { %vm1784_vm14 = vcmp.eq.s32.totalorder %v6762_v22, %v1642_v18  ;;  %v1322_v20 = vpop.permute.xlu1 %1321  ;;  %1737 = vperm.xlu0 %6464, %v1560_v16   ;;  %5979 = vmatmul.mubr.msk.f32.gmra.mrb[54].mxu1 %vm2026_vm3, %v5188_v19 }
  0xf8   : > { %vm1464_vm15 = vcmp.eq.s32.totalorder %v6762_v22, %v1322_v20  ;;  %1417 = vperm.xlu1 %6466, %v1238_v12  }
  0xf9   : > { %vm1848_vm0 = vmor %vm1464_vm15, %vm1784_vm14  ;;  %v6926_v57 = vpop.f32.mrb[0].mxu0 }
  0xfa   : > { %v1645_v24 = vpop.permute.xlu0 %1644  ;;  %v5189_v25 = vsel %vm1848_vm0, 1.0, %v6477_v32  ;;  %v6928_v58 = vpop.f32.mrb[1].mxu0 }
  0xfb   : > { %vm1785_vm1 = vcmp.eq.s32.totalorder %v6762_v22, %v1645_v24  ;;  %v1325_v26 = vpop.permute.xlu1 %1324  ;;  %1740 = vperm.xlu0 %6464, %v1561_v21   ;;  %5981 = vmatprep.mubr.msk.f32.mxu1 %vm2026_vm3, %v5189_v25  ;;  %v6973_v24 = vpop.f32.mrb[0].mxu1 }
  0xfc   : > { %vm1465_vm2 = vcmp.eq.s32.totalorder %v6762_v22, %v1325_v26  ;;  %1420 = vperm.xlu1 %6466, %v1239_v17   ;;  %v6978_v26 = vpop.f32.mrb[1].mxu1 }
  0xfd   : > { %vm1849_vm4 = vmor %vm1465_vm2, %vm1785_vm1  ;;  %v6934_v62 = vpop.f32.mrb[2].mxu0 }
  0xfe   : > { %v1648_v29 = vpop.permute.xlu0 %1647  ;;  %v5190_v30 = vsel %vm1849_vm4, 1.0, %v6477_v32  ;;  %v6936_v63 = vpop.f32.mrb[3].mxu0 }
  0xff   : > { %vm1786_vm5 = vcmp.eq.s32.totalorder %v6762_v22, %v1648_v29  ;;  %v1328_v31 = vpop.permute.xlu1 %1327  ;;  %1743 = vperm.xlu0 %6464, %v1562_v27   ;;  %5982 = vmatmul.mubr.msk.f32.gmra.mrb[56].mxu1 %vm2026_vm3, %v5190_v30 }
 0x100   : > { %vm1466_vm6 = vcmp.eq.s32.totalorder %v6762_v22, %v1328_v31  ;;  %1423 = vperm.xlu1 %6466, %v1240_v23   ;;  %v6985_v31 = vpop.f32.mrb[2].mxu1 }
 0x101   : > { %vm1850_vm7 = vmor %vm1466_vm6, %vm1786_vm5  ;;  %v6942_v3 = vpop.f32.mrb[4].mxu0 }
 0x102   : > { %v1651_v35 = vpop.permute.xlu0 %1650  ;;  %v5191_v36 = vsel %vm1850_vm7, 1.0, %v6477_v32  ;;  %v6944_v4 = vpop.f32.mrb[5].mxu0 }
 0x103   : > { %vm1787_vm8 = vcmp.eq.s32.totalorder %v6762_v22, %v1651_v35  ;;  %v1331_v37 = vpop.permute.xlu1 %1330  ;;  %1746 = vperm.xlu0 %6464, %v1563_v33   ;;  %5984 = vmatprep.mubr.msk.f32.mxu1 %vm2026_vm3, %v5191_v36 }
 0x104   : > { %vm1467_vm9 = vcmp.eq.s32.totalorder %v6762_v22, %v1331_v37  ;;  %1426 = vperm.xlu1 %6466, %v1241_v28  }
 0x105   : > { %vm1851_vm10 = vmor %vm1467_vm9, %vm1787_vm8  ;;  %v6950_v8 = vpop.f32.mrb[6].mxu0 }
 0x106   : > { %v1654_v40 = vpop.permute.xlu0 %1653  ;;  %v5192_v41 = vsel %vm1851_vm10, 1.0, %v6477_v32  ;;  %v6952_v9 = vpop.f32.mrb[7].mxu0 }
 0x107   : > { %vm1788_vm11 = vcmp.eq.s32.totalorder %v6762_v22, %v1654_v40  ;;  %v1334_v42 = vpop.permute.xlu1 %1333  ;;  %1749 = vperm.xlu0 %6464, %v1564_v38   ;;  %5985 = vmatmul.mubr.msk.f32.gmra.mrb[58].mxu1 %vm2026_vm3, %v5192_v41 }
 0x108   : > { %vm1468_vm12 = vcmp.eq.s32.totalorder %v6762_v22, %v1334_v42  ;;  %1429 = vperm.xlu1 %6466, %v1242_v34   ;;  %v6990_v34 = vpop.f32.mrb[3].mxu1 }
 0x109   : > { %vm1852_vm13 = vmor %vm1468_vm12, %vm1788_vm11  ;;  %v6958_v13 = vpop.f32.mrb[8].mxu0 }
 0x10a   : > { %v1657_v45 = vpop.permute.xlu0 %1656  ;;  %v5193_v46 = vsel %vm1852_vm13, 1.0, %v6477_v32  ;;  %v6960_v14 = vpop.f32.mrb[9].mxu0 }
 0x10b   : > { %vm1789_vm14 = vcmp.eq.s32.totalorder %v6762_v22, %v1657_v45  ;;  %v1337_v47 = vpop.permute.xlu1 %1336  ;;  %1752 = vperm.xlu0 %6464, %v1565_v43   ;;  %5987 = vmatprep.mubr.msk.f32.mxu1 %vm2026_vm3, %v5193_v46 }
 0x10c   : > { %vm1469_vm15 = vcmp.eq.s32.totalorder %v6762_v22, %v1337_v47  ;;  %1432 = vperm.xlu1 %6466, %v1243_v39   ;;  %v6997_v39 = vpop.f32.mrb[4].mxu1 }
 0x10d   : > { %vm1853_vm0 = vmor %vm1469_vm15, %vm1789_vm14  ;;  %v6966_v18 = vpop.f32.mrb[10].mxu0  ;;  %v7002_v41 = vpop.f32.mrb[5].mxu1 }
 0x10e   : > { %v1660_v50 = vpop.permute.xlu0 %1659  ;;  %v5194_v51 = vsel %vm1853_vm0, 1.0, %v6477_v32  ;;  %v6968_v19 = vpop.f32.mrb[11].mxu0 }
 0x10f   : > { %vm1790_vm1 = vcmp.eq.s32.totalorder %v6762_v22, %v1660_v50  ;;  %v1340_v52 = vpop.permute.xlu1 %1339  ;;  %1755 = vperm.xlu0 %6464, %v1566_v48   ;;  %5988 = vmatmul.mubr.msk.f32.gmra.mrb[60].mxu1 %vm2026_vm3, %v5194_v51  ;;  %v7009_v46 = vpop.f32.mrb[6].mxu1 }
 0x110   : > { %vm1470_vm2 = vcmp.eq.s32.totalorder %v6762_v22, %v1340_v52  ;;  %1435 = vperm.xlu1 %6466, %v1244_v44   ;;  %v7014_v48 = vpop.f32.mrb[7].mxu1 }
 0x111   : > { %vm1854_vm4 = vmor %vm1470_vm2, %vm1790_vm1  ;;  %v6976_v25 = vpop.f32.mrb[12].mxu0 }
 0x112   : > { %v1663_v54 = vpop.permute.xlu0 %1662  ;;  %v5195_v55 = vsel %vm1854_vm4, 1.0, %v6477_v32  ;;  %v6980_v27 = vpop.f32.mrb[13].mxu0 }
 0x113   : > { %vm1791_vm5 = vcmp.eq.s32.totalorder %v6762_v22, %v1663_v54  ;;  %v1343_v56 = vpop.permute.xlu1 %1342  ;;  %1758 = vperm.xlu0 %6464, %v1567_v53   ;;  %5990 = vmatprep.mubr.msk.f32.mxu1 %vm2026_vm3, %v5195_v55  ;;  %v7021_v53 = vpop.f32.mrb[8].mxu1 }
 0x114   : > { %vm1471_vm6 = vcmp.eq.s32.totalorder %v6762_v22, %v1343_v56  ;;  %1438 = vperm.xlu1 %6466, %v1245_v49   ;;  %v7026_v55 = vpop.f32.mrb[9].mxu1 }
 0x115   : > { %vm1855_vm7 = vmor %vm1471_vm6, %vm1791_vm5  ;;  %v6988_v33 = vpop.f32.mrb[14].mxu0 }
 0x116   : > { %v1666_v59 = vpop.permute.xlu0 %1665  ;;  %v5196_v60 = vsel %vm1855_vm7, 1.0, %v6477_v32  ;;  %v6992_v35 = vpop.f32.mrb[15].mxu0 }
 0x117   : > { %vm1792_vm8 = vcmp.eq.s32.totalorder %v6762_v22, %v1666_v59  ;;  %v1346_v61 = vpop.permute.xlu1 %1345  ;;  %5991 = vmatmul.mubr.msk.f32.gmra.mrb[62].mxu1 %vm2026_vm3, %v5196_v60 }
 0x118   : > { %vm1472_vm9 = vcmp.eq.s32.totalorder %v6762_v22, %v1346_v61 }
 0x119   : > { %vm1856_vm10 = vmor %vm1472_vm9, %vm1792_vm8  ;;  %v7000_v40 = vpop.f32.mrb[16].mxu0 }
 0x11a   : > { %v1669_v0 = vpop.permute.xlu0 %1668  ;;  %v5197_v1 = vsel %vm1856_vm10, 1.0, %v6477_v32  ;;  %v7004_v42 = vpop.f32.mrb[17].mxu0 }
 0x11b   : > { %vm1793_vm11 = vcmp.eq.s32.totalorder %v6762_v22, %v1669_v0  ;;  %v1349_v2 = vpop.permute.xlu1 %1348  ;;  %5993 = vmatprep.mubr.msk.f32.mxu1 %vm2026_vm3, %v5197_v1  ;;  %v7033_v0 = vpop.f32.mrb[10].mxu1 }
 0x11c   : > { %vm1473_vm12 = vcmp.eq.s32.totalorder %v6762_v22, %v1349_v2  ;;  %v7038_v2 = vpop.f32.mrb[11].mxu1 }
 0x11d   : > { %vm1857_vm13 = vmor %vm1473_vm12, %vm1793_vm11  ;;  %v7012_v47 = vpop.f32.mrb[18].mxu0 }
 0x11e   : > { %v1672_v5 = vpop.permute.xlu0 %1671  ;;  %v5198_v6 = vsel %vm1857_vm13, 1.0, %v6477_v32  ;;  %v7016_v49 = vpop.f32.mrb[19].mxu0 }
 0x11f   : > { %vm1794_vm14 = vcmp.eq.s32.totalorder %v6762_v22, %v1672_v5  ;;  %v1352_v7 = vpop.permute.xlu1 %1351  ;;  %5994 = vmatmul.mubr.msk.f32.gmra.mrb[64].mxu1 %vm2026_vm3, %v5198_v6 }
 0x120   : > { %vm1474_vm15 = vcmp.eq.s32.totalorder %v6762_v22, %v1352_v7 }
 0x121   : > { %vm1858_vm0 = vmor %vm1474_vm15, %vm1794_vm14  ;;  %v7024_v54 = vpop.f32.mrb[20].mxu0 }
 0x122   : > { %v1675_v10 = vpop.permute.xlu0 %1674  ;;  %v5199_v11 = vsel %vm1858_vm0, 1.0, %v6477_v32  ;;  %v7028_v56 = vpop.f32.mrb[21].mxu0 }
 0x123   : > { %vm1795_vm1 = vcmp.eq.s32.totalorder %v6762_v22, %v1675_v10  ;;  %v1355_v12 = vpop.permute.xlu1 %1354  ;;  %5996 = vmatprep.mubr.msk.f32.mxu1 %vm2026_vm3, %v5199_v11  ;;  %v7045_v11 = vpop.f32.mrb[12].mxu1 }
 0x124   : > { %vm1475_vm2 = vcmp.eq.s32.totalorder %v6762_v22, %v1355_v12 }
 0x125   : > { %vm1859_vm4 = vmor %vm1475_vm2, %vm1795_vm1  ;;  %v7036_v1 = vpop.f32.mrb[22].mxu0 }
 0x126   : > { %v1678_v15 = vpop.permute.xlu0 %1677  ;;  %v5200_v16 = vsel %vm1859_vm4, 1.0, %v6477_v32  ;;  %v7040_v5 = vpop.f32.mrb[23].mxu0 }
 0x127   : > { %vm1796_vm5 = vcmp.eq.s32.totalorder %v6762_v22, %v1678_v15  ;;  %v1358_v17 = vpop.permute.xlu1 %1357  ;;  %5997 = vmatmul.mubr.msk.f32.gmra.mrb[66].mxu1 %vm2026_vm3, %v5200_v16  ;;  %v7050_v15 = vpop.f32.mrb[13].mxu1 }
 0x128   : > { %vm1476_vm6 = vcmp.eq.s32.totalorder %v6762_v22, %v1358_v17 }
 0x129   : > { %vm1860_vm7 = vmor %vm1476_vm6, %vm1796_vm5  ;;  %v7048_v12 = vpop.f32.mrb[24].mxu0 }
 0x12a   : > { %v1681_v20 = vpop.permute.xlu0 %1680  ;;  %v5201_v21 = vsel %vm1860_vm7, 1.0, %v6477_v32  ;;  %v7052_v16 = vpop.f32.mrb[25].mxu0 }
 0x12b   : > { %vm1797_vm8 = vcmp.eq.s32.totalorder %v6762_v22, %v1681_v20  ;;  %v1361_v23 = vpop.permute.xlu1 %1360  ;;  %5999 = vmatprep.mubr.msk.f32.mxu1 %vm2026_vm3, %v5201_v21 }
 0x12c   : > { %vm1477_vm9 = vcmp.eq.s32.totalorder %v6762_v22, %v1361_v23  ;;  %v7057_v23 = vpop.f32.mrb[14].mxu1 }
 0x12d   : > { %vm1861_vm10 = vmor %vm1477_vm9, %vm1797_vm8 }
 0x12e   : > { %v1684_v28 = vpop.permute.xlu0 %1683  ;;  %v5202_v29 = vsel %vm1861_vm10, 1.0, %v6477_v32 }
 0x12f   : > { %vm1798_vm11 = vcmp.eq.s32.totalorder %v6762_v22, %v1684_v28  ;;  %v1364_v30 = vpop.permute.xlu1 %1363  ;;  %6000 = vmatmul.mubr.msk.f32.gmra.mrb[68].mxu1 %vm2026_vm3, %v5202_v29  ;;  %v7060_v28 = vpop.f32.mrb[26].mxu0 }
 0x130   : > { %vm1478_vm12 = vcmp.eq.s32.totalorder %v6762_v22, %v1364_v30  ;;  %v7062_v29 = vpop.f32.mrb[15].mxu1  ;;  %v7064_v30 = vpop.f32.mrb[27].mxu0 }
 0x131   : > { %vm1862_vm13 = vmor %vm1478_vm12, %vm1798_vm11 }
 0x132   : > { %v1687_v36 = vpop.permute.xlu0 %1686  ;;  %v5203_v37 = vsel %vm1862_vm13, 1.0, %v6477_v32 }
 0x133   : > { %vm1799_vm14 = vcmp.eq.s32.totalorder %v6762_v22, %v1687_v36  ;;  %v1367_v38 = vpop.permute.xlu1 %1366  ;;  %6002 = vmatprep.mubr.msk.f32.mxu1 %vm2026_vm3, %v5203_v37 }
 0x134   : > { %vm1479_vm15 = vcmp.eq.s32.totalorder %v6762_v22, %v1367_v38 }
 0x135   : > { %vm1863_vm0 = vmor %vm1479_vm15, %vm1799_vm14 }
 0x136   : > { %v1690_v43 = vpop.permute.xlu0 %1689  ;;  %v5204_v44 = vsel %vm1863_vm0, 1.0, %v6477_v32 }
 0x137   : > { %vm1800_vm1 = vcmp.eq.s32.totalorder %v6762_v22, %v1690_v43  ;;  %v1370_v45 = vpop.permute.xlu1 %1369  ;;  %6003 = vmatmul.mubr.msk.f32.gmra.mrb[70].mxu1 %vm2026_vm3, %v5204_v44  ;;  %v7069_v43 = vpop.f32.mrb[16].mxu1 }
 0x138   : > { %vm1480_vm2 = vcmp.eq.s32.totalorder %v6762_v22, %v1370_v45  ;;  %v7072_v44 = vpop.f32.mrb[28].mxu0  ;;  %v7074_v45 = vpop.f32.mrb[17].mxu1 }
 0x139   : > { %vm1864_vm4 = vmor %vm1480_vm2, %vm1800_vm1 }
 0x13a   : > { %v1693_v50 = vpop.permute.xlu0 %1692  ;;  %v5205_v51 = vsel %vm1864_vm4, 1.0, %v6477_v32 }
 0x13b   : > { %vm1801_vm5 = vcmp.eq.s32.totalorder %v6762_v22, %v1693_v50  ;;  %v1373_v52 = vpop.permute.xlu1 %1372  ;;  %6005 = vmatprep.mubr.msk.f32.mxu1 %vm2026_vm3, %v5205_v51  ;;  %v7076_v50 = vpop.f32.mrb[29].mxu0 }
 0x13c   : > { %vm1481_vm6 = vcmp.eq.s32.totalorder %v6762_v22, %v1373_v52 }
 0x13d   : > { %vm1865_vm7 = vmor %vm1481_vm6, %vm1801_vm5 }
 0x13e   : > { %v1696_v59 = vpop.permute.xlu0 %1695  ;;  %v5206_v60 = vsel %vm1865_vm7, 1.0, %v6477_v32 }
 0x13f   : > { %vm1802_vm8 = vcmp.eq.s32.totalorder %v6762_v22, %v1696_v59  ;;  %v1376_v61 = vpop.permute.xlu1 %1375  ;;  %6006 = vmatmul.mubr.msk.f32.gmra.mrb[72].mxu1 %vm2026_vm3, %v5206_v60  ;;  %v7081_v60 = vpop.f32.mrb[18].mxu1 }
 0x140   : > { %vm1482_vm9 = vcmp.eq.s32.totalorder %v6762_v22, %v1376_v61  ;;  %v7084_v61 = vpop.f32.mrb[30].mxu0 }
 0x141   : > { %vm1866_vm10 = vmor %vm1482_vm9, %vm1802_vm8 }
 0x142   : > { %v1699_v6 = vpop.permute.xlu0 %1698  ;;  %v5207_v7 = vsel %vm1866_vm10, 1.0, %v6477_v32 }
 0x143   : > { %vm1803_vm11 = vcmp.eq.s32.totalorder %v6762_v22, %v1699_v6  ;;  %v1379_v10 = vpop.permute.xlu1 %1378  ;;  %6008 = vmatprep.mubr.msk.f32.mxu1 %vm2026_vm3, %v5207_v7  ;;  %v7086_v6 = vpop.f32.mrb[19].mxu1 }
 0x144   : > { %vm1483_vm12 = vcmp.eq.s32.totalorder %v6762_v22, %v1379_v10  ;;  %v7088_v7 = vpop.f32.mrb[31].mxu0 }
 0x145   : > { %vm1867_vm13 = vmor %vm1483_vm12, %vm1803_vm11 }
 0x146   : > { %v1702_v17 = vpop.permute.xlu0 %1701  ;;  %v5208_v20 = vsel %vm1867_vm13, 1.0, %v6477_v32 }
 0x147   : > { %vm1804_vm14 = vcmp.eq.s32.totalorder %v6762_v22, %v1702_v17  ;;  %v1382_v21 = vpop.permute.xlu1 %1381  ;;  %6009 = vmatmul.mubr.msk.f32.gmra.mrb[74].mxu1 %vm2026_vm3, %v5208_v20 }
 0x148   : > { %vm1484_vm15 = vcmp.eq.s32.totalorder %v6762_v22, %v1382_v21  ;;  %v7093_v21 = vpop.f32.mrb[20].mxu1 }
 0x149   : > { %vm1868_vm0 = vmor %vm1484_vm15, %vm1804_vm14  ;;  %8090 = vst [vmem:[#allocation3_spill] sm:$0xff] %v7093_v21 }
 0x14a   : > { %v1705_v36 = vpop.permute.xlu0 %1704  ;;  %v5209_v37 = vsel %vm1868_vm0, 1.0, %v6477_v32 }
 0x14b   : > { %vm1805_vm1 = vcmp.eq.s32.totalorder %v6762_v22, %v1705_v36  ;;  %v1385_v38 = vpop.permute.xlu1 %1384  ;;  %6011 = vmatprep.mubr.msk.f32.mxu1 %vm2026_vm3, %v5209_v37  ;;  %v7096_v36 = vpop.f32.mrb[21].mxu1 }
 0x14c   : > { %vm1485_vm2 = vcmp.eq.s32.totalorder %v6762_v22, %v1385_v38 }
 0x14d   : > { %vm1869_vm4 = vmor %vm1485_vm2, %vm1805_vm1 }
 0x14e   : > { %v1708_v51 = vpop.permute.xlu0 %1707  ;;  %v5210_v52 = vsel %vm1869_vm4, 1.0, %v6477_v32 }
 0x14f   : > { %vm1806_vm5 = vcmp.eq.s32.totalorder %v6762_v22, %v1708_v51  ;;  %v1388_v59 = vpop.permute.xlu1 %1387  ;;  %6012 = vmatmul.mubr.msk.f32.gmra.mrb[76].mxu1 %vm2026_vm3, %v5210_v52  ;;  %v7102_v52 = vpop.f32.mrb[22].mxu1 }
 0x150   : > { %vm1486_vm6 = vcmp.eq.s32.totalorder %v6762_v22, %v1388_v59  ;;  %8091 = vst [vmem:[#allocation4_spill] sm:$0xff] %v7102_v52  ;;  %v7104_v59 = vpop.f32.mrb[23].mxu1 }
 0x151   : > { %vm1870_vm7 = vmor %vm1486_vm6, %vm1806_vm5  ;;  %8092 = vst [vmem:[#allocation5_spill] sm:$0xff] %v7104_v59 }
 0x152   : > { %v1711_v10 = vpop.permute.xlu0 %1710  ;;  %v5211_v17 = vsel %vm1870_vm7, 1.0, %v6477_v32 }
 0x153   : > { %vm1807_vm8 = vcmp.eq.s32.totalorder %v6762_v22, %v1711_v10  ;;  %v1391_v20 = vpop.permute.xlu1 %1390  ;;  %6014 = vmatprep.mubr.msk.f32.mxu1 %vm2026_vm3, %v5211_v17 }
 0x154   : > { %vm1487_vm9 = vcmp.eq.s32.totalorder %v6762_v22, %v1391_v20 }
 0x155   : > { %vm1871_vm10 = vmor %vm1487_vm9, %vm1807_vm8 }
 0x156   : > { %v5212_v37 = vsel %vm1871_vm10, 1.0, %v6477_v32  ;;  %v1714_v38 = vpop.permute.xlu0 %1713 }
 0x157   : > { %vm1808_vm11 = vcmp.eq.s32.totalorder %v6762_v22, %v1714_v38  ;;  %v1394_v51 = vpop.permute.xlu1 %1393  ;;  %6015 = vmatmul.mubr.msk.f32.gmra.mrb[78].mxu1 %vm2026_vm3, %v5212_v37  ;;  %v7110_v38 = vpop.f32.mrb[24].mxu1 }
 0x158   : > { %vm1488_vm12 = vcmp.eq.s32.totalorder %v6762_v22, %v1394_v51  ;;  %8093 = vst [vmem:[#allocation6_spill] sm:$0xff] %v7110_v38  ;;  %v7112_v37 = vpop.f32.mrb[25].mxu1 }
 0x159   : > { %vm1872_vm13 = vmor %vm1488_vm12, %vm1808_vm11  ;;  %8094 = vst [vmem:[#allocation7_spill] sm:$0xff] %v7112_v37 }
 0x15a   : > { %v5213_v10 = vsel %vm1872_vm13, 1.0, %v6477_v32  ;;  %v1717_v17 = vpop.permute.xlu0 %1716 }
 0x15b   : > { %vm1809_vm14 = vcmp.eq.s32.totalorder %v6762_v22, %v1717_v17  ;;  %v1397_v20 = vpop.permute.xlu1 %1396  ;;  %6017 = vmatprep.mubr.msk.f32.mxu1 %vm2026_vm3, %v5213_v10  ;;  %v7118_v17 = vpop.f32.mrb[26].mxu1 }
 0x15c   : > { %vm1489_vm15 = vcmp.eq.s32.totalorder %v6762_v22, %v1397_v20  ;;  %8095 = vst [vmem:[#allocation8_spill] sm:$0xff] %v7118_v17  ;;  %v7120_v10 = vpop.f32.mrb[27].mxu1 }
 0x15d   : > { %vm1873_vm0 = vmor %vm1489_vm15, %vm1809_vm14  ;;  %8096 = vst [vmem:[#allocation9_spill] sm:$0xff] %v7120_v10 }
 0x15e   : > { %v5214_v51 = vsel %vm1873_vm0, 1.0, %v6477_v32  ;;  %v1720_v52 = vpop.permute.xlu0 %1719 }
 0x15f   : > { %vm1810_vm1 = vcmp.eq.s32.totalorder %v6762_v22, %v1720_v52  ;;  %v1400_v59 = vpop.permute.xlu1 %1399  ;;  %6018 = vmatmul.mubr.msk.f32.gmra.mrb[80].mxu1 %vm2026_vm3, %v5214_v51  ;;  %v7126_v52 = vpop.f32.mrb[28].mxu1 }
 0x160   : > { %vm1490_vm2 = vcmp.eq.s32.totalorder %v6762_v22, %v1400_v59  ;;  %8097 = vst [vmem:[#allocation10_spill] sm:$0xff] %v7126_v52  ;;  %v7128_v51 = vpop.f32.mrb[29].mxu1 }
 0x161   : > { %vm1874_vm4 = vmor %vm1490_vm2, %vm1810_vm1  ;;  %8098 = vst [vmem:[#allocation11_spill] sm:$0xff] %v7128_v51 }
 0x162   : > { %v5215_v20 = vsel %vm1874_vm4, 1.0, %v6477_v32  ;;  %v1723_v38 = vpop.permute.xlu0 %1722 }
 0x163   : > { %vm1811_vm5 = vcmp.eq.s32.totalorder %v6762_v22, %v1723_v38  ;;  %v1403_v37 = vpop.permute.xlu1 %1402  ;;  %6020 = vmatprep.mubr.msk.f32.mxu1 %vm2026_vm3, %v5215_v20  ;;  %v7134_v38 = vpop.f32.mrb[30].mxu1 }
 0x164   : > { %vm1491_vm6 = vcmp.eq.s32.totalorder %v6762_v22, %v1403_v37  ;;  %8099 = vst [vmem:[#allocation12_spill] sm:$0xff] %v7134_v38  ;;  %v7136_v20 = vpop.f32.mrb[31].mxu1 }
 0x165   : > { %vm1875_vm7 = vmor %vm1491_vm6, %vm1811_vm5  ;;  %8100 = vst [vmem:[#allocation13_spill] sm:$0xff] %v7136_v20 }
 0x166   : > { %v5216_v59 = vsel %vm1875_vm7, 1.0, %v6477_v32  ;;  %v1726_v17 = vpop.permute.xlu0 %1725 }
 0x167   : > { %vm1812_vm8 = vcmp.eq.s32.totalorder %v6762_v22, %v1726_v17  ;;  %v1406_v10 = vpop.permute.xlu1 %1405  ;;  %6021 = vmatmul.mubr.msk.f32.gmra.mrb[82].mxu1 %vm2026_vm3, %v5216_v59 }
 0x168   : > { %vm1492_vm9 = vcmp.eq.s32.totalorder %v6762_v22, %v1406_v10 }
 0x169   : > { %vm1876_vm10 = vmor %vm1492_vm9, %vm1812_vm8 }
 0x16a   : > { %v5217_v37 = vsel %vm1876_vm10, 1.0, %v6477_v32  ;;  %v1729_v52 = vpop.permute.xlu0 %1728 }
 0x16b   : > { %vm1813_vm11 = vcmp.eq.s32.totalorder %v6762_v22, %v1729_v52  ;;  %v1409_v51 = vpop.permute.xlu1 %1408  ;;  %6023 = vmatprep.mubr.msk.f32.mxu1 %vm2026_vm3, %v5217_v37 }
 0x16c   : > { %vm1493_vm12 = vcmp.eq.s32.totalorder %v6762_v22, %v1409_v51 }
 0x16d   : > { %vm1877_vm13 = vmor %vm1493_vm12, %vm1813_vm11 }
 0x16e   : > { %v5218_v17 = vsel %vm1877_vm13, 1.0, %v6477_v32  ;;  %v1732_v59 = vpop.permute.xlu0 %1731 }
 0x16f   : > { %vm1814_vm14 = vcmp.eq.s32.totalorder %v6762_v22, %v1732_v59  ;;  %v1412_v10 = vpop.permute.xlu1 %1411  ;;  %6024 = vmatmul.mubr.msk.f32.gmra.mrb[84].mxu1 %vm2026_vm3, %v5218_v17 }
 0x170   : > { %vm1494_vm15 = vcmp.eq.s32.totalorder %v6762_v22, %v1412_v10 }
 0x171   : > { %vm1878_vm0 = vmor %vm1494_vm15, %vm1814_vm14 }
 0x172   : > { %v5219_v38 = vsel %vm1878_vm0, 1.0, %v6477_v32  ;;  %v1735_v52 = vpop.permute.xlu0 %1734 }
 0x173   : > { %vm1815_vm1 = vcmp.eq.s32.totalorder %v6762_v22, %v1735_v52  ;;  %v1415_v37 = vpop.permute.xlu1 %1414  ;;  %6026 = vmatprep.mubr.msk.f32.mxu1 %vm2026_vm3, %v5219_v38 }
 0x174   : > { %vm1495_vm2 = vcmp.eq.s32.totalorder %v6762_v22, %v1415_v37 }
 0x175   : > { %vm1879_vm4 = vmor %vm1495_vm2, %vm1815_vm1 }
 0x176   : > { %v5220_v51 = vsel %vm1879_vm4, 1.0, %v6477_v32  ;;  %v1738_v59 = vpop.permute.xlu0 %1737 }
 0x177   : > { %vm1816_vm5 = vcmp.eq.s32.totalorder %v6762_v22, %v1738_v59  ;;  %v1418_v17 = vpop.permute.xlu1 %1417  ;;  %6027 = vmatmul.mubr.msk.f32.gmra.mrb[86].mxu1 %vm2026_vm3, %v5220_v51 }
 0x178   : > { %vm1496_vm6 = vcmp.eq.s32.totalorder %v6762_v22, %v1418_v17 }
 0x179   : > { %vm1880_vm7 = vmor %vm1496_vm6, %vm1816_vm5 }
 0x17a   : > { %v5221_v10 = vsel %vm1880_vm7, 1.0, %v6477_v32  ;;  %v1741_v52 = vpop.permute.xlu0 %1740 }
 0x17b   : > { %vm1817_vm8 = vcmp.eq.s32.totalorder %v6762_v22, %v1741_v52  ;;  %v1421_v38 = vpop.permute.xlu1 %1420  ;;  %6029 = vmatprep.mubr.msk.f32.mxu1 %vm2026_vm3, %v5221_v10 }
 0x17c   : > { %vm1497_vm9 = vcmp.eq.s32.totalorder %v6762_v22, %v1421_v38 }
 0x17d   : > { %vm1881_vm10 = vmor %vm1497_vm9, %vm1817_vm8 }
 0x17e   : > { %v5222_v37 = vsel %vm1881_vm10, 1.0, %v6477_v32  ;;  %v1744_v59 = vpop.permute.xlu0 %1743 }
 0x17f   : > { %vm1818_vm11 = vcmp.eq.s32.totalorder %v6762_v22, %v1744_v59  ;;  %v1424_v51 = vpop.permute.xlu1 %1423  ;;  %6030 = vmatmul.mubr.msk.f32.gmra.mrb[88].mxu1 %vm2026_vm3, %v5222_v37 }
 0x180   : > { %vm1498_vm12 = vcmp.eq.s32.totalorder %v6762_v22, %v1424_v51 }
 0x181   : > { %vm1882_vm13 = vmor %vm1498_vm12, %vm1818_vm11 }
 0x182   : > { %v5223_v17 = vsel %vm1882_vm13, 1.0, %v6477_v32  ;;  %v1747_v52 = vpop.permute.xlu0 %1746 }
 0x183   : > { %vm1819_vm14 = vcmp.eq.s32.totalorder %v6762_v22, %v1747_v52  ;;  %v1427_v10 = vpop.permute.xlu1 %1426  ;;  %6032 = vmatprep.mubr.msk.f32.mxu1 %vm2026_vm3, %v5223_v17 }
 0x184   : > { %vm1499_vm15 = vcmp.eq.s32.totalorder %v6762_v22, %v1427_v10  ;;  %v7177_v10 = vld [vmem:[%s8079_s3] ss:$0 sm:$0xff] }
 0x185   : > { %vm1883_vm0 = vmor %vm1499_vm15, %vm1819_vm14  ;;  %vm2604_vm14 = vcmask 130048   ;;  %vm4956_vm15 = vcmask 7168  }
 0x186   : > { %v5224_v38 = vsel %vm1883_vm0, 1.0, %v6477_v32  ;;  %v1750_v59 = vpop.permute.xlu0 %1749 }
 0x187   : > { %vm1820_vm1 = vcmp.eq.s32.totalorder %v6762_v22, %v1750_v59  ;;  %v1430_v37 = vpop.permute.xlu1 %1429  ;;  %6033 = vmatmul.mubr.msk.f32.gmra.mrb[90].mxu1 %vm2026_vm3, %v5224_v38 }
 0x188   : > { %vm1500_vm2 = vcmp.eq.s32.totalorder %v6762_v22, %v1430_v37 }
 0x189   : > { %vm1884_vm4 = vmor %vm1500_vm2, %vm1820_vm1 }
 0x18a   : > { %v5225_v51 = vsel %vm1884_vm4, 1.0, %v6477_v32  ;;  %v1753_v52 = vpop.permute.xlu0 %1752 }
 0x18b   : > { %vm1821_vm5 = vcmp.eq.s32.totalorder %v6762_v22, %v1753_v52  ;;  %v1433_v17 = vpop.permute.xlu1 %1432  ;;  %6035 = vmatprep.mubr.msk.f32.mxu1 %vm2026_vm3, %v5225_v51  ;;  %v800_v51 = vadd.f32 %v7177_v10, %v6928_v58 }
 0x18c   : > { %vm1501_vm6 = vcmp.eq.s32.totalorder %v6762_v22, %v1433_v17 }
 0x18d   : > { %vm1885_vm7 = vmor %vm1501_vm6, %vm1821_vm5 }
 0x18e   : > { %v5226_v38 = vsel %vm1885_vm7, 1.0, %v6477_v32  ;;  %v1756_v59 = vpop.permute.xlu0 %1755 }
 0x18f   : > { %vm1822_vm8 = vcmp.eq.s32.totalorder %v6762_v22, %v1756_v59  ;;  %v1436_v37 = vpop.permute.xlu1 %1435  ;;  %6036 = vmatmul.mubr.msk.f32.gmra.mrb[92].mxu1 %vm2026_vm3, %v5226_v38  ;;  %v1118_v59 = vmax.f32 %v800_v51, 0.0  ;;  %v810_v38 = vadd.f32 %v7177_v10, %v6936_v63  ;;  %v3319_v63 = vld [vmem:[%s8083_s7 + $0x10] sm:$0xff]  ;;  %v3320_v51 = vld [vmem:[%s8083_s7 + $0x18] sm:$0xff] }
 0x190   : > { %vm1502_vm9 = vcmp.eq.s32.totalorder %v6762_v22, %v1436_v37  ;;  %v805_v37 = vadd.f32 %v6926_v57, %v7177_v10  ;;  %v6373_v21 = vpack.c.bf16 %v3320_v51, %v3319_v63  ;;  %v835_v63 = vadd.f32 %v6950_v8, %v7177_v10 }
 0x191   : > { %vm1886_vm10 = vmor %vm1502_vm9, %vm1822_vm8  ;;  %v860_v8 = vadd.f32 %v7177_v10, %v6980_v27 }
 0x192   : > { %v5227_v52 = vsel %vm1886_vm10, 1.0, %v6477_v32  ;;  %v1759_v17 = vpop.permute.xlu0 %1758 }
 0x193   : > { %vm1823_vm11 = vcmp.eq.s32.totalorder %v6762_v22, %v1759_v17  ;;  %v1439_v20 = vpop.permute.xlu1 %1438  ;;  %6038 = vmatprep.mubr.msk.f32.mxu1 %vm2026_vm3, %v5227_v52  ;;  %v3317_v17 = vld [vmem:[%s8083_s7] sm:$0xff]  ;;  %v1119_v52 = vmax.f32 %v805_v37, 0.0  ;;  %v840_v37 = vadd.f32 %v7177_v10, %v6960_v14  ;;  %v1130_v51 = vmax.f32 %v860_v8, 0.0 }
 0x194   : > { %vm1503_vm12 = vcmp.eq.s32.totalorder %v6762_v22, %v1439_v20  ;;  %v3318_v22 = vld [vmem:[%s8083_s7 + $0x8] sm:$0xff]  ;;  %v1120_v20 = vmax.f32 %v810_v38, 0.0 }
 0x195   : > { %vm1887_vm13 = vmor %vm1503_vm12, %vm1823_vm11  ;;  %v6369_v57 = vpack.c.bf16 %v3318_v22, %v3317_v17  ;;  %v825_v17 = vadd.f32 %v6942_v3, %v7177_v10  ;;  %v850_v3 = vadd.f32 %v7177_v10, %v6968_v19 }
 0x196   : > { %v5228_v58 = vsel %vm1887_vm13, 1.0, %v6477_v32  ;;  %v820_v32 = vadd.f32 %v7177_v10, %v6944_v4  ;;  %v830_v4 = vadd.f32 %v7177_v10, %v6952_v9  ;;  %v1126_v9 = vmax.f32 %v840_v37, 0.0 }
 0x197   : > { %6039 = vmatmul.mubr.msk.f32.gmra.mrb[94].mxu1 %vm2026_vm3, %v5228_v58  ;;  %v815_v58 = vadd.f32 %v6934_v62, %v7177_v10  ;;  %6370 = vmatprep.subr.bf16.mxu0 %v6369_v57  ;;  %v1123_v22 = vmax.f32 %v825_v17, 0.0  ;;  %vm3328_vm3 = vcmask 261120  }
 0x198   : > { %6045 = vmatprep.mubr.msk.f32.mxu1 %vm2604_vm14, %v1118_v59  ;;  %6372 = vmatpush3.bf16.msra.mxu0 %v6369_v57  ;;  %v1122_v38 = vmax.f32 %v820_v32, 0.0  ;;  %v1124_v62 = vmax.f32 %v830_v4, 0.0  ;;  %v1128_v32 = vmax.f32 %v850_v3, 0.0  ;;  %v855_v57 = vadd.f32 %v6966_v18, %v7177_v10 }
 0x199   : > { %6374 = vmatprep.subr.bf16.mxu0 %v6373_v21  ;;  %v1121_v59 = vmax.f32 %v815_v58, 0.0  ;;  %v880_v18 = vadd.f32 %v7177_v10, %v7004_v42 }
 0x19a   : > { %v1129_v19 = vmax.f32 %v855_v57, 0.0 }
 0x19b   : > { %6046 = vmatmul.mubr.msk.f32.vlgmr.msra.gmra.mrb[32].mxu1 %vm2604_vm14, %v1119_v52  ;;  %v865_v52 = vadd.f32 %v6976_v25, %v7177_v10  ;;  %v1134_v4 = vmax.f32 %v880_v18, 0.0  ;;  %v890_v25 = vadd.f32 %v7177_v10, %v7016_v49 }
 0x19c   : > { %6048 = vmatprep.mubr.msk.f32.mxu1 %vm2604_vm14, %v1120_v20  ;;  %6376 = vmatpush3.bf16.msra.mxu0 %v6373_v21  ;;  %v1125_v20 = vmax.f32 %v835_v63, 0.0  ;;  %v845_v21 = vadd.f32 %v6958_v13, %v7177_v10  ;;  %v870_v13 = vadd.f32 %v7177_v10, %v6992_v35 }
 0x19d   : > { %v1131_v27 = vmax.f32 %v865_v52, 0.0  ;;  %v1136_v17 = vmax.f32 %v890_v25, 0.0 }
 0x19e   : > { %v1127_v14 = vmax.f32 %v845_v21, 0.0  ;;  %v1132_v58 = vmax.f32 %v870_v13, 0.0 }
 0x19f   : > { %6049 = vmatmul.mubr.msk.f32.gmra.mrb[34].mxu1 %vm2604_vm14, %v1121_v59  ;;  %v885_v59 = vadd.f32 %v7000_v40, %v7177_v10  ;;  %v910_v40 = vadd.f32 %v7177_v10, %v7040_v5 }
 0x1a0   : > { %6051 = vmatprep.mubr.msk.f32.mxu1 %vm2604_vm14, %v1122_v38  ;;  %v875_v38 = vadd.f32 %v6988_v33, %v7177_v10  ;;  %v900_v33 = vadd.f32 %v7177_v10, %v7028_v56 }
 0x1a1   : > { %v1135_v42 = vmax.f32 %v885_v59, 0.0  ;;  %v1140_v63 = vmax.f32 %v910_v40, 0.0 }
 0x1a2   : > { %v1133_v35 = vmax.f32 %v875_v38, 0.0  ;;  %v1138_v37 = vmax.f32 %v900_v33, 0.0 }
 0x1a3   : > { %6052 = vmatmul.mubr.msk.f32.gmra.mrb[36].mxu1 %vm2604_vm14, %v1123_v22  ;;  %v905_v22 = vadd.f32 %v7024_v54, %v7177_v10  ;;  %v930_v54 = vadd.f32 %v7177_v10, %v7064_v30 }
 0x1a4   : > { %6054 = vmatprep.mubr.msk.f32.mxu1 %vm2604_vm14, %v1124_v62  ;;  %v895_v62 = vadd.f32 %v7012_v47, %v7177_v10  ;;  %v920_v47 = vadd.f32 %v7177_v10, %v7052_v16 }
 0x1a5   : > { %v1139_v56 = vmax.f32 %v905_v22, 0.0  ;;  %v1144_v21 = vmax.f32 %v930_v54, 0.0  ;;  %v8103_v54 = vld [vmem:[#allocation4_spill] sm:$0xff] }
 0x1a6   : > { %v1137_v49 = vmax.f32 %v895_v62, 0.0  ;;  %v1142_v3 = vmax.f32 %v920_v47, 0.0  ;;  %v8101_v47 = vld [vmem:[#allocation3_spill] sm:$0xff] }
 0x1a7   : > { %6055 = vmatmul.mubr.msk.f32.gmra.mrb[38].mxu1 %vm2604_vm14, %v1125_v20  ;;  %v925_v20 = vadd.f32 %v7048_v12, %v7177_v10  ;;  %v950_v12 = vadd.f32 %v7177_v10, %v7088_v7  ;;  %v965_v7 = vadd.f32 %v6973_v24, %v7177_v10 }
 0x1a8   : > { %6057 = vmatprep.mubr.msk.f32.mxu1 %vm2604_vm14, %v1126_v9  ;;  %v915_v9 = vadd.f32 %v7036_v1, %v7177_v10  ;;  %v940_v1 = vadd.f32 %v7177_v10, %v7076_v50 }
 0x1a9   : > { %v1143_v16 = vmax.f32 %v925_v20, 0.0  ;;  %v1148_v57 = vmax.f32 %v950_v12, 0.0  ;;  %v8104_v20 = vld [vmem:[#allocation7_spill] sm:$0xff]  ;;  %v8106_v12 = vld [vmem:[#allocation9_spill] sm:$0xff] }
 0x1aa   : > { %v1141_v5 = vmax.f32 %v915_v9, 0.0  ;;  %v1146_v8 = vmax.f32 %v940_v1, 0.0  ;;  %v8102_v9 = vld [vmem:[#allocation5_spill] sm:$0xff] }
 0x1ab   : > { %6058 = vmatmul.mubr.msk.f32.gmra.mrb[40].mxu1 %vm2604_vm14, %v1127_v14  ;;  %v945_v14 = vadd.f32 %v7072_v44, %v7177_v10 }
 0x1ac   : > { %6060 = vmatprep.mubr.msk.f32.mxu1 %vm2604_vm14, %v1128_v32  ;;  %v935_v32 = vadd.f32 %v7060_v28, %v7177_v10  ;;  %v955_v28 = vadd.f32 %v7084_v61, %v7177_v10  ;;  %v1151_v61 = vmax.f32 %v965_v7, 0.0 }
 0x1ad   : > { %v1147_v50 = vmax.f32 %v945_v14, 0.0 }
 0x1ae   : > { %v1145_v30 = vmax.f32 %v935_v32, 0.0  ;;  %v1149_v44 = vmax.f32 %v955_v28, 0.0 }
 0x1af   : > { %6061 = vmatmul.mubr.msk.f32.gmra.mrb[42].mxu1 %vm2604_vm14, %v1129_v19  ;;  %v970_v19 = vadd.f32 %v7177_v10, %v6990_v34  ;;  %v985_v34 = vadd.f32 %v6997_v39, %v7177_v10 }
 0x1b0   : > { %6063 = vmatprep.mubr.msk.f32.mxu1 %vm2604_vm14, %v1130_v51  ;;  %v960_v51 = vadd.f32 %v7177_v10, %v6978_v26  ;;  %v975_v26 = vadd.f32 %v6985_v31, %v7177_v10 }
 0x1b1   : > { %v1152_v52 = vmax.f32 %v970_v19, 0.0  ;;  %v1155_v31 = vmax.f32 %v985_v34, 0.0 }
 0x1b2   : > { %v1150_v13 = vmax.f32 %v960_v51, 0.0  ;;  %v1153_v24 = vmax.f32 %v975_v26, 0.0  ;;  %v8108_v51 = vld [vmem:[#allocation11_spill] sm:$0xff]  ;;  %v8110_v26 = vld [vmem:[#allocation13_spill] sm:$0xff] }
 0x1b3   : > { %6064 = vmatmul.mubr.msk.f32.gmra.mrb[44].mxu1 %vm2604_vm14, %v1131_v27  ;;  %v990_v27 = vadd.f32 %v7177_v10, %v7014_v48  ;;  %v1005_v48 = vadd.f32 %v7021_v53, %v7177_v10  ;;  %v1100_v7 = vadd.f32 %v7177_v10, %v8108_v51 }
 0x1b4   : > { %6066 = vmatprep.mubr.msk.f32.mxu1 %vm2604_vm14, %v1132_v58  ;;  %v980_v58 = vadd.f32 %v7177_v10, %v7002_v41  ;;  %v995_v41 = vadd.f32 %v7009_v46, %v7177_v10 }
 0x1b5   : > { %v1156_v38 = vmax.f32 %v990_v27, 0.0  ;;  %v1159_v46 = vmax.f32 %v1005_v48, 0.0 }
 0x1b6   : > { %v1154_v18 = vmax.f32 %v980_v58, 0.0  ;;  %v1157_v39 = vmax.f32 %v995_v41, 0.0  ;;  %v3971_v41 = vld [vmem:[%s8085_s9 + $0x8] sm:$0xff] }
 0x1b7   : > { %6067 = vmatmul.mubr.msk.f32.gmra.mrb[46].mxu1 %vm2604_vm14, %v1133_v35  ;;  %v1010_v35 = vadd.f32 %v7177_v10, %v7038_v2  ;;  %v1025_v2 = vadd.f32 %v7045_v11, %v7177_v10 }
 0x1b8   : > { %6069 = vmatprep.mubr.msk.f32.mxu1 %vm2604_vm14, %v1134_v4  ;;  %v1000_v4 = vadd.f32 %v7177_v10, %v7026_v55  ;;  %v1015_v55 = vadd.f32 %v7033_v0, %v7177_v10 }
 0x1b9   : > { %v1160_v59 = vmax.f32 %v1010_v35, 0.0  ;;  %v1163_v0 = vmax.f32 %v1025_v2, 0.0  ;;  %v3972_v35 = vld [vmem:[%s8085_s9 + $0x10] sm:$0xff] }
 0x1ba   : > { %v1158_v25 = vmax.f32 %v1000_v4, 0.0  ;;  %v1161_v53 = vmax.f32 %v1015_v55, 0.0 }
 0x1bb   : > { %6070 = vmatmul.mubr.msk.f32.gmra.mrb[48].mxu1 %vm2604_vm14, %v1135_v42  ;;  %v1030_v42 = vadd.f32 %v7177_v10, %v7062_v29  ;;  %v1045_v29 = vadd.f32 %v7069_v43, %v7177_v10 }
 0x1bc   : > { %6072 = vmatprep.mubr.msk.f32.mxu1 %vm2604_vm14, %v1136_v17  ;;  %v1020_v17 = vadd.f32 %v7177_v10, %v7050_v15  ;;  %v1035_v15 = vadd.f32 %v7057_v23, %v7177_v10 }
 0x1bd   : > { %v1164_v62 = vmax.f32 %v1030_v42, 0.0  ;;  %v1167_v23 = vmax.f32 %v1045_v29, 0.0 }
 0x1be   : > { %v1162_v33 = vmax.f32 %v1020_v17, 0.0  ;;  %v1165_v11 = vmax.f32 %v1035_v15, 0.0 }
 0x1bf   : > { %6073 = vmatmul.mubr.msk.f32.gmra.mrb[50].mxu1 %vm2604_vm14, %v1137_v49  ;;  %v1050_v49 = vadd.f32 %v7177_v10, %v7086_v6  ;;  %v1065_v6 = vadd.f32 %v8101_v47, %v7177_v10 }
 0x1c0   : > { %6075 = vmatprep.mubr.msk.f32.mxu1 %vm2604_vm14, %v1138_v37  ;;  %v1040_v37 = vadd.f32 %v7177_v10, %v7074_v45  ;;  %v1055_v45 = vadd.f32 %v7081_v60, %v7177_v10 }
 0x1c1   : > { %v1168_v22 = vmax.f32 %v1050_v49, 0.0  ;;  %v1171_v60 = vmax.f32 %v1065_v6, 0.0 }
 0x1c2   : > { %v1166_v40 = vmax.f32 %v1040_v37, 0.0  ;;  %v1169_v43 = vmax.f32 %v1055_v45, 0.0 }
 0x1c3   : > { %6076 = vmatmul.mubr.msk.f32.gmra.mrb[52].mxu1 %vm2604_vm14, %v1139_v56 }
 0x1c4   : > { %6078 = vmatprep.mubr.msk.f32.mxu1 %vm2604_vm14, %v1140_v63  ;;  %v1060_v63 = vadd.f32 %v7177_v10, %v7096_v36  ;;  %v1075_v36 = vadd.f32 %v8103_v54, %v7177_v10 }
 0x1c6   : > { %v1170_v56 = vmax.f32 %v1060_v63, 0.0  ;;  %v1173_v1 = vmax.f32 %v1075_v36, 0.0 }
 0x1c7   : > { %6079 = vmatmul.mubr.msk.f32.gmra.mrb[54].mxu1 %vm2604_vm14, %v1141_v5 }
 0x1c8   : > { %6081 = vmatprep.mubr.msk.f32.mxu1 %vm2604_vm14, %v1142_v3  ;;  %v1070_v3 = vadd.f32 %v7177_v10, %v8102_v9 }
 0x1ca   : > { %v1172_v5 = vmax.f32 %v1070_v3, 0.0 }
 0x1cb   : > { %6082 = vmatmul.mubr.msk.f32.gmra.mrb[56].mxu1 %vm2604_vm14, %v1143_v16  ;;  %v8105_v16 = vld [vmem:[#allocation6_spill] sm:$0xff] }
 0x1cc   : > { %6084 = vmatprep.mubr.msk.f32.mxu1 %vm2604_vm14, %v1144_v21  ;;  %v1080_v21 = vadd.f32 %v7177_v10, %v8104_v20  ;;  %v1085_v32 = vadd.f32 %v8105_v16, %v7177_v10 }
 0x1ce   : > { %v1175_v14 = vmax.f32 %v1085_v32, 0.0 }
 0x1cf   : > { %6085 = vmatmul.mubr.msk.f32.gmra.mrb[58].mxu1 %vm2604_vm14, %v1145_v30  ;;  %v1090_v30 = vadd.f32 %v7177_v10, %v8106_v12 }
 0x1d0   : > { %6087 = vmatprep.mubr.msk.f32.mxu1 %vm2604_vm14, %v1146_v8  ;;  %v1174_v8 = vmax.f32 %v1080_v21, 0.0 }
 0x1d1   : > { %v1176_v28 = vmax.f32 %v1090_v30, 0.0 }
 0x1d3   : > { %6088 = vmatmul.mubr.msk.f32.gmra.mrb[60].mxu1 %vm2604_vm14, %v1147_v50 }
 0x1d4   : > { %6090 = vmatprep.mubr.msk.f32.mxu1 %vm2604_vm14, %v1148_v57  ;;  %v8107_v57 = vld [vmem:[#allocation8_spill] sm:$0xff] }
 0x1d5   : > { %v1095_v50 = vadd.f32 %v8107_v57, %v7177_v10 }
 0x1d7   : > { %6091 = vmatmul.mubr.msk.f32.gmra.mrb[62].mxu1 %vm2604_vm14, %v1149_v44  ;;  %v1177_v44 = vmax.f32 %v1095_v50, 0.0 }
 0x1d8   : > { %6093 = vmatprep.mubr.msk.f32.mxu1 %vm2604_vm14, %v1150_v13  ;;  %v8109_v13 = vld [vmem:[#allocation10_spill] sm:$0xff] }
 0x1d9   : > { %v1105_v19 = vadd.f32 %v8109_v13, %v7177_v10 }
 0x1db   : > { %6094 = vmatmul.mubr.msk.f32.gmra.mrb[64].mxu1 %vm2604_vm14, %v1151_v61  ;;  %v1178_v61 = vmax.f32 %v1100_v7, 0.0  ;;  %v1179_v58 = vmax.f32 %v1105_v19, 0.0 }
 0x1dc   : > { %6096 = vmatprep.mubr.msk.f32.mxu1 %vm2604_vm14, %v1152_v52  ;;  %v1110_v52 = vadd.f32 %v7177_v10, %v8110_v26 }
 0x1df   : > { %6097 = vmatmul.mubr.msk.f32.gmra.mrb[66].mxu1 %vm2604_vm14, %v1153_v24  ;;  %v8111_v24 = vld [vmem:[#allocation12_spill] sm:$0xff] }
 0x1e0   : > { %6099 = vmatprep.mubr.msk.f32.mxu1 %vm2604_vm14, %v1154_v18  ;;  %v1115_v34 = vadd.f32 %v8111_v24, %v7177_v10  ;;  %v1180_v18 = vmax.f32 %v1110_v52, 0.0  ;;  %v7402_v10 = vld [vmem:[%s8082_s6] ss:$0 sm:$0xff] }
 0x1e2   : > { %v1181_v27 = vmax.f32 %v1115_v34, 0.0 }
 0x1e3   : > { %6100 = vmatmul.mubr.msk.f32.gmra.mrb[68].mxu1 %vm2604_vm14, %v1155_v31  ;;  %v3970_v31 = vld [vmem:[%s8085_s9] sm:$0xff] }
 0x1e4   : > { %6102 = vmatprep.mubr.msk.f32.mxu1 %vm2604_vm14, %v1156_v38  ;;  %v6377_v38 = vpack.c.bf16 %v3971_v41, %v3970_v31 }
 0x1e6   : > { %6378 = vmatprep.subr.bf16.mxu0 %v6377_v38 }
 0x1e7   : > { %6103 = vmatmul.mubr.msk.f32.gmra.mrb[70].mxu1 %vm2604_vm14, %v1157_v39 }
 0x1e8   : > { %6105 = vmatprep.mubr.msk.f32.mxu1 %vm2604_vm14, %v1158_v25 }
 0x1eb   : > { %6106 = vmatmul.mubr.msk.f32.gmra.mrb[72].mxu1 %vm2604_vm14, %v1159_v46  ;;  %v3973_v46 = vld [vmem:[%s8085_s9 + $0x18] sm:$0xff] }
 0x1ec   : > { %6108 = vmatprep.mubr.msk.f32.mxu1 %vm2604_vm14, %v1160_v59 }
 0x1ef   : > { %6109 = vmatmul.mubr.msk.f32.gmra.mrb[74].mxu1 %vm2604_vm14, %v1161_v53 }
 0x1f0   : > { %6111 = vmatprep.mubr.msk.f32.mxu1 %vm2604_vm14, %v1162_v33  ;;  %v6381_v33 = vpack.c.bf16 %v3973_v46, %v3972_v35 }
 0x1f3   : > { %6112 = vmatmul.mubr.msk.f32.gmra.mrb[76].mxu1 %vm2604_vm14, %v1163_v0 }
 0x1f4   : > { %6114 = vmatprep.mubr.msk.f32.mxu1 %vm2604_vm14, %v1164_v62 }
 0x1f7   : > { %6115 = vmatmul.mubr.msk.f32.gmra.mrb[78].mxu1 %vm2604_vm14, %v1165_v11 }
 0x1f8   : > { %6117 = vmatprep.mubr.msk.f32.mxu1 %vm2604_vm14, %v1166_v40 }
 0x1fb   : > { %6118 = vmatmul.mubr.msk.f32.gmra.mrb[80].mxu1 %vm2604_vm14, %v1167_v23 }
 0x1fc   : > { %6120 = vmatprep.mubr.msk.f32.mxu1 %vm2604_vm14, %v1168_v22 }
 0x1ff   : > { %6121 = vmatmul.mubr.msk.f32.gmra.mrb[82].mxu1 %vm2604_vm14, %v1169_v43 }
 0x200   : > { %6123 = vmatprep.mubr.msk.f32.mxu1 %vm2604_vm14, %v1170_v56 }
 0x203   : > { %6124 = vmatmul.mubr.msk.f32.gmra.mrb[84].mxu1 %vm2604_vm14, %v1171_v60 }
 0x204   : > { %6126 = vmatprep.mubr.msk.f32.mxu1 %vm2604_vm14, %v1172_v5 }
 0x207   : > { %6127 = vmatmul.mubr.msk.f32.gmra.mrb[86].mxu1 %vm2604_vm14, %v1173_v1 }
 0x208   : > { %6129 = vmatprep.mubr.msk.f32.mxu1 %vm2604_vm14, %v1174_v8 }
 0x20b   : > { %6130 = vmatmul.mubr.msk.f32.gmra.mrb[88].mxu1 %vm2604_vm14, %v1175_v14 }
 0x20c   : > { %6132 = vmatprep.mubr.msk.f32.mxu1 %vm2604_vm14, %v1176_v28 }
 0x20f   : > { %6133 = vmatmul.mubr.msk.f32.gmra.mrb[90].mxu1 %vm2604_vm14, %v1177_v44 }
 0x210   : > { %6135 = vmatprep.mubr.msk.f32.mxu1 %vm2604_vm14, %v1178_v61 }
 0x213   : > { %6136 = vmatmul.mubr.msk.f32.gmra.mrb[92].mxu1 %vm2604_vm14, %v1179_v58 }
 0x214   : > { %6138 = vmatprep.mubr.msk.f32.mxu1 %vm2604_vm14, %v1180_v18 }
 0x217   : > { %6139 = vmatmul.mubr.msk.f32.gmra.mrb[94].mxu1 %vm2604_vm14, %v1181_v27 }
 0x26e   : > { %v6047_v4 = vpop.f32.mrb[32].mxu1 }
 0x26f   : > { %v3190_v39 = vadd.f32 %v6047_v4, %v7402_v10  ;;  %v2863_v48 = vpop.f32.mrb[33].mxu1 }
 0x270   : > { %v3189_v25 = vadd.f32 %v7402_v10, %v2863_v48 }
 0x271   : > { %v3254_v17 = vmax.f32 %v3190_v39, 0.0 }
 0x272   : > { %v3253_v55 = vmax.f32 %v3189_v25, 0.0  ;;  %v6050_v59 = vpop.f32.mrb[34].mxu1 }
 0x273   : > { %v3192_v53 = vadd.f32 %v6050_v59, %v7402_v10  ;;  %v2873_v2 = vpop.f32.mrb[35].mxu1 }
 0x274   : > { %v3191_v42 = vadd.f32 %v7402_v10, %v2873_v2  ;;  %6149 = vmatprep.mubr.msk.f32.mxu0 %vm3328_vm3, %v3253_v55 }
 0x275   : > { %6150 = vmatmul.mubr.msk.f32.vlgmr.msra.gmra.mrb[32].mxu0 %vm3328_vm3, %v3254_v17  ;;  %v3256_v62 = vmax.f32 %v3192_v53, 0.0 }
 0x276   : > { %v3255_v0 = vmax.f32 %v3191_v42, 0.0  ;;  %v6053_v15 = vpop.f32.mrb[36].mxu1  ;;  %6380 = vmatpush3.bf16.msra.mxu0 %v6377_v38 }
 0x277   : > { %v3194_v37 = vadd.f32 %v6053_v15, %v7402_v10  ;;  %v2883_v11 = vpop.f32.mrb[37].mxu1  ;;  %6382 = vmatprep.subr.bf16.mxu0 %v6381_v33 }
 0x278   : > { %v3193_v29 = vadd.f32 %v7402_v10, %v2883_v11  ;;  %6152 = vmatprep.mubr.msk.f32.mxu0 %vm3328_vm3, %v3255_v0 }
 0x279   : > { %6153 = vmatmul.mubr.msk.f32.gmra.mrb[34].mxu0 %vm3328_vm3, %v3256_v62  ;;  %v3258_v23 = vmax.f32 %v3194_v37, 0.0 }
 0x27a   : > { %v3257_v40 = vmax.f32 %v3193_v29, 0.0  ;;  %v6056_v49 = vpop.f32.mrb[38].mxu1  ;;  %6384 = vmatpush3.bf16.msra.mxu0 %v6381_v33 }
 0x27b   : > { %v3196_v45 = vadd.f32 %v6056_v49, %v7402_v10  ;;  %v2893_v22 = vpop.f32.mrb[39].mxu1 }
 0x27c   : > { %v3195_v63 = vadd.f32 %v7402_v10, %v2893_v22  ;;  %6155 = vmatprep.mubr.msk.f32.mxu0 %vm3328_vm3, %v3257_v40 }
 0x27d   : > { %6156 = vmatmul.mubr.msk.f32.gmra.mrb[36].mxu0 %vm3328_vm3, %v3258_v23  ;;  %v3260_v6 = vmax.f32 %v3196_v45, 0.0 }
 0x27e   : > { %v3259_v43 = vmax.f32 %v3195_v63, 0.0  ;;  %v6059_v47 = vpop.f32.mrb[40].mxu1 }
 0x27f   : > { %v3198_v56 = vadd.f32 %v6059_v47, %v7402_v10  ;;  %v2903_v9 = vpop.f32.mrb[41].mxu1 }
 0x280   : > { %v3197_v3 = vadd.f32 %v7402_v10, %v2903_v9  ;;  %6158 = vmatprep.mubr.msk.f32.mxu0 %vm3328_vm3, %v3259_v43 }
 0x281   : > { %6159 = vmatmul.mubr.msk.f32.gmra.mrb[38].mxu0 %vm3328_vm3, %v3260_v6  ;;  %v3262_v36 = vmax.f32 %v3198_v56, 0.0 }
 0x282   : > { %v3261_v60 = vmax.f32 %v3197_v3, 0.0  ;;  %v6062_v54 = vpop.f32.mrb[42].mxu1 }
 0x283   : > { %v3200_v5 = vadd.f32 %v6062_v54, %v7402_v10  ;;  %v2913_v20 = vpop.f32.mrb[43].mxu1 }
 0x284   : > { %v3199_v21 = vadd.f32 %v7402_v10, %v2913_v20  ;;  %6161 = vmatprep.mubr.msk.f32.mxu0 %vm3328_vm3, %v3261_v60 }
 0x285   : > { %6162 = vmatmul.mubr.msk.f32.gmra.mrb[40].mxu0 %vm3328_vm3, %v3262_v36  ;;  %v3264_v32 = vmax.f32 %v3200_v5, 0.0 }
 0x286   : > { %v3263_v1 = vmax.f32 %v3199_v21, 0.0  ;;  %v6065_v16 = vpop.f32.mrb[44].mxu1 }
 0x287   : > { %v3202_v8 = vadd.f32 %v6065_v16, %v7402_v10  ;;  %v2923_v12 = vpop.f32.mrb[45].mxu1 }
 0x288   : > { %v3201_v30 = vadd.f32 %v7402_v10, %v2923_v12  ;;  %6164 = vmatprep.mubr.msk.f32.mxu0 %vm3328_vm3, %v3263_v1 }
 0x289   : > { %6165 = vmatmul.mubr.msk.f32.gmra.mrb[42].mxu0 %vm3328_vm3, %v3264_v32  ;;  %v3266_v50 = vmax.f32 %v3202_v8, 0.0 }
 0x28a   : > { %v3265_v14 = vmax.f32 %v3201_v30, 0.0  ;;  %v6068_v57 = vpop.f32.mrb[46].mxu1 }
 0x28b   : > { %v3204_v28 = vadd.f32 %v6068_v57, %v7402_v10  ;;  %v2933_v51 = vpop.f32.mrb[47].mxu1 }
 0x28c   : > { %v3203_v7 = vadd.f32 %v7402_v10, %v2933_v51  ;;  %6167 = vmatprep.mubr.msk.f32.mxu0 %vm3328_vm3, %v3265_v14 }
 0x28d   : > { %6168 = vmatmul.mubr.msk.f32.gmra.mrb[44].mxu0 %vm3328_vm3, %v3266_v50  ;;  %v3268_v19 = vmax.f32 %v3204_v28, 0.0 }
 0x28e   : > { %v3267_v44 = vmax.f32 %v3203_v7, 0.0  ;;  %v6071_v13 = vpop.f32.mrb[48].mxu1 }
 0x28f   : > { %v3206_v61 = vadd.f32 %v6071_v13, %v7402_v10  ;;  %v2943_v26 = vpop.f32.mrb[49].mxu1 }
 0x290   : > { %v3205_v52 = vadd.f32 %v7402_v10, %v2943_v26  ;;  %6170 = vmatprep.mubr.msk.f32.mxu0 %vm3328_vm3, %v3267_v44 }
 0x291   : > { %6171 = vmatmul.mubr.msk.f32.gmra.mrb[46].mxu0 %vm3328_vm3, %v3268_v19  ;;  %v3270_v34 = vmax.f32 %v3206_v61, 0.0 }
 0x292   : > { %v3269_v58 = vmax.f32 %v3205_v52, 0.0  ;;  %v6074_v24 = vpop.f32.mrb[50].mxu1 }
 0x293   : > { %v3208_v18 = vadd.f32 %v6074_v24, %v7402_v10  ;;  %v2953_v27 = vpop.f32.mrb[51].mxu1 }
 0x294   : > { %v3207_v31 = vadd.f32 %v7402_v10, %v2953_v27  ;;  %6173 = vmatprep.mubr.msk.f32.mxu0 %vm3328_vm3, %v3269_v58 }
 0x295   : > { %6174 = vmatmul.mubr.msk.f32.gmra.mrb[48].mxu0 %vm3328_vm3, %v3270_v34  ;;  %v3272_v4 = vmax.f32 %v3208_v18, 0.0 }
 0x296   : > { %v3271_v41 = vmax.f32 %v3207_v31, 0.0  ;;  %v6077_v38 = vpop.f32.mrb[52].mxu1 }
 0x297   : > { %v3210_v39 = vadd.f32 %v6077_v38, %v7402_v10  ;;  %v2963_v48 = vpop.f32.mrb[53].mxu1 }
 0x298   : > { %v3209_v25 = vadd.f32 %v7402_v10, %v2963_v48  ;;  %6176 = vmatprep.mubr.msk.f32.mxu0 %vm3328_vm3, %v3271_v41 }
 0x299   : > { %6177 = vmatmul.mubr.msk.f32.gmra.mrb[50].mxu0 %vm3328_vm3, %v3272_v4  ;;  %v3274_v55 = vmax.f32 %v3210_v39, 0.0 }
 0x29a   : > { %v3273_v35 = vmax.f32 %v3209_v25, 0.0  ;;  %v6080_v46 = vpop.f32.mrb[54].mxu1 }
 0x29b   : > { %v3212_v59 = vadd.f32 %v6080_v46, %v7402_v10  ;;  %v2973_v17 = vpop.f32.mrb[55].mxu1 }
 0x29c   : > { %v3211_v53 = vadd.f32 %v7402_v10, %v2973_v17  ;;  %6179 = vmatprep.mubr.msk.f32.mxu0 %vm3328_vm3, %v3273_v35 }
 0x29d   : > { %6180 = vmatmul.mubr.msk.f32.gmra.mrb[52].mxu0 %vm3328_vm3, %v3274_v55  ;;  %v3276_v42 = vmax.f32 %v3212_v59, 0.0 }
 0x29e   : > { %v3275_v2 = vmax.f32 %v3211_v53, 0.0  ;;  %v6083_v33 = vpop.f32.mrb[56].mxu1 }
 0x29f   : > { %v3214_v0 = vadd.f32 %v6083_v33, %v7402_v10  ;;  %v2983_v15 = vpop.f32.mrb[57].mxu1 }
 0x2a0   : > { %v3213_v62 = vadd.f32 %v7402_v10, %v2983_v15  ;;  %6182 = vmatprep.mubr.msk.f32.mxu0 %vm3328_vm3, %v3275_v2 }
 0x2a1   : > { %6183 = vmatmul.mubr.msk.f32.gmra.mrb[54].mxu0 %vm3328_vm3, %v3276_v42  ;;  %v3278_v29 = vmax.f32 %v3214_v0, 0.0 }
 0x2a2   : > { %v3277_v37 = vmax.f32 %v3213_v62, 0.0  ;;  %v6086_v11 = vpop.f32.mrb[58].mxu1 }
 0x2a3   : > { %v3216_v40 = vadd.f32 %v6086_v11, %v7402_v10  ;;  %v2993_v49 = vpop.f32.mrb[59].mxu1 }
 0x2a4   : > { %v3215_v23 = vadd.f32 %v7402_v10, %v2993_v49  ;;  %6185 = vmatprep.mubr.msk.f32.mxu0 %vm3328_vm3, %v3277_v37 }
 0x2a5   : > { %6186 = vmatmul.mubr.msk.f32.gmra.mrb[56].mxu0 %vm3328_vm3, %v3278_v29  ;;  %v3280_v63 = vmax.f32 %v3216_v40, 0.0 }
 0x2a6   : > { %v3279_v45 = vmax.f32 %v3215_v23, 0.0  ;;  %v6089_v22 = vpop.f32.mrb[60].mxu1 }
 0x2a7   : > { %v3218_v43 = vadd.f32 %v6089_v22, %v7402_v10  ;;  %v3003_v47 = vpop.f32.mrb[61].mxu1 }
 0x2a8   : > { %v3217_v6 = vadd.f32 %v7402_v10, %v3003_v47  ;;  %6188 = vmatprep.mubr.msk.f32.mxu0 %vm3328_vm3, %v3279_v45 }
 0x2a9   : > { %6189 = vmatmul.mubr.msk.f32.gmra.mrb[58].mxu0 %vm3328_vm3, %v3280_v63  ;;  %v3282_v3 = vmax.f32 %v3218_v43, 0.0 }
 0x2aa   : > { %v3281_v56 = vmax.f32 %v3217_v6, 0.0  ;;  %v6092_v9 = vpop.f32.mrb[62].mxu1 }
 0x2ab   : > { %v3220_v60 = vadd.f32 %v6092_v9, %v7402_v10  ;;  %v3013_v54 = vpop.f32.mrb[63].mxu1 }
 0x2ac   : > { %v3219_v36 = vadd.f32 %v7402_v10, %v3013_v54  ;;  %6191 = vmatprep.mubr.msk.f32.mxu0 %vm3328_vm3, %v3281_v56 }
 0x2ad   : > { %6192 = vmatmul.mubr.msk.f32.gmra.mrb[60].mxu0 %vm3328_vm3, %v3282_v3  ;;  %v3284_v21 = vmax.f32 %v3220_v60, 0.0 }
 0x2ae   : > { %v3283_v5 = vmax.f32 %v3219_v36, 0.0  ;;  %v6095_v20 = vpop.f32.mrb[64].mxu1 }
 0x2af   : > { %v3222_v1 = vadd.f32 %v6095_v20, %v7402_v10  ;;  %v3023_v16 = vpop.f32.mrb[65].mxu1 }
 0x2b0   : > { %v3221_v32 = vadd.f32 %v7402_v10, %v3023_v16  ;;  %6194 = vmatprep.mubr.msk.f32.mxu0 %vm3328_vm3, %v3283_v5 }
 0x2b1   : > { %6195 = vmatmul.mubr.msk.f32.gmra.mrb[62].mxu0 %vm3328_vm3, %v3284_v21  ;;  %v3286_v30 = vmax.f32 %v3222_v1, 0.0 }
 0x2b2   : > { %v3285_v8 = vmax.f32 %v3221_v32, 0.0  ;;  %v6098_v12 = vpop.f32.mrb[66].mxu1 }
 0x2b3   : > { %v3224_v14 = vadd.f32 %v6098_v12, %v7402_v10  ;;  %v3033_v57 = vpop.f32.mrb[67].mxu1 }
 0x2b4   : > { %v3223_v50 = vadd.f32 %v7402_v10, %v3033_v57  ;;  %6197 = vmatprep.mubr.msk.f32.mxu0 %vm3328_vm3, %v3285_v8 }
 0x2b5   : > { %6198 = vmatmul.mubr.msk.f32.gmra.mrb[64].mxu0 %vm3328_vm3, %v3286_v30  ;;  %v3288_v7 = vmax.f32 %v3224_v14, 0.0 }
 0x2b6   : > { %v3287_v28 = vmax.f32 %v3223_v50, 0.0  ;;  %v6101_v51 = vpop.f32.mrb[68].mxu1 }
 0x2b7   : > { %v3226_v44 = vadd.f32 %v6101_v51, %v7402_v10  ;;  %v3043_v13 = vpop.f32.mrb[69].mxu1 }
 0x2b8   : > { %v3225_v19 = vadd.f32 %v7402_v10, %v3043_v13  ;;  %6200 = vmatprep.mubr.msk.f32.mxu0 %vm3328_vm3, %v3287_v28 }
 0x2b9   : > { %6201 = vmatmul.mubr.msk.f32.gmra.mrb[66].mxu0 %vm3328_vm3, %v3288_v7  ;;  %v3290_v52 = vmax.f32 %v3226_v44, 0.0 }
 0x2ba   : > { %v3289_v61 = vmax.f32 %v3225_v19, 0.0  ;;  %v6104_v26 = vpop.f32.mrb[70].mxu1 }
 0x2bb   : > { %v3228_v58 = vadd.f32 %v6104_v26, %v7402_v10  ;;  %v3053_v24 = vpop.f32.mrb[71].mxu1 }
 0x2bc   : > { %v3227_v34 = vadd.f32 %v7402_v10, %v3053_v24  ;;  %6203 = vmatprep.mubr.msk.f32.mxu0 %vm3328_vm3, %v3289_v61 }
 0x2bd   : > { %6204 = vmatmul.mubr.msk.f32.gmra.mrb[68].mxu0 %vm3328_vm3, %v3290_v52  ;;  %v3292_v31 = vmax.f32 %v3228_v58, 0.0 }
 0x2be   : > { %v3291_v18 = vmax.f32 %v3227_v34, 0.0  ;;  %v6107_v27 = vpop.f32.mrb[72].mxu1 }
 0x2bf   : > { %v3230_v41 = vadd.f32 %v6107_v27, %v7402_v10  ;;  %v3063_v38 = vpop.f32.mrb[73].mxu1 }
 0x2c0   : > { %v3229_v4 = vadd.f32 %v7402_v10, %v3063_v38  ;;  %6206 = vmatprep.mubr.msk.f32.mxu0 %vm3328_vm3, %v3291_v18 }
 0x2c1   : > { %6207 = vmatmul.mubr.msk.f32.gmra.mrb[70].mxu0 %vm3328_vm3, %v3292_v31  ;;  %v3294_v25 = vmax.f32 %v3230_v41, 0.0 }
 0x2c2   : > { %v3293_v39 = vmax.f32 %v3229_v4, 0.0  ;;  %v6110_v48 = vpop.f32.mrb[74].mxu1 }
 0x2c3   : > { %v3232_v35 = vadd.f32 %v6110_v48, %v7402_v10  ;;  %v3073_v46 = vpop.f32.mrb[75].mxu1 }
 0x2c4   : > { %v3231_v55 = vadd.f32 %v7402_v10, %v3073_v46  ;;  %6209 = vmatprep.mubr.msk.f32.mxu0 %vm3328_vm3, %v3293_v39 }
 0x2c5   : > { %6210 = vmatmul.mubr.msk.f32.gmra.mrb[72].mxu0 %vm3328_vm3, %v3294_v25  ;;  %v3296_v53 = vmax.f32 %v3232_v35, 0.0 }
 0x2c6   : > { %v3295_v59 = vmax.f32 %v3231_v55, 0.0  ;;  %v6113_v17 = vpop.f32.mrb[76].mxu1  ;;  %v7541_v55 = vld [vmem:[%s8084_s8] ss:$0 sm:$0xff] }
 0x2c7   : > { %v3234_v2 = vadd.f32 %v6113_v17, %v7402_v10  ;;  %v3083_v33 = vpop.f32.mrb[77].mxu1 }
 0x2c8   : > { %v3233_v42 = vadd.f32 %v7402_v10, %v3083_v33  ;;  %6212 = vmatprep.mubr.msk.f32.mxu0 %vm3328_vm3, %v3295_v59 }
 0x2c9   : > { %6213 = vmatmul.mubr.msk.f32.gmra.mrb[74].mxu0 %vm3328_vm3, %v3296_v53  ;;  %v3298_v62 = vmax.f32 %v3234_v2, 0.0 }
 0x2ca   : > { %v3297_v0 = vmax.f32 %v3233_v42, 0.0  ;;  %v6116_v15 = vpop.f32.mrb[78].mxu1 }
 0x2cb   : > { %v3236_v37 = vadd.f32 %v6116_v15, %v7402_v10  ;;  %v3093_v11 = vpop.f32.mrb[79].mxu1 }
 0x2cc   : > { %v3235_v29 = vadd.f32 %v7402_v10, %v3093_v11  ;;  %6215 = vmatprep.mubr.msk.f32.mxu0 %vm3328_vm3, %v3297_v0 }
 0x2cd   : > { %6216 = vmatmul.mubr.msk.f32.gmra.mrb[76].mxu0 %vm3328_vm3, %v3298_v62  ;;  %v3300_v23 = vmax.f32 %v3236_v37, 0.0 }
 0x2ce   : > { %v3299_v40 = vmax.f32 %v3235_v29, 0.0  ;;  %v6119_v49 = vpop.f32.mrb[80].mxu1 }
 0x2cf   : > { %v3238_v45 = vadd.f32 %v6119_v49, %v7402_v10  ;;  %v3103_v22 = vpop.f32.mrb[81].mxu1 }
 0x2d0   : > { %v3237_v63 = vadd.f32 %v7402_v10, %v3103_v22  ;;  %6218 = vmatprep.mubr.msk.f32.mxu0 %vm3328_vm3, %v3299_v40 }
 0x2d1   : > { %6219 = vmatmul.mubr.msk.f32.gmra.mrb[78].mxu0 %vm3328_vm3, %v3300_v23  ;;  %v3302_v6 = vmax.f32 %v3238_v45, 0.0 }
 0x2d2   : > { %v3301_v43 = vmax.f32 %v3237_v63, 0.0  ;;  %v6122_v47 = vpop.f32.mrb[82].mxu1 }
 0x2d3   : > { %v3240_v56 = vadd.f32 %v6122_v47, %v7402_v10  ;;  %v3113_v9 = vpop.f32.mrb[83].mxu1 }
 0x2d4   : > { %v3239_v3 = vadd.f32 %v7402_v10, %v3113_v9  ;;  %6221 = vmatprep.mubr.msk.f32.mxu0 %vm3328_vm3, %v3301_v43 }
 0x2d5   : > { %6222 = vmatmul.mubr.msk.f32.gmra.mrb[80].mxu0 %vm3328_vm3, %v3302_v6  ;;  %v3304_v36 = vmax.f32 %v3240_v56, 0.0 }
 0x2d6   : > { %v3303_v60 = vmax.f32 %v3239_v3, 0.0  ;;  %v6125_v54 = vpop.f32.mrb[84].mxu1 }
 0x2d7   : > { %v3242_v5 = vadd.f32 %v6125_v54, %v7402_v10  ;;  %v3123_v20 = vpop.f32.mrb[85].mxu1 }
 0x2d8   : > { %v3241_v21 = vadd.f32 %v7402_v10, %v3123_v20  ;;  %6224 = vmatprep.mubr.msk.f32.mxu0 %vm3328_vm3, %v3303_v60 }
 0x2d9   : > { %6225 = vmatmul.mubr.msk.f32.gmra.mrb[82].mxu0 %vm3328_vm3, %v3304_v36  ;;  %v3306_v32 = vmax.f32 %v3242_v5, 0.0 }
 0x2da   : > { %v3305_v1 = vmax.f32 %v3241_v21, 0.0  ;;  %v6128_v16 = vpop.f32.mrb[86].mxu1 }
 0x2db   : > { %v3244_v8 = vadd.f32 %v6128_v16, %v7402_v10  ;;  %v3133_v12 = vpop.f32.mrb[87].mxu1 }
 0x2dc   : > { %v3243_v30 = vadd.f32 %v7402_v10, %v3133_v12  ;;  %6227 = vmatprep.mubr.msk.f32.mxu0 %vm3328_vm3, %v3305_v1 }
 0x2dd   : > { %6228 = vmatmul.mubr.msk.f32.gmra.mrb[84].mxu0 %vm3328_vm3, %v3306_v32  ;;  %v3308_v50 = vmax.f32 %v3244_v8, 0.0 }
 0x2de   : > { %v3307_v14 = vmax.f32 %v3243_v30, 0.0  ;;  %v6131_v57 = vpop.f32.mrb[88].mxu1 }
 0x2df   : > { %v3246_v28 = vadd.f32 %v6131_v57, %v7402_v10  ;;  %v3143_v51 = vpop.f32.mrb[89].mxu1 }
 0x2e0   : > { %v3245_v7 = vadd.f32 %v7402_v10, %v3143_v51  ;;  %6230 = vmatprep.mubr.msk.f32.mxu0 %vm3328_vm3, %v3307_v14 }
 0x2e1   : > { %6231 = vmatmul.mubr.msk.f32.gmra.mrb[86].mxu0 %vm3328_vm3, %v3308_v50  ;;  %v3310_v19 = vmax.f32 %v3246_v28, 0.0 }
 0x2e2   : > { %v3309_v44 = vmax.f32 %v3245_v7, 0.0  ;;  %v6134_v13 = vpop.f32.mrb[90].mxu1 }
 0x2e3   : > { %v3248_v61 = vadd.f32 %v6134_v13, %v7402_v10  ;;  %v3153_v26 = vpop.f32.mrb[91].mxu1 }
 0x2e4   : > { %v3247_v52 = vadd.f32 %v7402_v10, %v3153_v26  ;;  %6233 = vmatprep.mubr.msk.f32.mxu0 %vm3328_vm3, %v3309_v44 }
 0x2e5   : > { %6234 = vmatmul.mubr.msk.f32.gmra.mrb[88].mxu0 %vm3328_vm3, %v3310_v19  ;;  %v3312_v34 = vmax.f32 %v3248_v61, 0.0 }
 0x2e6   : > { %v3311_v58 = vmax.f32 %v3247_v52, 0.0  ;;  %v6137_v24 = vpop.f32.mrb[92].mxu1 }
 0x2e7   : > { %v3250_v18 = vadd.f32 %v6137_v24, %v7402_v10  ;;  %v3163_v27 = vpop.f32.mrb[93].mxu1 }
 0x2e8   : > { %v3249_v31 = vadd.f32 %v7402_v10, %v3163_v27  ;;  %6236 = vmatprep.mubr.msk.f32.mxu0 %vm3328_vm3, %v3311_v58 }
 0x2e9   : > { %6237 = vmatmul.mubr.msk.f32.gmra.mrb[90].mxu0 %vm3328_vm3, %v3312_v34  ;;  %v3314_v4 = vmax.f32 %v3250_v18, 0.0 }
 0x2ea   : > { %v3313_v41 = vmax.f32 %v3249_v31, 0.0  ;;  %v6140_v38 = vpop.f32.mrb[94].mxu1 }
 0x2eb   : > { %v3252_v39 = vadd.f32 %v6140_v38, %v7402_v10  ;;  %v3173_v48 = vpop.f32.mrb[95].mxu1 }
 0x2ec   : > { %v3251_v25 = vadd.f32 %v7402_v10, %v3173_v48  ;;  %6239 = vmatprep.mubr.msk.f32.mxu0 %vm3328_vm3, %v3313_v41 }
 0x2ed   : > { %6240 = vmatmul.mubr.msk.f32.gmra.mrb[92].mxu0 %vm3328_vm3, %v3314_v4  ;;  %v3316_v46 = vmax.f32 %v3252_v39, 0.0 }
 0x2ee   : > { %v3315_v35 = vmax.f32 %v3251_v25, 0.0 }
 0x2f0   : > { %6242 = vmatprep.mubr.msk.f32.mxu0 %vm3328_vm3, %v3315_v35 }
 0x2f1   : > { %6243 = vmatmul.mubr.msk.f32.gmra.mrb[94].mxu0 %vm3328_vm3, %v3316_v46 }
 0x348   : > { %v6151_v59 = vpop.f32.mrb[32].mxu0 }
 0x349   : > { %v3593_v17 = vadd.f32 %v6151_v59, %v7541_v55  ;;  %v3587_v53 = vpop.f32.mrb[33].mxu0 }
 0x34a   : > { %v3588_v10 = vadd.f32 %v7541_v55, %v3587_v53 }
 0x34b   : > { %v3907_v42 = vmax.f32 %v3593_v17, 0.0 }
 0x34c   : > { %v3906_v2 = vmax.f32 %v3588_v10, 0.0  ;;  %v6154_v33 = vpop.f32.mrb[34].mxu0 }
 0x34d   : > { %v3603_v0 = vadd.f32 %v6154_v33, %v7541_v55  ;;  %v3597_v15 = vpop.f32.mrb[35].mxu0 }
 0x34e   : > { %v3598_v62 = vadd.f32 %v7541_v55, %v3597_v15  ;;  %6253 = vmatprep.mubr.msk.f32.mxu0 %vm3328_vm3, %v3906_v2 }
 0x34f   : > { %6254 = vmatmul.mubr.msk.f32.vlgmr.msra.gmra.mrb[96].mxu0 %vm3328_vm3, %v3907_v42  ;;  %v3909_v29 = vmax.f32 %v3603_v0, 0.0 }
 0x350   : > { %v3908_v37 = vmax.f32 %v3598_v62, 0.0  ;;  %v6157_v11 = vpop.f32.mrb[36].mxu0 }
 0x351   : > { %v3613_v40 = vadd.f32 %v6157_v11, %v7541_v55  ;;  %v3607_v49 = vpop.f32.mrb[37].mxu0 }
 0x352   : > { %v3608_v23 = vadd.f32 %v7541_v55, %v3607_v49  ;;  %6256 = vmatprep.mubr.msk.f32.mxu0 %vm3328_vm3, %v3908_v37 }
 0x353   : > { %6257 = vmatmul.mubr.msk.f32.gmra.mrb[98].mxu0 %vm3328_vm3, %v3909_v29  ;;  %v3911_v63 = vmax.f32 %v3613_v40, 0.0 }
 0x354   : > { %v3910_v45 = vmax.f32 %v3608_v23, 0.0  ;;  %v6160_v22 = vpop.f32.mrb[38].mxu0 }
 0x355   : > { %v3623_v43 = vadd.f32 %v6160_v22, %v7541_v55  ;;  %v3617_v47 = vpop.f32.mrb[39].mxu0 }
 0x356   : > { %v3618_v6 = vadd.f32 %v7541_v55, %v3617_v47  ;;  %6259 = vmatprep.mubr.msk.f32.mxu0 %vm3328_vm3, %v3910_v45 }
 0x357   : > { %6260 = vmatmul.mubr.msk.f32.gmra.mrb[100].mxu0 %vm3328_vm3, %v3911_v63  ;;  %v3913_v3 = vmax.f32 %v3623_v43, 0.0 }
 0x358   : > { %v3912_v56 = vmax.f32 %v3618_v6, 0.0  ;;  %v6163_v9 = vpop.f32.mrb[40].mxu0 }
 0x359   : > { %v3633_v60 = vadd.f32 %v6163_v9, %v7541_v55  ;;  %v3627_v54 = vpop.f32.mrb[41].mxu0 }
 0x35a   : > { %v3628_v36 = vadd.f32 %v7541_v55, %v3627_v54  ;;  %6262 = vmatprep.mubr.msk.f32.mxu0 %vm3328_vm3, %v3912_v56 }
 0x35b   : > { %6263 = vmatmul.mubr.msk.f32.gmra.mrb[102].mxu0 %vm3328_vm3, %v3913_v3  ;;  %v3915_v21 = vmax.f32 %v3633_v60, 0.0 }
 0x35c   : > { %v3914_v5 = vmax.f32 %v3628_v36, 0.0  ;;  %v6166_v20 = vpop.f32.mrb[42].mxu0 }
 0x35d   : > { %v3643_v1 = vadd.f32 %v6166_v20, %v7541_v55  ;;  %v3637_v16 = vpop.f32.mrb[43].mxu0 }
 0x35e   : > { %v3638_v32 = vadd.f32 %v7541_v55, %v3637_v16  ;;  %6265 = vmatprep.mubr.msk.f32.mxu0 %vm3328_vm3, %v3914_v5 }
 0x35f   : > { %6266 = vmatmul.mubr.msk.f32.gmra.mrb[104].mxu0 %vm3328_vm3, %v3915_v21  ;;  %v3917_v30 = vmax.f32 %v3643_v1, 0.0 }
 0x360   : > { %v3916_v8 = vmax.f32 %v3638_v32, 0.0  ;;  %v6169_v12 = vpop.f32.mrb[44].mxu0 }
 0x361   : > { %v3653_v14 = vadd.f32 %v6169_v12, %v7541_v55  ;;  %v3647_v57 = vpop.f32.mrb[45].mxu0 }
 0x362   : > { %v3648_v50 = vadd.f32 %v7541_v55, %v3647_v57  ;;  %6268 = vmatprep.mubr.msk.f32.mxu0 %vm3328_vm3, %v3916_v8 }
 0x363   : > { %6269 = vmatmul.mubr.msk.f32.gmra.mrb[106].mxu0 %vm3328_vm3, %v3917_v30  ;;  %v3919_v7 = vmax.f32 %v3653_v14, 0.0 }
 0x364   : > { %v3918_v28 = vmax.f32 %v3648_v50, 0.0  ;;  %v6172_v51 = vpop.f32.mrb[46].mxu0 }
 0x365   : > { %v3663_v44 = vadd.f32 %v6172_v51, %v7541_v55  ;;  %v3657_v13 = vpop.f32.mrb[47].mxu0 }
 0x366   : > { %v3658_v19 = vadd.f32 %v7541_v55, %v3657_v13  ;;  %6271 = vmatprep.mubr.msk.f32.mxu0 %vm3328_vm3, %v3918_v28 }
 0x367   : > { %6272 = vmatmul.mubr.msk.f32.gmra.mrb[108].mxu0 %vm3328_vm3, %v3919_v7  ;;  %v3921_v52 = vmax.f32 %v3663_v44, 0.0 }
 0x368   : > { %v3920_v61 = vmax.f32 %v3658_v19, 0.0  ;;  %v6175_v26 = vpop.f32.mrb[48].mxu0 }
 0x369   : > { %v3673_v58 = vadd.f32 %v6175_v26, %v7541_v55  ;;  %v3667_v24 = vpop.f32.mrb[49].mxu0 }
 0x36a   : > { %v3668_v34 = vadd.f32 %v7541_v55, %v3667_v24  ;;  %6274 = vmatprep.mubr.msk.f32.mxu0 %vm3328_vm3, %v3920_v61 }
 0x36b   : > { %6275 = vmatmul.mubr.msk.f32.gmra.mrb[110].mxu0 %vm3328_vm3, %v3921_v52  ;;  %v3923_v31 = vmax.f32 %v3673_v58, 0.0 }
 0x36c   : > { %v3922_v18 = vmax.f32 %v3668_v34, 0.0  ;;  %v6178_v27 = vpop.f32.mrb[50].mxu0 }
 0x36d   : > { %v3683_v41 = vadd.f32 %v6178_v27, %v7541_v55  ;;  %v3677_v38 = vpop.f32.mrb[51].mxu0 }
 0x36e   : > { %v3678_v4 = vadd.f32 %v7541_v55, %v3677_v38  ;;  %6277 = vmatprep.mubr.msk.f32.mxu0 %vm3328_vm3, %v3922_v18 }
 0x36f   : > { %6278 = vmatmul.mubr.msk.f32.gmra.mrb[112].mxu0 %vm3328_vm3, %v3923_v31  ;;  %v3925_v25 = vmax.f32 %v3683_v41, 0.0 }
 0x370   : > { %v3924_v39 = vmax.f32 %v3678_v4, 0.0  ;;  %v6181_v48 = vpop.f32.mrb[52].mxu0 }
 0x371   : > { %v3693_v35 = vadd.f32 %v6181_v48, %v7541_v55  ;;  %v3687_v46 = vpop.f32.mrb[53].mxu0 }
 0x372   : > { %v3688_v59 = vadd.f32 %v7541_v55, %v3687_v46  ;;  %6280 = vmatprep.mubr.msk.f32.mxu0 %vm3328_vm3, %v3924_v39 }
 0x373   : > { %6281 = vmatmul.mubr.msk.f32.gmra.mrb[114].mxu0 %vm3328_vm3, %v3925_v25  ;;  %v3927_v10 = vmax.f32 %v3693_v35, 0.0 }
 0x374   : > { %v3926_v17 = vmax.f32 %v3688_v59, 0.0  ;;  %v6184_v53 = vpop.f32.mrb[54].mxu0 }
 0x375   : > { %v3703_v2 = vadd.f32 %v6184_v53, %v7541_v55  ;;  %v3697_v33 = vpop.f32.mrb[55].mxu0 }
 0x376   : > { %v3698_v42 = vadd.f32 %v7541_v55, %v3697_v33  ;;  %6283 = vmatprep.mubr.msk.f32.mxu0 %vm3328_vm3, %v3926_v17 }
 0x377   : > { %6284 = vmatmul.mubr.msk.f32.gmra.mrb[116].mxu0 %vm3328_vm3, %v3927_v10  ;;  %v3929_v62 = vmax.f32 %v3703_v2, 0.0 }
 0x378   : > { %v3928_v0 = vmax.f32 %v3698_v42, 0.0  ;;  %v6187_v15 = vpop.f32.mrb[56].mxu0 }
 0x379   : > { %v3713_v37 = vadd.f32 %v6187_v15, %v7541_v55  ;;  %v3707_v11 = vpop.f32.mrb[57].mxu0 }
 0x37a   : > { %v3708_v29 = vadd.f32 %v7541_v55, %v3707_v11  ;;  %6286 = vmatprep.mubr.msk.f32.mxu0 %vm3328_vm3, %v3928_v0 }
 0x37b   : > { %6287 = vmatmul.mubr.msk.f32.gmra.mrb[118].mxu0 %vm3328_vm3, %v3929_v62  ;;  %v3931_v23 = vmax.f32 %v3713_v37, 0.0 }
 0x37c   : > { %v3930_v40 = vmax.f32 %v3708_v29, 0.0  ;;  %v6190_v49 = vpop.f32.mrb[58].mxu0 }
 0x37d   : > { %v3723_v45 = vadd.f32 %v6190_v49, %v7541_v55  ;;  %v3717_v22 = vpop.f32.mrb[59].mxu0 }
 0x37e   : > { %v3718_v63 = vadd.f32 %v7541_v55, %v3717_v22  ;;  %6289 = vmatprep.mubr.msk.f32.mxu0 %vm3328_vm3, %v3930_v40 }
 0x37f   : > { %6290 = vmatmul.mubr.msk.f32.gmra.mrb[120].mxu0 %vm3328_vm3, %v3931_v23  ;;  %v3933_v6 = vmax.f32 %v3723_v45, 0.0 }
 0x380   : > { %v3932_v43 = vmax.f32 %v3718_v63, 0.0  ;;  %v6193_v47 = vpop.f32.mrb[60].mxu0 }
 0x381   : > { %v3733_v56 = vadd.f32 %v6193_v47, %v7541_v55  ;;  %v3727_v9 = vpop.f32.mrb[61].mxu0 }
 0x382   : > { %v3728_v3 = vadd.f32 %v7541_v55, %v3727_v9  ;;  %6292 = vmatprep.mubr.msk.f32.mxu0 %vm3328_vm3, %v3932_v43 }
 0x383   : > { %6293 = vmatmul.mubr.msk.f32.gmra.mrb[122].mxu0 %vm3328_vm3, %v3933_v6  ;;  %v3935_v36 = vmax.f32 %v3733_v56, 0.0 }
 0x384   : > { %v3934_v60 = vmax.f32 %v3728_v3, 0.0  ;;  %v6196_v54 = vpop.f32.mrb[62].mxu0 }
 0x385   : > { %v3743_v5 = vadd.f32 %v6196_v54, %v7541_v55  ;;  %v3737_v20 = vpop.f32.mrb[63].mxu0 }
 0x386   : > { %v3738_v21 = vadd.f32 %v7541_v55, %v3737_v20  ;;  %6295 = vmatprep.mubr.msk.f32.mxu0 %vm3328_vm3, %v3934_v60 }
 0x387   : > { %6296 = vmatmul.mubr.msk.f32.gmra.mrb[124].mxu0 %vm3328_vm3, %v3935_v36  ;;  %v3937_v32 = vmax.f32 %v3743_v5, 0.0 }
 0x388   : > { %v3936_v1 = vmax.f32 %v3738_v21, 0.0  ;;  %v6199_v16 = vpop.f32.mrb[64].mxu0 }
 0x389   : > { %v3753_v8 = vadd.f32 %v6199_v16, %v7541_v55  ;;  %v3747_v12 = vpop.f32.mrb[65].mxu0 }
 0x38a   : > { %v3748_v30 = vadd.f32 %v7541_v55, %v3747_v12  ;;  %6298 = vmatprep.mubr.msk.f32.mxu0 %vm3328_vm3, %v3936_v1 }
 0x38b   : > { %6299 = vmatmul.mubr.msk.f32.gmra.mrb[126].mxu0 %vm3328_vm3, %v3937_v32  ;;  %v3939_v50 = vmax.f32 %v3753_v8, 0.0 }
 0x38c   : > { %v3938_v14 = vmax.f32 %v3748_v30, 0.0  ;;  %v6202_v57 = vpop.f32.mrb[66].mxu0 }
 0x38d   : > { %v3763_v28 = vadd.f32 %v6202_v57, %v7541_v55  ;;  %v3757_v51 = vpop.f32.mrb[67].mxu0 }
 0x38e   : > { %v3758_v7 = vadd.f32 %v7541_v55, %v3757_v51  ;;  %6301 = vmatprep.mubr.msk.f32.mxu0 %vm3328_vm3, %v3938_v14 }
 0x38f   : > { %6302 = vmatmul.mubr.msk.f32.gmra.mrb[128].mxu0 %vm3328_vm3, %v3939_v50  ;;  %v3941_v19 = vmax.f32 %v3763_v28, 0.0 }
 0x390   : > { %v3940_v44 = vmax.f32 %v3758_v7, 0.0  ;;  %v6205_v13 = vpop.f32.mrb[68].mxu0 }
 0x391   : > { %v3773_v61 = vadd.f32 %v6205_v13, %v7541_v55  ;;  %v3767_v26 = vpop.f32.mrb[69].mxu0 }
 0x392   : > { %v3768_v52 = vadd.f32 %v7541_v55, %v3767_v26  ;;  %6304 = vmatprep.mubr.msk.f32.mxu0 %vm3328_vm3, %v3940_v44 }
 0x393   : > { %6305 = vmatmul.mubr.msk.f32.gmra.mrb[130].mxu0 %vm3328_vm3, %v3941_v19  ;;  %v3943_v34 = vmax.f32 %v3773_v61, 0.0 }
 0x394   : > { %v3942_v58 = vmax.f32 %v3768_v52, 0.0  ;;  %v6208_v24 = vpop.f32.mrb[70].mxu0 }
 0x395   : > { %v3783_v18 = vadd.f32 %v6208_v24, %v7541_v55  ;;  %v3777_v27 = vpop.f32.mrb[71].mxu0 }
 0x396   : > { %v3778_v31 = vadd.f32 %v7541_v55, %v3777_v27  ;;  %6307 = vmatprep.mubr.msk.f32.mxu0 %vm3328_vm3, %v3942_v58 }
 0x397   : > { %6308 = vmatmul.mubr.msk.f32.gmra.mrb[132].mxu0 %vm3328_vm3, %v3943_v34  ;;  %v3945_v4 = vmax.f32 %v3783_v18, 0.0 }
 0x398   : > { %v3944_v41 = vmax.f32 %v3778_v31, 0.0  ;;  %v6211_v38 = vpop.f32.mrb[72].mxu0 }
 0x399   : > { %v3793_v39 = vadd.f32 %v6211_v38, %v7541_v55  ;;  %v3787_v48 = vpop.f32.mrb[73].mxu0 }
 0x39a   : > { %v3788_v25 = vadd.f32 %v7541_v55, %v3787_v48  ;;  %6310 = vmatprep.mubr.msk.f32.mxu0 %vm3328_vm3, %v3944_v41 }
 0x39b   : > { %6311 = vmatmul.mubr.msk.f32.gmra.mrb[134].mxu0 %vm3328_vm3, %v3945_v4  ;;  %v3947_v59 = vmax.f32 %v3793_v39, 0.0 }
 0x39c   : > { %v3946_v35 = vmax.f32 %v3788_v25, 0.0  ;;  %v6214_v46 = vpop.f32.mrb[74].mxu0 }
 0x39d   : > { %v3803_v17 = vadd.f32 %v6214_v46, %v7541_v55  ;;  %v3797_v53 = vpop.f32.mrb[75].mxu0 }
 0x39e   : > { %v3798_v10 = vadd.f32 %v7541_v55, %v3797_v53  ;;  %6313 = vmatprep.mubr.msk.f32.mxu0 %vm3328_vm3, %v3946_v35 }
 0x39f   : > { %6314 = vmatmul.mubr.msk.f32.gmra.mrb[136].mxu0 %vm3328_vm3, %v3947_v59  ;;  %v3949_v42 = vmax.f32 %v3803_v17, 0.0 }
 0x3a0   : > { %v3948_v2 = vmax.f32 %v3798_v10, 0.0  ;;  %v6217_v33 = vpop.f32.mrb[76].mxu0  ;;  %v7674_v10 = vld [vmem:[%s8086_s10] ss:$0 sm:$0xff] }
 0x3a1   : > { %v3813_v0 = vadd.f32 %v6217_v33, %v7541_v55  ;;  %v3807_v15 = vpop.f32.mrb[77].mxu0 }
 0x3a2   : > { %v3808_v62 = vadd.f32 %v7541_v55, %v3807_v15  ;;  %6316 = vmatprep.mubr.msk.f32.mxu0 %vm3328_vm3, %v3948_v2 }
 0x3a3   : > { %6317 = vmatmul.mubr.msk.f32.gmra.mrb[138].mxu0 %vm3328_vm3, %v3949_v42  ;;  %v3951_v29 = vmax.f32 %v3813_v0, 0.0 }
 0x3a4   : > { %v3950_v37 = vmax.f32 %v3808_v62, 0.0  ;;  %v6220_v11 = vpop.f32.mrb[78].mxu0 }
 0x3a5   : > { %v3823_v40 = vadd.f32 %v6220_v11, %v7541_v55  ;;  %v3817_v49 = vpop.f32.mrb[79].mxu0 }
 0x3a6   : > { %v3818_v23 = vadd.f32 %v7541_v55, %v3817_v49  ;;  %6319 = vmatprep.mubr.msk.f32.mxu0 %vm3328_vm3, %v3950_v37 }
 0x3a7   : > { %6320 = vmatmul.mubr.msk.f32.gmra.mrb[140].mxu0 %vm3328_vm3, %v3951_v29  ;;  %v3953_v63 = vmax.f32 %v3823_v40, 0.0 }
 0x3a8   : > { %v3952_v45 = vmax.f32 %v3818_v23, 0.0  ;;  %v6223_v22 = vpop.f32.mrb[80].mxu0 }
 0x3a9   : > { %v3833_v43 = vadd.f32 %v6223_v22, %v7541_v55  ;;  %v3827_v47 = vpop.f32.mrb[81].mxu0 }
 0x3aa   : > { %v3828_v6 = vadd.f32 %v7541_v55, %v3827_v47  ;;  %6322 = vmatprep.mubr.msk.f32.mxu0 %vm3328_vm3, %v3952_v45 }
 0x3ab   : > { %6323 = vmatmul.mubr.msk.f32.gmra.mrb[142].mxu0 %vm3328_vm3, %v3953_v63  ;;  %v3955_v3 = vmax.f32 %v3833_v43, 0.0 }
 0x3ac   : > { %v3954_v56 = vmax.f32 %v3828_v6, 0.0  ;;  %v6226_v9 = vpop.f32.mrb[82].mxu0 }
 0x3ad   : > { %v3843_v60 = vadd.f32 %v6226_v9, %v7541_v55  ;;  %v3837_v54 = vpop.f32.mrb[83].mxu0 }
 0x3ae   : > { %v3838_v36 = vadd.f32 %v7541_v55, %v3837_v54  ;;  %6325 = vmatprep.mubr.msk.f32.mxu0 %vm3328_vm3, %v3954_v56 }
 0x3af   : > { %6326 = vmatmul.mubr.msk.f32.gmra.mrb[144].mxu0 %vm3328_vm3, %v3955_v3  ;;  %v3957_v21 = vmax.f32 %v3843_v60, 0.0 }
 0x3b0   : > { %v3956_v5 = vmax.f32 %v3838_v36, 0.0  ;;  %v6229_v20 = vpop.f32.mrb[84].mxu0 }
 0x3b1   : > { %v3853_v1 = vadd.f32 %v6229_v20, %v7541_v55  ;;  %v3847_v16 = vpop.f32.mrb[85].mxu0 }
 0x3b2   : > { %v3848_v32 = vadd.f32 %v7541_v55, %v3847_v16  ;;  %6328 = vmatprep.mubr.msk.f32.mxu0 %vm3328_vm3, %v3956_v5 }
 0x3b3   : > { %6329 = vmatmul.mubr.msk.f32.gmra.mrb[146].mxu0 %vm3328_vm3, %v3957_v21  ;;  %v3959_v30 = vmax.f32 %v3853_v1, 0.0 }
 0x3b4   : > { %v3958_v8 = vmax.f32 %v3848_v32, 0.0  ;;  %v6232_v12 = vpop.f32.mrb[86].mxu0 }
 0x3b5   : > { %v3863_v14 = vadd.f32 %v6232_v12, %v7541_v55  ;;  %v3857_v57 = vpop.f32.mrb[87].mxu0 }
 0x3b6   : > { %v3858_v50 = vadd.f32 %v7541_v55, %v3857_v57  ;;  %6331 = vmatprep.mubr.msk.f32.mxu0 %vm3328_vm3, %v3958_v8 }
 0x3b7   : > { %6332 = vmatmul.mubr.msk.f32.gmra.mrb[148].mxu0 %vm3328_vm3, %v3959_v30  ;;  %v3961_v7 = vmax.f32 %v3863_v14, 0.0 }
 0x3b8   : > { %v3960_v28 = vmax.f32 %v3858_v50, 0.0  ;;  %v6235_v51 = vpop.f32.mrb[88].mxu0 }
 0x3b9   : > { %v3873_v44 = vadd.f32 %v6235_v51, %v7541_v55  ;;  %v3867_v13 = vpop.f32.mrb[89].mxu0 }
 0x3ba   : > { %v3868_v19 = vadd.f32 %v7541_v55, %v3867_v13  ;;  %6334 = vmatprep.mubr.msk.f32.mxu0 %vm3328_vm3, %v3960_v28 }
 0x3bb   : > { %6335 = vmatmul.mubr.msk.f32.gmra.mrb[150].mxu0 %vm3328_vm3, %v3961_v7  ;;  %v3963_v52 = vmax.f32 %v3873_v44, 0.0 }
 0x3bc   : > { %v3962_v61 = vmax.f32 %v3868_v19, 0.0  ;;  %v6238_v26 = vpop.f32.mrb[90].mxu0 }
 0x3bd   : > { %v3883_v58 = vadd.f32 %v6238_v26, %v7541_v55  ;;  %v3877_v24 = vpop.f32.mrb[91].mxu0 }
 0x3be   : > { %v3878_v34 = vadd.f32 %v7541_v55, %v3877_v24  ;;  %6337 = vmatprep.mubr.msk.f32.mxu0 %vm3328_vm3, %v3962_v61 }
 0x3bf   : > { %6338 = vmatmul.mubr.msk.f32.gmra.mrb[152].mxu0 %vm3328_vm3, %v3963_v52  ;;  %v3965_v31 = vmax.f32 %v3883_v58, 0.0 }
 0x3c0   : > { %v3964_v18 = vmax.f32 %v3878_v34, 0.0  ;;  %v6241_v27 = vpop.f32.mrb[92].mxu0 }
 0x3c1   : > { %v3893_v41 = vadd.f32 %v6241_v27, %v7541_v55  ;;  %v3887_v38 = vpop.f32.mrb[93].mxu0 }
 0x3c2   : > { %v3888_v4 = vadd.f32 %v7541_v55, %v3887_v38  ;;  %6340 = vmatprep.mubr.msk.f32.mxu0 %vm3328_vm3, %v3964_v18 }
 0x3c3   : > { %6341 = vmatmul.mubr.msk.f32.gmra.mrb[154].mxu0 %vm3328_vm3, %v3965_v31  ;;  %v3967_v25 = vmax.f32 %v3893_v41, 0.0 }
 0x3c4   : > { %v3966_v39 = vmax.f32 %v3888_v4, 0.0  ;;  %v6244_v48 = vpop.f32.mrb[94].mxu0 }
 0x3c5   : > { %v3903_v35 = vadd.f32 %v6244_v48, %v7541_v55  ;;  %v3897_v46 = vpop.f32.mrb[95].mxu0 }
 0x3c6   : > { %v3898_v59 = vadd.f32 %v7541_v55, %v3897_v46  ;;  %6343 = vmatprep.mubr.msk.f32.mxu0 %vm3328_vm3, %v3966_v39  ;;  %v7680_v55 = vld [vmem:[%s8087_s11] ss:$0 sm:$0xff] }
 0x3c7   : > { %6344 = vmatmul.mubr.msk.f32.gmra.mrb[156].mxu0 %vm3328_vm3, %v3967_v25  ;;  %v3969_v53 = vmax.f32 %v3903_v35, 0.0 }
 0x3c8   : > { %v3968_v17 = vmax.f32 %v3898_v59, 0.0 }
 0x3ca   : > { %6346 = vmatprep.mubr.msk.f32.mxu0 %vm3328_vm3, %v3968_v17 }
 0x3cb   : > { %6347 = vmatmul.mubr.msk.f32.gmra.mrb[158].mxu0 %vm3328_vm3, %v3969_v53 }
 0x422   : > { %v6255_v2 = vpop.f32.mrb[96].mxu0 }
 0x423   : > { %v4245_v33 = vadd.f32 %v6255_v2, %v7674_v10  ;;  %v4239_v42 = vpop.f32.mrb[97].mxu0 }
 0x424   : > { %v4240_v0 = vadd.f32 %v7674_v10, %v4239_v42 }
 0x425   : > { %v4559_v15 = vmax.f32 %v4245_v33, 0.0 }
 0x426   : > { %v4558_v62 = vmax.f32 %v4240_v0, 0.0  ;;  %v6258_v37 = vpop.f32.mrb[98].mxu0 }
 0x427   : > { %v4630_v11 = vmul.f32 %v7680_v55, %v4559_v15  ;;  %v4255_v29 = vadd.f32 %v6258_v37, %v7674_v10  ;;  %v4249_v40 = vpop.f32.mrb[99].mxu0 }
 0x428   : > { %v4629_v49 = vmul.f32 %v7680_v55, %v4558_v62  ;;  %v4250_v23 = vadd.f32 %v7674_v10, %v4249_v40 }
 0x429   : > { %v4561_v45 = vmax.f32 %v4255_v29, 0.0  ;;  %v4696_v22 = vsel %vm2604_vm14, %v4630_v11, 0.0 }
 0x42a   : > { %v4560_v63 = vmax.f32 %v4250_v23, 0.0  ;;  %4697 = vadd.xlane.f32.xlu0 %v4696_v22  ;;  %v6261_v43 = vpop.f32.mrb[100].mxu0  ;;  %v4693_v47 = vsel %vm2604_vm14, %v4629_v49, 0.0 }
 0x42b   : > { %v4632_v6 = vmul.f32 %v7680_v55, %v4561_v45  ;;  %v4265_v56 = vadd.f32 %v6261_v43, %v7674_v10  ;;  %v4259_v9 = vpop.f32.mrb[101].mxu0  ;;  %4694 = vadd.xlane.f32.xlu1 %v4693_v47 }
 0x42c   : > { %v4631_v3 = vmul.f32 %v7680_v55, %v4560_v63  ;;  %v4260_v60 = vadd.f32 %v7674_v10, %v4259_v9 }
 0x42d   : > { %v4563_v54 = vmax.f32 %v4265_v56, 0.0  ;;  %v4702_v36 = vsel %vm2604_vm14, %v4632_v6, 0.0 }
 0x42e   : > { %v4562_v5 = vmax.f32 %v4260_v60, 0.0  ;;  %v6264_v20 = vpop.f32.mrb[102].mxu0  ;;  %v4699_v21 = vsel %vm2604_vm14, %v4631_v3, 0.0 }
 0x42f   : > { %v4634_v1 = vmul.f32 %v7680_v55, %v4563_v54  ;;  %v4275_v16 = vadd.f32 %v6264_v20, %v7674_v10  ;;  %v4269_v32 = vpop.f32.mrb[103].mxu0  ;;  %4700 = vadd.xlane.f32.xlu0 %v4699_v21  ;;  %4703 = vadd.xlane.f32.xlu1 %v4702_v36 }
 0x430   : > { %v4633_v8 = vmul.f32 %v7680_v55, %v4562_v5  ;;  %v4270_v12 = vadd.f32 %v7674_v10, %v4269_v32 }
 0x431   : > { %v4565_v30 = vmax.f32 %v4275_v16, 0.0  ;;  %v4708_v14 = vsel %vm2604_vm14, %v4634_v1, 0.0 }
 0x432   : > { %v4564_v57 = vmax.f32 %v4270_v12, 0.0  ;;  %v6267_v50 = vpop.f32.mrb[104].mxu0  ;;  %v4705_v28 = vsel %vm2604_vm14, %v4633_v8, 0.0 }
 0x433   : > { %v4636_v51 = vmul.f32 %v7680_v55, %v4565_v30  ;;  %v4285_v7 = vadd.f32 %v6267_v50, %v7674_v10  ;;  %v4279_v44 = vpop.f32.mrb[105].mxu0  ;;  %4706 = vadd.xlane.f32.xlu0 %v4705_v28  ;;  %4709 = vadd.xlane.f32.xlu1 %v4708_v14 }
 0x434   : > { %v4635_v13 = vmul.f32 %v7680_v55, %v4564_v57  ;;  %v4280_v19 = vadd.f32 %v7674_v10, %v4279_v44 }
 0x435   : > { %v4567_v61 = vmax.f32 %v4285_v7, 0.0  ;;  %v4714_v26 = vsel %vm2604_vm14, %v4636_v51, 0.0 }
 0x436   : > { %v4566_v52 = vmax.f32 %v4280_v19, 0.0  ;;  %v6270_v58 = vpop.f32.mrb[106].mxu0  ;;  %v4711_v24 = vsel %vm2604_vm14, %v4635_v13, 0.0 }
 0x437   : > { %v4638_v34 = vmul.f32 %v7680_v55, %v4567_v61  ;;  %v4295_v18 = vadd.f32 %v6270_v58, %v7674_v10  ;;  %v4289_v27 = vpop.f32.mrb[107].mxu0  ;;  %4712 = vadd.xlane.f32.xlu0 %v4711_v24  ;;  %4715 = vadd.xlane.f32.xlu1 %v4714_v26 }
 0x438   : > { %v4637_v31 = vmul.f32 %v7680_v55, %v4566_v52  ;;  %v4290_v41 = vadd.f32 %v7674_v10, %v4289_v27 }
 0x439   : > { %v4569_v38 = vmax.f32 %v4295_v18, 0.0  ;;  %v4720_v4 = vsel %vm2604_vm14, %v4638_v34, 0.0 }
 0x43a   : > { %v4568_v39 = vmax.f32 %v4290_v41, 0.0  ;;  %v6273_v48 = vpop.f32.mrb[108].mxu0  ;;  %v4717_v25 = vsel %vm2604_vm14, %v4637_v31, 0.0 }
 0x43b   : > { %v4640_v35 = vmul.f32 %v7680_v55, %v4569_v38  ;;  %v4305_v46 = vadd.f32 %v6273_v48, %v7674_v10  ;;  %v4299_v59 = vpop.f32.mrb[109].mxu0  ;;  %4718 = vadd.xlane.f32.xlu0 %v4717_v25  ;;  %4721 = vadd.xlane.f32.xlu1 %v4720_v4 }
 0x43c   : > { %v4639_v17 = vmul.f32 %v7680_v55, %v4568_v39  ;;  %v4300_v53 = vadd.f32 %v7674_v10, %v4299_v59 }
 0x43d   : > { %v4571_v2 = vmax.f32 %v4305_v46, 0.0  ;;  %v4726_v33 = vsel %vm2604_vm14, %v4640_v35, 0.0 }
 0x43e   : > { %v4570_v42 = vmax.f32 %v4300_v53, 0.0  ;;  %v6276_v0 = vpop.f32.mrb[110].mxu0  ;;  %v4723_v15 = vsel %vm2604_vm14, %v4639_v17, 0.0 }
 0x43f   : > { %v4642_v62 = vmul.f32 %v7680_v55, %v4571_v2  ;;  %v4315_v37 = vadd.f32 %v6276_v0, %v7674_v10  ;;  %v4309_v11 = vpop.f32.mrb[111].mxu0  ;;  %4724 = vadd.xlane.f32.xlu0 %v4723_v15  ;;  %4727 = vadd.xlane.f32.xlu1 %v4726_v33 }
 0x440   : > { %v4641_v29 = vmul.f32 %v7680_v55, %v4570_v42  ;;  %v4310_v40 = vadd.f32 %v7674_v10, %v4309_v11 }
 0x441   : > { %v4573_v49 = vmax.f32 %v4315_v37, 0.0  ;;  %v4732_v23 = vsel %vm2604_vm14, %v4642_v62, 0.0 }
 0x442   : > { %v4572_v45 = vmax.f32 %v4310_v40, 0.0  ;;  %v6279_v22 = vpop.f32.mrb[112].mxu0  ;;  %v4729_v63 = vsel %vm2604_vm14, %v4641_v29, 0.0 }
 0x443   : > { %v4644_v43 = vmul.f32 %v7680_v55, %v4573_v49  ;;  %v4325_v47 = vadd.f32 %v6279_v22, %v7674_v10  ;;  %v4319_v6 = vpop.f32.mrb[113].mxu0  ;;  %4730 = vadd.xlane.f32.xlu0 %v4729_v63  ;;  %4733 = vadd.xlane.f32.xlu1 %v4732_v23 }
 0x444   : > { %v4643_v56 = vmul.f32 %v7680_v55, %v4572_v45  ;;  %v4320_v9 = vadd.f32 %v7674_v10, %v4319_v6 }
 0x445   : > { %v4575_v3 = vmax.f32 %v4325_v47, 0.0  ;;  %v4738_v60 = vsel %vm2604_vm14, %v4644_v43, 0.0 }
 0x446   : > { %v4574_v54 = vmax.f32 %v4320_v9, 0.0  ;;  %v6282_v36 = vpop.f32.mrb[114].mxu0  ;;  %v4735_v5 = vsel %vm2604_vm14, %v4643_v56, 0.0 }
 0x447   : > { %v4646_v20 = vmul.f32 %v7680_v55, %v4575_v3  ;;  %v4335_v21 = vadd.f32 %v6282_v36, %v7674_v10  ;;  %v4329_v1 = vpop.f32.mrb[115].mxu0  ;;  %4736 = vadd.xlane.f32.xlu0 %v4735_v5  ;;  %4739 = vadd.xlane.f32.xlu1 %v4738_v60 }
 0x448   : > { %v4645_v16 = vmul.f32 %v7680_v55, %v4574_v54  ;;  %v4330_v32 = vadd.f32 %v7674_v10, %v4329_v1 }
 0x449   : > { %v4577_v8 = vmax.f32 %v4335_v21, 0.0  ;;  %v4744_v12 = vsel %vm2604_vm14, %v4646_v20, 0.0 }
 0x44a   : > { %v4576_v30 = vmax.f32 %v4330_v32, 0.0  ;;  %v6285_v14 = vpop.f32.mrb[116].mxu0  ;;  %v4741_v57 = vsel %vm2604_vm14, %v4645_v16, 0.0 }
 0x44b   : > { %v4648_v50 = vmul.f32 %v7680_v55, %v4577_v8  ;;  %v4345_v28 = vadd.f32 %v6285_v14, %v7674_v10  ;;  %v4339_v51 = vpop.f32.mrb[117].mxu0  ;;  %4742 = vadd.xlane.f32.xlu0 %v4741_v57  ;;  %4745 = vadd.xlane.f32.xlu1 %v4744_v12 }
 0x44c   : > { %v4647_v7 = vmul.f32 %v7680_v55, %v4576_v30  ;;  %v4340_v44 = vadd.f32 %v7674_v10, %v4339_v51 }
 0x44d   : > { %v4579_v13 = vmax.f32 %v4345_v28, 0.0  ;;  %v4750_v19 = vsel %vm2604_vm14, %v4648_v50, 0.0 }
 0x44e   : > { %v4578_v61 = vmax.f32 %v4340_v44, 0.0  ;;  %v6288_v26 = vpop.f32.mrb[118].mxu0  ;;  %v4747_v52 = vsel %vm2604_vm14, %v4647_v7, 0.0 }
 0x44f   : > { %v4650_v58 = vmul.f32 %v7680_v55, %v4579_v13  ;;  %v4355_v24 = vadd.f32 %v6288_v26, %v7674_v10  ;;  %v4349_v34 = vpop.f32.mrb[119].mxu0  ;;  %4748 = vadd.xlane.f32.xlu0 %v4747_v52  ;;  %4751 = vadd.xlane.f32.xlu1 %v4750_v19 }
 0x450   : > { %v4649_v18 = vmul.f32 %v7680_v55, %v4578_v61  ;;  %v4350_v27 = vadd.f32 %v7674_v10, %v4349_v34 }
 0x451   : > { %v4581_v31 = vmax.f32 %v4355_v24, 0.0  ;;  %v4756_v41 = vsel %vm2604_vm14, %v4650_v58, 0.0 }
 0x452   : > { %v4580_v38 = vmax.f32 %v4350_v27, 0.0  ;;  %v6291_v4 = vpop.f32.mrb[120].mxu0  ;;  %v4753_v39 = vsel %vm2604_vm14, %v4649_v18, 0.0 }
 0x453   : > { %v4652_v48 = vmul.f32 %v7680_v55, %v4581_v31  ;;  %v4365_v25 = vadd.f32 %v6291_v4, %v7674_v10  ;;  %v4359_v35 = vpop.f32.mrb[121].mxu0  ;;  %4754 = vadd.xlane.f32.xlu0 %v4753_v39  ;;  %4757 = vadd.xlane.f32.xlu1 %v4756_v41 }
 0x454   : > { %v4651_v46 = vmul.f32 %v7680_v55, %v4580_v38  ;;  %v4360_v59 = vadd.f32 %v7674_v10, %v4359_v35 }
 0x455   : > { %v4583_v17 = vmax.f32 %v4365_v25, 0.0  ;;  %v4762_v53 = vsel %vm2604_vm14, %v4652_v48, 0.0 }
 0x456   : > { %v4582_v2 = vmax.f32 %v4360_v59, 0.0  ;;  %v6294_v33 = vpop.f32.mrb[122].mxu0  ;;  %v4759_v42 = vsel %vm2604_vm14, %v4651_v46, 0.0 }
 0x457   : > { %v4654_v0 = vmul.f32 %v7680_v55, %v4583_v17  ;;  %v4375_v15 = vadd.f32 %v6294_v33, %v7674_v10  ;;  %v4369_v62 = vpop.f32.mrb[123].mxu0  ;;  %4760 = vadd.xlane.f32.xlu0 %v4759_v42  ;;  %4763 = vadd.xlane.f32.xlu1 %v4762_v53 }
 0x458   : > { %v4653_v37 = vmul.f32 %v7680_v55, %v4582_v2  ;;  %v4370_v11 = vadd.f32 %v7674_v10, %v4369_v62 }
 0x459   : > { %v4585_v29 = vmax.f32 %v4375_v15, 0.0  ;;  %v4768_v40 = vsel %vm2604_vm14, %v4654_v0, 0.0 }
 0x45a   : > { %v4584_v49 = vmax.f32 %v4370_v11, 0.0  ;;  %v6297_v23 = vpop.f32.mrb[124].mxu0  ;;  %v4765_v45 = vsel %vm2604_vm14, %v4653_v37, 0.0 }
 0x45b   : > { %v4656_v22 = vmul.f32 %v7680_v55, %v4585_v29  ;;  %v4385_v63 = vadd.f32 %v6297_v23, %v7674_v10  ;;  %v4379_v43 = vpop.f32.mrb[125].mxu0  ;;  %4766 = vadd.xlane.f32.xlu0 %v4765_v45  ;;  %4769 = vadd.xlane.f32.xlu1 %v4768_v40 }
 0x45c   : > { %v4655_v47 = vmul.f32 %v7680_v55, %v4584_v49  ;;  %v4380_v6 = vadd.f32 %v7674_v10, %v4379_v43 }
 0x45d   : > { %v4587_v56 = vmax.f32 %v4385_v63, 0.0  ;;  %v4774_v9 = vsel %vm2604_vm14, %v4656_v22, 0.0 }
 0x45e   : > { %v4586_v3 = vmax.f32 %v4380_v6, 0.0  ;;  %v6300_v60 = vpop.f32.mrb[126].mxu0  ;;  %v4771_v54 = vsel %vm2604_vm14, %v4655_v47, 0.0 }
 0x45f   : > { %v4658_v36 = vmul.f32 %v7680_v55, %v4587_v56  ;;  %v4395_v5 = vadd.f32 %v6300_v60, %v7674_v10  ;;  %v4389_v20 = vpop.f32.mrb[127].mxu0  ;;  %4772 = vadd.xlane.f32.xlu0 %v4771_v54  ;;  %4775 = vadd.xlane.f32.xlu1 %v4774_v9 }
 0x460   : > { %v4657_v21 = vmul.f32 %v7680_v55, %v4586_v3  ;;  %v4390_v1 = vadd.f32 %v7674_v10, %v4389_v20 }
 0x461   : > { %v4589_v16 = vmax.f32 %v4395_v5, 0.0  ;;  %v4780_v32 = vsel %vm2604_vm14, %v4658_v36, 0.0 }
 0x462   : > { %v4588_v8 = vmax.f32 %v4390_v1, 0.0  ;;  %v6303_v12 = vpop.f32.mrb[128].mxu0  ;;  %v4777_v30 = vsel %vm2604_vm14, %v4657_v21, 0.0 }
 0x463   : > { %v4660_v14 = vmul.f32 %v7680_v55, %v4589_v16  ;;  %v4405_v57 = vadd.f32 %v6303_v12, %v7674_v10  ;;  %v4399_v50 = vpop.f32.mrb[129].mxu0  ;;  %4778 = vadd.xlane.f32.xlu0 %v4777_v30  ;;  %4781 = vadd.xlane.f32.xlu1 %v4780_v32 }
 0x464   : > { %v4659_v28 = vmul.f32 %v7680_v55, %v4588_v8  ;;  %v4400_v51 = vadd.f32 %v7674_v10, %v4399_v50 }
 0x465   : > { %v4591_v7 = vmax.f32 %v4405_v57, 0.0  ;;  %v4786_v44 = vsel %vm2604_vm14, %v4660_v14, 0.0 }
 0x466   : > { %v4590_v13 = vmax.f32 %v4400_v51, 0.0  ;;  %v6306_v19 = vpop.f32.mrb[130].mxu0  ;;  %v4783_v61 = vsel %vm2604_vm14, %v4659_v28, 0.0 }
 0x467   : > { %v4662_v26 = vmul.f32 %v7680_v55, %v4591_v7  ;;  %v4415_v52 = vadd.f32 %v6306_v19, %v7674_v10  ;;  %v4409_v58 = vpop.f32.mrb[131].mxu0  ;;  %4784 = vadd.xlane.f32.xlu0 %v4783_v61  ;;  %4787 = vadd.xlane.f32.xlu1 %v4786_v44 }
 0x468   : > { %v4661_v24 = vmul.f32 %v7680_v55, %v4590_v13  ;;  %v4410_v34 = vadd.f32 %v7674_v10, %v4409_v58 }
 0x469   : > { %v4593_v18 = vmax.f32 %v4415_v52, 0.0  ;;  %v4792_v27 = vsel %vm2604_vm14, %v4662_v26, 0.0 }
 0x46a   : > { %v4592_v31 = vmax.f32 %v4410_v34, 0.0  ;;  %v6309_v41 = vpop.f32.mrb[132].mxu0  ;;  %v4789_v38 = vsel %vm2604_vm14, %v4661_v24, 0.0 }
 0x46b   : > { %v4664_v4 = vmul.f32 %v7680_v55, %v4593_v18  ;;  %v4425_v39 = vadd.f32 %v6309_v41, %v7674_v10  ;;  %v4419_v48 = vpop.f32.mrb[133].mxu0  ;;  %4790 = vadd.xlane.f32.xlu0 %v4789_v38  ;;  %4793 = vadd.xlane.f32.xlu1 %v4792_v27 }
 0x46c   : > { %v4663_v25 = vmul.f32 %v7680_v55, %v4592_v31  ;;  %v4420_v35 = vadd.f32 %v7674_v10, %v4419_v48 }
 0x46d   : > { %v4595_v46 = vmax.f32 %v4425_v39, 0.0  ;;  %v4798_v59 = vsel %vm2604_vm14, %v4664_v4, 0.0 }
 0x46e   : > { %v4594_v17 = vmax.f32 %v4420_v35, 0.0  ;;  %v6312_v53 = vpop.f32.mrb[134].mxu0  ;;  %v4795_v2 = vsel %vm2604_vm14, %v4663_v25, 0.0 }
 0x46f   : > { %v4666_v33 = vmul.f32 %v7680_v55, %v4595_v46  ;;  %v4435_v42 = vadd.f32 %v6312_v53, %v7674_v10  ;;  %v4429_v0 = vpop.f32.mrb[135].mxu0  ;;  %4796 = vadd.xlane.f32.xlu0 %v4795_v2  ;;  %4799 = vadd.xlane.f32.xlu1 %v4798_v59 }
 0x470   : > { %v4665_v15 = vmul.f32 %v7680_v55, %v4594_v17  ;;  %v4430_v62 = vadd.f32 %v7674_v10, %v4429_v0 }
 0x471   : > { %v4597_v37 = vmax.f32 %v4435_v42, 0.0  ;;  %v4804_v11 = vsel %vm2604_vm14, %v4666_v33, 0.0 }
 0x472   : > { %v4596_v29 = vmax.f32 %v4430_v62, 0.0  ;;  %v6315_v40 = vpop.f32.mrb[136].mxu0  ;;  %v4801_v49 = vsel %vm2604_vm14, %v4665_v15, 0.0 }
 0x473   : > { %v4668_v23 = vmul.f32 %v7680_v55, %v4597_v37  ;;  %v4445_v45 = vadd.f32 %v6315_v40, %v7674_v10  ;;  %v4439_v22 = vpop.f32.mrb[137].mxu0  ;;  %4802 = vadd.xlane.f32.xlu0 %v4801_v49  ;;  %4805 = vadd.xlane.f32.xlu1 %v4804_v11 }
 0x474   : > { %v4667_v63 = vmul.f32 %v7680_v55, %v4596_v29  ;;  %v4440_v43 = vadd.f32 %v7674_v10, %v4439_v22 }
 0x475   : > { %v4599_v47 = vmax.f32 %v4445_v45, 0.0  ;;  %v4810_v6 = vsel %vm2604_vm14, %v4668_v23, 0.0 }
 0x476   : > { %v4598_v56 = vmax.f32 %v4440_v43, 0.0  ;;  %v6318_v9 = vpop.f32.mrb[138].mxu0  ;;  %v4807_v3 = vsel %vm2604_vm14, %v4667_v63, 0.0 }
 0x477   : > { %v4670_v60 = vmul.f32 %v7680_v55, %v4599_v47  ;;  %v4455_v54 = vadd.f32 %v6318_v9, %v7674_v10  ;;  %v4449_v36 = vpop.f32.mrb[139].mxu0  ;;  %4808 = vadd.xlane.f32.xlu0 %v4807_v3  ;;  %4811 = vadd.xlane.f32.xlu1 %v4810_v6 }
 0x478   : > { %v4669_v5 = vmul.f32 %v7680_v55, %v4598_v56  ;;  %v4450_v20 = vadd.f32 %v7674_v10, %v4449_v36 }
 0x479   : > { %v4601_v21 = vmax.f32 %v4455_v54, 0.0  ;;  %v4816_v1 = vsel %vm2604_vm14, %v4670_v60, 0.0 }
 0x47a   : > { %v4600_v16 = vmax.f32 %v4450_v20, 0.0  ;;  %v6321_v32 = vpop.f32.mrb[140].mxu0  ;;  %v4813_v8 = vsel %vm2604_vm14, %v4669_v5, 0.0 }
 0x47b   : > { %v4672_v12 = vmul.f32 %v7680_v55, %v4601_v21  ;;  %v4465_v30 = vadd.f32 %v6321_v32, %v7674_v10  ;;  %v4459_v14 = vpop.f32.mrb[141].mxu0  ;;  %4814 = vadd.xlane.f32.xlu0 %v4813_v8  ;;  %4817 = vadd.xlane.f32.xlu1 %v4816_v1 }
 0x47c   : > { %v4671_v57 = vmul.f32 %v7680_v55, %v4600_v16  ;;  %v4460_v50 = vadd.f32 %v7674_v10, %v4459_v14 }
 0x47d   : > { %v4603_v28 = vmax.f32 %v4465_v30, 0.0  ;;  %v4822_v51 = vsel %vm2604_vm14, %v4672_v12, 0.0 }
 0x47e   : > { %v4602_v7 = vmax.f32 %v4460_v50, 0.0  ;;  %v6324_v44 = vpop.f32.mrb[142].mxu0  ;;  %v4819_v13 = vsel %vm2604_vm14, %v4671_v57, 0.0 }
 0x47f   : > { %v4674_v19 = vmul.f32 %v7680_v55, %v4603_v28  ;;  %v4475_v61 = vadd.f32 %v6324_v44, %v7674_v10  ;;  %v4469_v26 = vpop.f32.mrb[143].mxu0  ;;  %4820 = vadd.xlane.f32.xlu0 %v4819_v13  ;;  %4823 = vadd.xlane.f32.xlu1 %v4822_v51 }
 0x480   : > { %v4673_v52 = vmul.f32 %v7680_v55, %v4602_v7  ;;  %v4470_v58 = vadd.f32 %v7674_v10, %v4469_v26 }
 0x481   : > { %v4605_v24 = vmax.f32 %v4475_v61, 0.0  ;;  %v4828_v34 = vsel %vm2604_vm14, %v4674_v19, 0.0 }
 0x482   : > { %v4604_v18 = vmax.f32 %v4470_v58, 0.0  ;;  %v6327_v27 = vpop.f32.mrb[144].mxu0  ;;  %v4825_v31 = vsel %vm2604_vm14, %v4673_v52, 0.0 }
 0x483   : > { %v4676_v41 = vmul.f32 %v7680_v55, %v4605_v24  ;;  %v4485_v38 = vadd.f32 %v6327_v27, %v7674_v10  ;;  %v4479_v4 = vpop.f32.mrb[145].mxu0  ;;  %4826 = vadd.xlane.f32.xlu0 %v4825_v31  ;;  %4829 = vadd.xlane.f32.xlu1 %v4828_v34 }
 0x484   : > { %v4675_v39 = vmul.f32 %v7680_v55, %v4604_v18  ;;  %v4480_v48 = vadd.f32 %v7674_v10, %v4479_v4 }
 0x485   : > { %v4607_v25 = vmax.f32 %v4485_v38, 0.0  ;;  %v4834_v35 = vsel %vm2604_vm14, %v4676_v41, 0.0 }
 0x486   : > { %v4606_v46 = vmax.f32 %v4480_v48, 0.0  ;;  %v6330_v59 = vpop.f32.mrb[146].mxu0  ;;  %v4831_v17 = vsel %vm2604_vm14, %v4675_v39, 0.0 }
 0x487   : > { %v4678_v53 = vmul.f32 %v7680_v55, %v4607_v25  ;;  %v4495_v2 = vadd.f32 %v6330_v59, %v7674_v10  ;;  %v4489_v33 = vpop.f32.mrb[147].mxu0  ;;  %4832 = vadd.xlane.f32.xlu0 %v4831_v17  ;;  %4835 = vadd.xlane.f32.xlu1 %v4834_v35 }
 0x488   : > { %v4677_v42 = vmul.f32 %v7680_v55, %v4606_v46  ;;  %v4490_v0 = vadd.f32 %v7674_v10, %v4489_v33 }
 0x489   : > { %v4609_v15 = vmax.f32 %v4495_v2, 0.0  ;;  %v4840_v62 = vsel %vm2604_vm14, %v4678_v53, 0.0 }
 0x48a   : > { %v4608_v37 = vmax.f32 %v4490_v0, 0.0  ;;  %v6333_v11 = vpop.f32.mrb[148].mxu0  ;;  %v4837_v29 = vsel %vm2604_vm14, %v4677_v42, 0.0 }
 0x48b   : > { %v4680_v40 = vmul.f32 %v7680_v55, %v4609_v15  ;;  %v4505_v49 = vadd.f32 %v6333_v11, %v7674_v10  ;;  %v4499_v23 = vpop.f32.mrb[149].mxu0  ;;  %4838 = vadd.xlane.f32.xlu0 %v4837_v29  ;;  %4841 = vadd.xlane.f32.xlu1 %v4840_v62 }
 0x48c   : > { %v4679_v45 = vmul.f32 %v7680_v55, %v4608_v37  ;;  %v4500_v22 = vadd.f32 %v7674_v10, %v4499_v23 }
 0x48d   : > { %v4611_v63 = vmax.f32 %v4505_v49, 0.0  ;;  %v4846_v43 = vsel %vm2604_vm14, %v4680_v40, 0.0  ;;  %v7873_v49 = vld [vmem:[#allocation2] ss:$0 sm:$0xff] }
 0x48e   : > { %v4610_v47 = vmax.f32 %v4500_v22, 0.0  ;;  %v6336_v6 = vpop.f32.mrb[150].mxu0  ;;  %v4843_v56 = vsel %vm2604_vm14, %v4679_v45, 0.0 }
 0x48f   : > { %v4682_v9 = vmul.f32 %v7680_v55, %v4611_v63  ;;  %v4515_v3 = vadd.f32 %v6336_v6, %v7674_v10  ;;  %v4509_v60 = vpop.f32.mrb[151].mxu0  ;;  %4844 = vadd.xlane.f32.xlu0 %v4843_v56  ;;  %4847 = vadd.xlane.f32.xlu1 %v4846_v43 }
 0x490   : > { %v4681_v54 = vmul.f32 %v7680_v55, %v4610_v47  ;;  %v4510_v36 = vadd.f32 %v7674_v10, %v4509_v60 }
 0x491   : > { %v4613_v5 = vmax.f32 %v4515_v3, 0.0  ;;  %v4852_v20 = vsel %vm2604_vm14, %v4682_v9, 0.0 }
 0x492   : > { %v4612_v21 = vmax.f32 %v4510_v36, 0.0  ;;  %v6339_v1 = vpop.f32.mrb[152].mxu0  ;;  %v4849_v16 = vsel %vm2604_vm14, %v4681_v54, 0.0 }
 0x493   : > { %v4684_v32 = vmul.f32 %v7680_v55, %v4613_v5  ;;  %v4525_v8 = vadd.f32 %v6339_v1, %v7674_v10  ;;  %v4519_v12 = vpop.f32.mrb[153].mxu0  ;;  %4850 = vadd.xlane.f32.xlu0 %v4849_v16  ;;  %4853 = vadd.xlane.f32.xlu1 %v4852_v20 }
 0x494   : > { %v4683_v30 = vmul.f32 %v7680_v55, %v4612_v21  ;;  %v4520_v14 = vadd.f32 %v7674_v10, %v4519_v12 }
 0x495   : > { %v4615_v57 = vmax.f32 %v4525_v8, 0.0  ;;  %v4858_v50 = vsel %vm2604_vm14, %v4684_v32, 0.0 }
 0x496   : > { %v4614_v28 = vmax.f32 %v4520_v14, 0.0  ;;  %v6342_v51 = vpop.f32.mrb[154].mxu0  ;;  %v4855_v7 = vsel %vm2604_vm14, %v4683_v30, 0.0 }
 0x497   : > { %v4686_v44 = vmul.f32 %v7680_v55, %v4615_v57  ;;  %v4535_v13 = vadd.f32 %v6342_v51, %v7674_v10  ;;  %v4529_v19 = vpop.f32.mrb[155].mxu0  ;;  %4856 = vadd.xlane.f32.xlu0 %v4855_v7  ;;  %4859 = vadd.xlane.f32.xlu1 %v4858_v50 }
 0x498   : > { %v4685_v61 = vmul.f32 %v7680_v55, %v4614_v28  ;;  %v4530_v26 = vadd.f32 %v7674_v10, %v4529_v19 }
 0x499   : > { %v4617_v52 = vmax.f32 %v4535_v13, 0.0  ;;  %v4864_v58 = vsel %vm2604_vm14, %v4686_v44, 0.0 }
 0x49a   : > { %v4616_v24 = vmax.f32 %v4530_v26, 0.0  ;;  %v6345_v34 = vpop.f32.mrb[156].mxu0  ;;  %v4861_v18 = vsel %vm2604_vm14, %v4685_v61, 0.0 }
 0x49b   : > { %v4688_v27 = vmul.f32 %v7680_v55, %v4617_v52  ;;  %v4545_v31 = vadd.f32 %v6345_v34, %v7674_v10  ;;  %v4539_v41 = vpop.f32.mrb[157].mxu0  ;;  %4862 = vadd.xlane.f32.xlu0 %v4861_v18  ;;  %4865 = vadd.xlane.f32.xlu1 %v4864_v58 }
 0x49c   : > { %v4687_v38 = vmul.f32 %v7680_v55, %v4616_v24  ;;  %v4540_v4 = vadd.f32 %v7674_v10, %v4539_v41 }
 0x49d   : > { %v4619_v39 = vmax.f32 %v4545_v31, 0.0  ;;  %v4870_v48 = vsel %vm2604_vm14, %v4688_v27, 0.0 }
 0x49e   : > { %v4618_v25 = vmax.f32 %v4540_v4, 0.0  ;;  %v6348_v35 = vpop.f32.mrb[158].mxu0  ;;  %v4867_v46 = vsel %vm2604_vm14, %v4687_v38, 0.0 }
 0x49f   : > { %v4690_v59 = vmul.f32 %v7680_v55, %v4619_v39  ;;  %v4555_v17 = vadd.f32 %v6348_v35, %v7674_v10  ;;  %4868 = vadd.xlane.f32.xlu0 %v4867_v46  ;;  %4871 = vadd.xlane.f32.xlu1 %v4870_v48  ;;  %v4549_v53 = vpop.f32.mrb[159].mxu0 }
 0x4a0   : > { %v4689_v2 = vmul.f32 %v7680_v55, %v4618_v25  ;;  %v4550_v33 = vadd.f32 %v7674_v10, %v4549_v53 }
 0x4a1   : > { %v4621_v42 = vmax.f32 %v4555_v17, 0.0  ;;  %v4876_v0 = vsel %vm2604_vm14, %v4690_v59, 0.0 }
 0x4a2   : > { %v4620_v15 = vmax.f32 %v4550_v33, 0.0  ;;  %v4873_v62 = vsel %vm2604_vm14, %v4689_v2, 0.0 }
 0x4a3   : > { %v4692_v37 = vmul.f32 %v7680_v55, %v4621_v42  ;;  %4874 = vadd.xlane.f32.xlu0 %v4873_v62  ;;  %4877 = vadd.xlane.f32.xlu1 %v4876_v0 }
 0x4a4   : > { %v4691_v11 = vmul.f32 %v7680_v55, %v4620_v15 }
 0x4a5   : > { %v4882_v29 = vsel %vm2604_vm14, %v4692_v37, 0.0 }
 0x4a6   : > { %v4879_v40 = vsel %vm2604_vm14, %v4691_v11, 0.0 }
 0x4a7   : > { %4883 = vadd.xlane.f32.xlu1 %v4882_v29  ;;  %4880 = vadd.xlane.f32.xlu0 %v4879_v40 }
 0x4b7   : > { %v4698_v10 = vpop.xlane.xlu0 %4697 }
 0x4b8   : > { %v4893_v55 = vadd.f32 %v7873_v49, %v4698_v10  ;;  %v4695_v23 = vpop.xlane.xlu1 %4694 }
 0x4b9   : > { %v4892_v45 = vadd.f32 %v7873_v49, %v4695_v23 }
 0x4ba   : > { %4958 = vst.msk [vmem:[%s7879_s22 + $0x8] sm:$0xff] %vm4956_vm15, %v4893_v55 }
 0x4bb   : > { %4957 = vst.msk [vmem:[%s7879_s22] sm:$0xff] %vm4956_vm15, %v4892_v45 }
 0x4bc   : > { %v4701_v22 = vpop.xlane.xlu0 %4700  ;;  %v4704_v63 = vpop.xlane.xlu1 %4703 }
 0x4bd   : > { %v4894_v43 = vadd.f32 %v7873_v49, %v4701_v22  ;;  %v4895_v47 = vadd.f32 %v7873_v49, %v4704_v63 }
 0x4bf   : > { %4959 = vst.msk [vmem:[%s7879_s22 + $0x10] sm:$0xff] %vm4956_vm15, %v4894_v43  ;;  %4960 = vst.msk [vmem:[%s7879_s22 + $0x18] sm:$0xff] %vm4956_vm15, %v4895_v47 }
 0x4c0   : > { %v4707_v6 = vpop.xlane.xlu0 %4706  ;;  %v4710_v56 = vpop.xlane.xlu1 %4709 }
 0x4c1   : > { %v4896_v9 = vadd.f32 %v7873_v49, %v4707_v6  ;;  %v4897_v3 = vadd.f32 %v7873_v49, %v4710_v56 }
 0x4c3   : > { %4961 = vst.msk [vmem:[%s7879_s22 + $0x20] sm:$0xff] %vm4956_vm15, %v4896_v9  ;;  %4962 = vst.msk [vmem:[%s7879_s22 + $0x28] sm:$0xff] %vm4956_vm15, %v4897_v3 }
 0x4c4   : > { %v4713_v60 = vpop.xlane.xlu0 %4712  ;;  %v4716_v54 = vpop.xlane.xlu1 %4715 }
 0x4c5   : > { %v4898_v36 = vadd.f32 %v7873_v49, %v4713_v60  ;;  %v4899_v5 = vadd.f32 %v7873_v49, %v4716_v54 }
 0x4c7   : > { %4963 = vst.msk [vmem:[%s7879_s22 + $0x30] sm:$0xff] %vm4956_vm15, %v4898_v36  ;;  %4964 = vst.msk [vmem:[%s7879_s22 + $0x38] sm:$0xff] %vm4956_vm15, %v4899_v5 }
 0x4c8   : > { %v4719_v20 = vpop.xlane.xlu0 %4718  ;;  %v4722_v21 = vpop.xlane.xlu1 %4721 }
 0x4c9   : > { %v4900_v1 = vadd.f32 %v7873_v49, %v4719_v20  ;;  %v4901_v16 = vadd.f32 %v7873_v49, %v4722_v21 }
 0x4cb   : > { %4965 = vst.msk [vmem:[%s7879_s22 + $0x40] sm:$0xff] %vm4956_vm15, %v4900_v1  ;;  %4966 = vst.msk [vmem:[%s7879_s22 + $0x48] sm:$0xff] %vm4956_vm15, %v4901_v16 }
 0x4cc   : > { %v4725_v32 = vpop.xlane.xlu0 %4724  ;;  %v4728_v8 = vpop.xlane.xlu1 %4727 }
 0x4cd   : > { %v4902_v12 = vadd.f32 %v7873_v49, %v4725_v32  ;;  %v4903_v30 = vadd.f32 %v7873_v49, %v4728_v8 }
 0x4cf   : > { %4967 = vst.msk [vmem:[%s7879_s22 + $0x50] sm:$0xff] %vm4956_vm15, %v4902_v12  ;;  %4968 = vst.msk [vmem:[%s7879_s22 + $0x58] sm:$0xff] %vm4956_vm15, %v4903_v30 }
 0x4d0   : > { %v4731_v14 = vpop.xlane.xlu0 %4730  ;;  %v4734_v57 = vpop.xlane.xlu1 %4733 }
 0x4d1   : > { %v4904_v50 = vadd.f32 %v7873_v49, %v4731_v14  ;;  %v4905_v28 = vadd.f32 %v7873_v49, %v4734_v57 }
 0x4d3   : > { %4969 = vst.msk [vmem:[%s7879_s22 + $0x60] sm:$0xff] %vm4956_vm15, %v4904_v50  ;;  %4970 = vst.msk [vmem:[%s7879_s22 + $0x68] sm:$0xff] %vm4956_vm15, %v4905_v28 }
 0x4d4   : > { %v4737_v51 = vpop.xlane.xlu0 %4736  ;;  %v4740_v7 = vpop.xlane.xlu1 %4739 }
 0x4d5   : > { %v4906_v44 = vadd.f32 %v7873_v49, %v4737_v51  ;;  %v4907_v13 = vadd.f32 %v7873_v49, %v4740_v7 }
 0x4d7   : > { %4971 = vst.msk [vmem:[%s7879_s22 + $0x70] sm:$0xff] %vm4956_vm15, %v4906_v44  ;;  %4972 = vst.msk [vmem:[%s7879_s22 + $0x78] sm:$0xff] %vm4956_vm15, %v4907_v13 }
 0x4d8   : > { %v4743_v19 = vpop.xlane.xlu0 %4742  ;;  %v4746_v61 = vpop.xlane.xlu1 %4745 }
 0x4d9   : > { %v4908_v26 = vadd.f32 %v7873_v49, %v4743_v19  ;;  %v4909_v52 = vadd.f32 %v7873_v49, %v4746_v61 }
 0x4db   : > { %4973 = vst.msk [vmem:[%s7879_s22 + $0x80] sm:$0xff] %vm4956_vm15, %v4908_v26  ;;  %4974 = vst.msk [vmem:[%s7879_s22 + $0x88] sm:$0xff] %vm4956_vm15, %v4909_v52 }
 0x4dc   : > { %v4749_v58 = vpop.xlane.xlu0 %4748  ;;  %v4752_v24 = vpop.xlane.xlu1 %4751 }
 0x4dd   : > { %v4910_v34 = vadd.f32 %v7873_v49, %v4749_v58  ;;  %v4911_v18 = vadd.f32 %v7873_v49, %v4752_v24 }
 0x4df   : > { %4975 = vst.msk [vmem:[%s7879_s22 + $0x90] sm:$0xff] %vm4956_vm15, %v4910_v34  ;;  %4976 = vst.msk [vmem:[%s7879_s22 + $0x98] sm:$0xff] %vm4956_vm15, %v4911_v18 }
 0x4e0   : > { %v4755_v27 = vpop.xlane.xlu0 %4754  ;;  %v4758_v31 = vpop.xlane.xlu1 %4757 }
 0x4e1   : > { %v4912_v41 = vadd.f32 %v7873_v49, %v4755_v27  ;;  %v4913_v38 = vadd.f32 %v7873_v49, %v4758_v31 }
 0x4e3   : > { %4977 = vst.msk [vmem:[%s7879_s22 + $0xa0] sm:$0xff] %vm4956_vm15, %v4912_v41  ;;  %4978 = vst.msk [vmem:[%s7879_s22 + $0xa8] sm:$0xff] %vm4956_vm15, %v4913_v38 }
 0x4e4   : > { %v4761_v4 = vpop.xlane.xlu0 %4760  ;;  %v4764_v39 = vpop.xlane.xlu1 %4763 }
 0x4e5   : > { %v4914_v48 = vadd.f32 %v7873_v49, %v4761_v4  ;;  %v4915_v25 = vadd.f32 %v7873_v49, %v4764_v39 }
 0x4e7   : > { %4979 = vst.msk [vmem:[%s7879_s22 + $0xb0] sm:$0xff] %vm4956_vm15, %v4914_v48  ;;  %4980 = vst.msk [vmem:[%s7879_s22 + $0xb8] sm:$0xff] %vm4956_vm15, %v4915_v25 }
 0x4e8   : > { %v4767_v35 = vpop.xlane.xlu0 %4766  ;;  %v4770_v46 = vpop.xlane.xlu1 %4769 }
 0x4e9   : > { %v4916_v59 = vadd.f32 %v7873_v49, %v4767_v35  ;;  %v4917_v17 = vadd.f32 %v7873_v49, %v4770_v46 }
 0x4eb   : > { %4981 = vst.msk [vmem:[%s7879_s22 + $0xc0] sm:$0xff] %vm4956_vm15, %v4916_v59  ;;  %4982 = vst.msk [vmem:[%s7879_s22 + $0xc8] sm:$0xff] %vm4956_vm15, %v4917_v17 }
 0x4ec   : > { %v4773_v53 = vpop.xlane.xlu0 %4772  ;;  %v4776_v2 = vpop.xlane.xlu1 %4775 }
 0x4ed   : > { %v4918_v33 = vadd.f32 %v7873_v49, %v4773_v53  ;;  %v4919_v42 = vadd.f32 %v7873_v49, %v4776_v2 }
 0x4ef   : > { %4983 = vst.msk [vmem:[%s7879_s22 + $0xd0] sm:$0xff] %vm4956_vm15, %v4918_v33  ;;  %4984 = vst.msk [vmem:[%s7879_s22 + $0xd8] sm:$0xff] %vm4956_vm15, %v4919_v42 }
 0x4f0   : > { %v4779_v0 = vpop.xlane.xlu0 %4778  ;;  %v4782_v15 = vpop.xlane.xlu1 %4781 }
 0x4f1   : > { %v4920_v62 = vadd.f32 %v7873_v49, %v4779_v0  ;;  %v4921_v37 = vadd.f32 %v7873_v49, %v4782_v15 }
 0x4f3   : > { %4985 = vst.msk [vmem:[%s7879_s22 + $0xe0] sm:$0xff] %vm4956_vm15, %v4920_v62  ;;  %4986 = vst.msk [vmem:[%s7879_s22 + $0xe8] sm:$0xff] %vm4956_vm15, %v4921_v37 }
 0x4f4   : > { %v4785_v11 = vpop.xlane.xlu0 %4784  ;;  %v4788_v29 = vpop.xlane.xlu1 %4787 }
 0x4f5   : > { %v4922_v40 = vadd.f32 %v7873_v49, %v4785_v11  ;;  %v4923_v10 = vadd.f32 %v7873_v49, %v4788_v29 }
 0x4f7   : > { %4987 = vst.msk [vmem:[%s7879_s22 + $0xf0] sm:$0xff] %vm4956_vm15, %v4922_v40  ;;  %4988 = vst.msk [vmem:[%s7879_s22 + $0xf8] sm:$0xff] %vm4956_vm15, %v4923_v10 }
 0x4f8   : > { %v4791_v55 = vpop.xlane.xlu0 %4790  ;;  %v4794_v23 = vpop.xlane.xlu1 %4793 }
 0x4f9   : > { %v4924_v45 = vadd.f32 %v7873_v49, %v4791_v55  ;;  %v4925_v22 = vadd.f32 %v7873_v49, %v4794_v23 }
 0x4fb   : > { %4989 = vst.msk [vmem:[%s7879_s22 + $0x100] sm:$0xff] %vm4956_vm15, %v4924_v45  ;;  %4990 = vst.msk [vmem:[%s7879_s22 + $0x108] sm:$0xff] %vm4956_vm15, %v4925_v22 }
 0x4fc   : > { %v4797_v63 = vpop.xlane.xlu0 %4796  ;;  %v4800_v43 = vpop.xlane.xlu1 %4799 }
 0x4fd   : > { %v4926_v47 = vadd.f32 %v7873_v49, %v4797_v63  ;;  %v4927_v6 = vadd.f32 %v7873_v49, %v4800_v43 }
 0x4ff   : > { %4991 = vst.msk [vmem:[%s7879_s22 + $0x110] sm:$0xff] %vm4956_vm15, %v4926_v47  ;;  %4992 = vst.msk [vmem:[%s7879_s22 + $0x118] sm:$0xff] %vm4956_vm15, %v4927_v6 }
 0x500   : > { %v4803_v56 = vpop.xlane.xlu0 %4802  ;;  %v4806_v9 = vpop.xlane.xlu1 %4805 }
 0x501   : > { %v4928_v3 = vadd.f32 %v7873_v49, %v4803_v56  ;;  %v4929_v60 = vadd.f32 %v7873_v49, %v4806_v9 }
 0x503   : > { %4993 = vst.msk [vmem:[%s7879_s22 + $0x120] sm:$0xff] %vm4956_vm15, %v4928_v3  ;;  %4994 = vst.msk [vmem:[%s7879_s22 + $0x128] sm:$0xff] %vm4956_vm15, %v4929_v60 }
 0x504   : > { %v4809_v54 = vpop.xlane.xlu0 %4808  ;;  %v4812_v36 = vpop.xlane.xlu1 %4811 }
 0x505   : > { %v4930_v5 = vadd.f32 %v7873_v49, %v4809_v54  ;;  %v4931_v20 = vadd.f32 %v7873_v49, %v4812_v36 }
 0x507   : > { %4995 = vst.msk [vmem:[%s7879_s22 + $0x130] sm:$0xff] %vm4956_vm15, %v4930_v5  ;;  %4996 = vst.msk [vmem:[%s7879_s22 + $0x138] sm:$0xff] %vm4956_vm15, %v4931_v20 }
 0x508   : > { %v4815_v21 = vpop.xlane.xlu0 %4814  ;;  %v4818_v1 = vpop.xlane.xlu1 %4817 }
 0x509   : > { %v4932_v16 = vadd.f32 %v7873_v49, %v4815_v21  ;;  %v4933_v32 = vadd.f32 %v7873_v49, %v4818_v1 }
 0x50b   : > { %4997 = vst.msk [vmem:[%s7879_s22 + $0x140] sm:$0xff] %vm4956_vm15, %v4932_v16  ;;  %4998 = vst.msk [vmem:[%s7879_s22 + $0x148] sm:$0xff] %vm4956_vm15, %v4933_v32 }
 0x50c   : > { %v4821_v8 = vpop.xlane.xlu0 %4820  ;;  %v4824_v12 = vpop.xlane.xlu1 %4823 }
 0x50d   : > { %v4934_v30 = vadd.f32 %v7873_v49, %v4821_v8  ;;  %v4935_v14 = vadd.f32 %v7873_v49, %v4824_v12 }
 0x50f   : > { %4999 = vst.msk [vmem:[%s7879_s22 + $0x150] sm:$0xff] %vm4956_vm15, %v4934_v30  ;;  %5000 = vst.msk [vmem:[%s7879_s22 + $0x158] sm:$0xff] %vm4956_vm15, %v4935_v14 }
 0x510   : > { %v4827_v57 = vpop.xlane.xlu0 %4826  ;;  %v4830_v50 = vpop.xlane.xlu1 %4829 }
 0x511   : > { %v4936_v28 = vadd.f32 %v7873_v49, %v4827_v57  ;;  %v4937_v51 = vadd.f32 %v7873_v49, %v4830_v50 }
 0x513   : > { %5001 = vst.msk [vmem:[%s7879_s22 + $0x160] sm:$0xff] %vm4956_vm15, %v4936_v28  ;;  %5002 = vst.msk [vmem:[%s7879_s22 + $0x168] sm:$0xff] %vm4956_vm15, %v4937_v51 }
 0x514   : > { %v4833_v7 = vpop.xlane.xlu0 %4832  ;;  %v4836_v44 = vpop.xlane.xlu1 %4835 }
 0x515   : > { %v4938_v13 = vadd.f32 %v7873_v49, %v4833_v7  ;;  %v4939_v19 = vadd.f32 %v7873_v49, %v4836_v44 }
 0x517   : > { %5003 = vst.msk [vmem:[%s7879_s22 + $0x170] sm:$0xff] %vm4956_vm15, %v4938_v13  ;;  %5004 = vst.msk [vmem:[%s7879_s22 + $0x178] sm:$0xff] %vm4956_vm15, %v4939_v19 }
 0x518   : > { %v4839_v61 = vpop.xlane.xlu0 %4838  ;;  %v4842_v26 = vpop.xlane.xlu1 %4841 }
 0x519   : > { %v4940_v52 = vadd.f32 %v7873_v49, %v4839_v61  ;;  %v4941_v58 = vadd.f32 %v7873_v49, %v4842_v26 }
 0x51b   : > { %5005 = vst.msk [vmem:[%s7879_s22 + $0x180] sm:$0xff] %vm4956_vm15, %v4940_v52  ;;  %5006 = vst.msk [vmem:[%s7879_s22 + $0x188] sm:$0xff] %vm4956_vm15, %v4941_v58 }
 0x51c   : > { %v4845_v24 = vpop.xlane.xlu0 %4844  ;;  %v4848_v34 = vpop.xlane.xlu1 %4847 }
 0x51d   : > { %v4942_v18 = vadd.f32 %v7873_v49, %v4845_v24  ;;  %v4943_v27 = vadd.f32 %v7873_v49, %v4848_v34 }
 0x51f   : > { %5007 = vst.msk [vmem:[%s7879_s22 + $0x190] sm:$0xff] %vm4956_vm15, %v4942_v18  ;;  %5008 = vst.msk [vmem:[%s7879_s22 + $0x198] sm:$0xff] %vm4956_vm15, %v4943_v27 }
 0x520   : > { %v4851_v31 = vpop.xlane.xlu0 %4850  ;;  %v4854_v41 = vpop.xlane.xlu1 %4853 }
 0x521   : > { %v4944_v38 = vadd.f32 %v7873_v49, %v4851_v31  ;;  %v4945_v4 = vadd.f32 %v7873_v49, %v4854_v41 }
 0x523   : > { %5009 = vst.msk [vmem:[%s7879_s22 + $0x1a0] sm:$0xff] %vm4956_vm15, %v4944_v38  ;;  %5010 = vst.msk [vmem:[%s7879_s22 + $0x1a8] sm:$0xff] %vm4956_vm15, %v4945_v4 }
 0x524   : > { %v4857_v39 = vpop.xlane.xlu0 %4856  ;;  %v4860_v48 = vpop.xlane.xlu1 %4859 }
 0x525   : > { %v4946_v25 = vadd.f32 %v7873_v49, %v4857_v39  ;;  %v4947_v35 = vadd.f32 %v7873_v49, %v4860_v48 }
 0x527   : > { %5011 = vst.msk [vmem:[%s7879_s22 + $0x1b0] sm:$0xff] %vm4956_vm15, %v4946_v25  ;;  %5012 = vst.msk [vmem:[%s7879_s22 + $0x1b8] sm:$0xff] %vm4956_vm15, %v4947_v35 }
 0x528   : > { %v4863_v46 = vpop.xlane.xlu0 %4862  ;;  %v4866_v59 = vpop.xlane.xlu1 %4865 }
 0x529   : > { %v4948_v17 = vadd.f32 %v7873_v49, %v4863_v46  ;;  %v4949_v53 = vadd.f32 %v7873_v49, %v4866_v59 }
 0x52b   : > { %5013 = vst.msk [vmem:[%s7879_s22 + $0x1c0] sm:$0xff] %vm4956_vm15, %v4948_v17  ;;  %5014 = vst.msk [vmem:[%s7879_s22 + $0x1c8] sm:$0xff] %vm4956_vm15, %v4949_v53 }
 0x52c   : > { %v4869_v2 = vpop.xlane.xlu0 %4868  ;;  %v4872_v33 = vpop.xlane.xlu1 %4871 }
 0x52d   : > { %v4950_v42 = vadd.f32 %v7873_v49, %v4869_v2  ;;  %v4951_v0 = vadd.f32 %v7873_v49, %v4872_v33 }
 0x52f   : > { %5015 = vst.msk [vmem:[%s7879_s22 + $0x1d0] sm:$0xff] %vm4956_vm15, %v4950_v42  ;;  %5016 = vst.msk [vmem:[%s7879_s22 + $0x1d8] sm:$0xff] %vm4956_vm15, %v4951_v0 }
 0x530   : > { %v4875_v15 = vpop.xlane.xlu0 %4874  ;;  %v4878_v62 = vpop.xlane.xlu1 %4877 }
 0x531   : > { %v4952_v37 = vadd.f32 %v7873_v49, %v4875_v15  ;;  %v4953_v11 = vadd.f32 %v7873_v49, %v4878_v62 }
 0x533   : > { %5017 = vst.msk [vmem:[%s7879_s22 + $0x1e0] sm:$0xff] %vm4956_vm15, %v4952_v37  ;;  %5018 = vst.msk [vmem:[%s7879_s22 + $0x1e8] sm:$0xff] %vm4956_vm15, %v4953_v11 }
 0x534   : > { %v4884_v29 = vpop.xlane.xlu1 %4883  ;;  %v4881_v40 = vpop.xlane.xlu0 %4880 }
 0x535   : > { %v4955_v10 = vadd.f32 %v7873_v49, %v4884_v29  ;;  %v4954_v55 = vadd.f32 %v7873_v49, %v4881_v40 }
 0x537   : > { %5020 = vst.msk [vmem:[%s7879_s22 + $0x1f8] sm:$0xff] %vm4956_vm15, %v4955_v10  ;;  %5019 = vst.msk [vmem:[%s7879_s22 + $0x1f0] sm:$0xff] %vm4956_vm15, %v4954_v55 }
 0x538 PF: > { %s25_s27 = sadd.s32 1, %s6473_s27  }
 0x539   : > { %p22_p4 = scmp.ge.s32.totalorder %s25_s27, 4  }
 0x53b   :  { %24 = sbr.rel (!%p22_p4) target bundleno = 3 (0x3), region = 105 }

</bundles_post_ra>
